<compile_context>
chip_gen: v5e
topology: v5e:2x2
jax: 0.10.0
libtpu: 0.0.40
codegen_flags: <defaults>
</compile_context>

<pallas_src>
import jax
import jax.numpy as jnp
from jax.experimental import pallas as pl
from jax.experimental.pallas import tpu as pltpu

_LANE_PAD = 128  # pad layer-3/4 lane dim 64 -> 128 (lane-dense vregs)


def _critic_kernel(x_ref,
                   w1_ref, b1_ref,
                   w2_ref, b2_ref,
                   w3_ref, b3_ref,
                   w4_ref, b4_ref,
                   o_ref):
    """One batch tile of the full forward pass.  MXU operands in w*_ref.dtype,
    accumulation and all elementwise math (bias/ReLU/softmax) in f32."""
    cd = w1_ref.dtype                       # compute dtype for MXU operands (bf16 or f32)
    exact = cd == jnp.float32               # trace-time switch

    x = x_ref[...].astype(cd)

    # Linear(D, 512) + ReLU       (cast to cd immediately -> less spill before next dot)
    h1 = jnp.dot(x, w1_ref[...], preferred_element_type=jnp.float32) + b1_ref[...]
    h1 = jnp.maximum(h1, 0.0).astype(cd)

    # Linear(512, 256) + Softmax(dim=-1)   (max-subtracted, matches torch)
    z2 = jnp.dot(h1, w2_ref[...], preferred_element_type=jnp.float32) + b2_ref[...]
    z2 = z2 - jnp.max(z2, axis=-1, keepdims=True)
    e2 = jnp.exp(z2)
    denom = jnp.sum(e2, axis=-1, keepdims=True)
    if exact:
        h2 = (e2 / denom).astype(cd)                                   # exact f32 path
    else:
        h2 = (e2 * pl.reciprocal(denom, approx=True)).astype(cd)       # EUP slot, ~free

    # Linear(256, 64) + ReLU   (lane-padded to 128; padded lanes: ReLU(0 + 0) = 0)
    h3 = jnp.dot(h2, w3_ref[...], preferred_element_type=jnp.float32) + b3_ref[...]
    h3 = jnp.maximum(h3, 0.0)

    # Linear(64, 1) as a VPU multiply + cross-lane reduction (skip a K=64,N=1 MXU matmul)
    out = jnp.sum(h3 * w4_ref[...], axis=-1, keepdims=True) + b4_ref[...]
    o_ref[...] = out.astype(o_ref.dtype)


def init_params(key, input_dim):
    """Deterministic synthetic parameters in PyTorch-like layout:
    weights (in_features, out_features) f32, biases (1, out_features) f32."""
    dims = [(input_dim, 512), (512, 256), (256, 64), (64, 1)]
    params = []
    for i, (din, dout) in enumerate(dims):
        kw, kb = jax.random.split(jax.random.fold_in(key, i))
        scale = 1.0 / jnp.sqrt(jnp.float32(din))   # roughly torch default init
        w = jax.random.uniform(kw, (din, dout), jnp.float32, -scale, scale)
        b = jax.random.uniform(kb, (1, dout), jnp.float32, -scale, scale)
        params.append((w, b))
    return params


def prepare_params(params, compute_dtype=jnp.bfloat16):
    """One-time conversion to the kernel layout:
       * w1/w2/w3 cast to compute_dtype (bf16 default: halves weight DMA, feeds MXU natively)
       * layer-3/4 lane dim zero-padded 64 -> 128 (padded lanes stay exactly 0)
       * w4 stored as a (1, 128) f32 row for the VPU reduction
       * biases kept in f32."""
    (w1, b1), (w2, b2), (w3, b3), (w4, b4) = params
    din3 = w3.shape[0]
    w3p = jnp.zeros((din3, _LANE_PAD), jnp.float32).at[:, :64].set(w3)
    b3p = jnp.zeros((1, _LANE_PAD), jnp.float32).at[:, :64].set(b3.reshape(1, -1))
    w4row = jnp.zeros((1, _LANE_PAD), jnp.float32).at[:, :64].set(w4.reshape(1, -1))
    return (w1.astype(compute_dtype), b1.reshape(1, -1).astype(jnp.float32),
            w2.astype(compute_dtype), b2.reshape(1, -1).astype(jnp.float32),
            w3p.astype(compute_dtype), b3p.astype(jnp.float32),
            w4row.astype(jnp.float32), b4.reshape(1, 1).astype(jnp.float32))


def critic_forward(x_nchw, kparams):
    """x_nchw: (B, C, H, W), f32 or bf16 (bf16 recommended for large B: it halves the
    streamed-x HBM traffic).  kparams: output of prepare_params.  Returns (B, 1) f32."""
    B = x_nchw.shape[0]
    x_flat = x_nchw.reshape(B, -1)          # nn.Flatten; keep the producer's dtype
    D = x_flat.shape[1]

    w1, b1, w2, b2, w3, b3, w4, b4 = kparams

    # --- batch tile selection -------------------------------------------------------
    # 512 rows amortizes per-grid-step overhead; cap so the double-buffered x tile stays
    # under ~8 MiB for large flatten dims; tiny batches become a single round-to-8 tile.
    x_itemsize = x_flat.dtype.itemsize
    tb_cap = max(8, (int((8 * 2 ** 20) // max(1, 2 * D * x_itemsize)) // 8) * 8)
    TB = min(512, tb_cap)
    if B < TB:
        TB = max(8, ((B + 7) // 8) * 8)
    B_pad = ((B + TB - 1) // TB) * TB
    if B_pad != B:
        x_flat = jnp.pad(x_flat, ((0, B_pad - B), (0, 0)))
    grid = (B_pad // TB,)

    # --- VMEM budget (explicit limit: v5e scoped default is only 16 MiB) -------------
    w_itemsize = w1.dtype.itemsize
    est = (
        2 * TB * D * x_itemsize                                    # streamed x (2 bufs)
        + 2 * ((D * 512 + 512 * 256 + 256 * _LANE_PAD) * w_itemsize
               + (512 + 256 + 2 * _LANE_PAD + 1) * 4)              # weights/biases (worst case 2 bufs)
        + 2 * TB * 128 * 4                                         # (TB,1) output, lane-padded
        + TB * (512 + 256 + 2 * _LANE_PAD) * 4                     # f32 intermediates
    )
    vmem_limit = int(min(64 * 2 ** 20, max(32 * 2 ** 20, int(1.5 * est))))

    def _build(single_buffer_weights):
        res_kwargs = {}
        if single_buffer_weights:
            # Constant index_map -> loaded once; one buffer is enough, second is waste.
            res_kwargs["pipeline_mode"] = pl.Buffered(1)

        def resident(shape):
            return pl.BlockSpec(shape, lambda i: (0,) * len(shape), **res_kwargs)

        return pl.pallas_call(
            _critic_kernel,
            out_shape=jax.ShapeDtypeStruct((B_pad, 1), jnp.float32),
            grid=grid,
            in_specs=[
                pl.BlockSpec((TB, D), lambda i: (i, 0)),       # x: streamed per batch tile
                resident(w1.shape), resident(b1.shape),
                resident(w2.shape), resident(b2.shape),
                resident(w3.shape), resident(b3.shape),
                resident(w4.shape), resident(b4.shape),
            ],
            out_specs=pl.BlockSpec((TB, 1), lambda i: (i, 0)),
            compiler_params=pltpu.CompilerParams(
                # Splits batch tiles across TensorCores where supported (v7x). If "parallel"
                # turns out not to shard the grid on v7x, switch to pltpu.CORE_PARALLEL.
                dimension_semantics=("parallel",),
                vmem_limit_bytes=vmem_limit,
            ),
        )

    args = (x_flat, w1, b1, w2, b2, w3, b3, w4, b4)
    if hasattr(pl, "Buffered"):
        try:
            out = _build(True)(*args)
        except Exception:
            # Fallback: JAX build rejects single-buffered resident blocks -> default pipeline.
            out = _build(False)(*args)
    else:
        out = _build(False)(*args)

    return out[:B]


def _reference_forward(x_nchw, params):
    """Plain-JAX f32 reference of the same forward pass (for the sanity check)."""
    B = x_nchw.shape[0]
    h = x_nchw.reshape(B, -1)
    (w1, b1), (w2, b2), (w3, b3), (w4, b4) = params
    h = jnp.maximum(h @ w1 + b1, 0.0)
    h = jax.nn.softmax(h @ w2 + b2, axis=-1)
    h = jnp.maximum(h @ w3 + b3, 0.0)
    return h @ w4 + b4


if __name__ == "__main__":
    key = jax.random.PRNGKey(0)
    kx, kp = jax.random.split(key)

    # Small NCHW input: batch=2, channels=4, spatial=16 -> input_dim = 4*16*16 = 1024
    x = jax.random.normal(kx, (2, 4, 16, 16), jnp.float32)
    params = init_params(kp, input_dim=4 * 16 * 16)
    ref = _reference_forward(x, params)

    # Exact path: f32 weights, f32 activations, exact softmax division -> tight check.
    out_f32 = jax.block_until_ready(critic_forward(x, prepare_params(params, jnp.float32)))
    assert out_f32.shape == (2, 1), out_f32.shape
    assert jnp.allclose(out_f32, ref, atol=1e-3, rtol=1e-3), (out_f32, ref)

    # Production path: bf16 MXU operands AND bf16 streamed activations (the cast below
    # stands in for an upstream producer that already emits bf16), f32 accumulation.
    out_bf16 = jax.block_until_ready(
        critic_forward(x.astype(jnp.bfloat16), prepare_params(params)))
    assert out_bf16.shape == (2, 1), out_bf16.shape
    assert jnp.allclose(out_bf16, ref, atol=2e-2, rtol=2e-2), (out_bf16, ref)

    print("KERNEL_OK")
</pallas_src>

<mosaic_0001>
module attributes {stable_mosaic.version = 11 : i64} {
  func.func @_critic_kernel(%arg0: i32, %arg1: memref<8x1024xf32, #tpu.memory_space<vmem>>, %arg2: memref<1024x512xf32, #tpu.memory_space<vmem>>, %arg3: memref<1x512xf32, #tpu.memory_space<vmem>>, %arg4: memref<512x256xf32, #tpu.memory_space<vmem>>, %arg5: memref<1x256xf32, #tpu.memory_space<vmem>>, %arg6: memref<256x128xf32, #tpu.memory_space<vmem>>, %arg7: memref<1x128xf32, #tpu.memory_space<vmem>>, %arg8: memref<1x128xf32, #tpu.memory_space<vmem>>, %arg9: memref<1x1xf32, #tpu.memory_space<vmem>>, %arg10: memref<8x1xf32, #tpu.memory_space<vmem>>) attributes {dimension_semantics = [#tpu.dimension_semantics<parallel>], iteration_bounds = array<i64: 1>, scalar_prefetch = 0 : i64, scratch_operands = 0 : i64, tpu.core_type = #tpu.core_type<tc>, window_params = [{transform_indices = @transform_0, window_bounds = array<i64: 8, 1024>}, {pipeline_mode = #tpu.pipeline_mode<synchronous>, transform_indices = @transform_1, window_bounds = array<i64: 1024, 512>}, {pipeline_mode = #tpu.pipeline_mode<synchronous>, transform_indices = @transform_2, window_bounds = array<i64: 1, 512>}, {pipeline_mode = #tpu.pipeline_mode<synchronous>, transform_indices = @transform_3, window_bounds = array<i64: 512, 256>}, {pipeline_mode = #tpu.pipeline_mode<synchronous>, transform_indices = @transform_4, window_bounds = array<i64: 1, 256>}, {pipeline_mode = #tpu.pipeline_mode<synchronous>, transform_indices = @transform_5, window_bounds = array<i64: 256, 128>}, {pipeline_mode = #tpu.pipeline_mode<synchronous>, transform_indices = @transform_6, window_bounds = array<i64: 1, 128>}, {pipeline_mode = #tpu.pipeline_mode<synchronous>, transform_indices = @transform_7, window_bounds = array<i64: 1, 128>}, {pipeline_mode = #tpu.pipeline_mode<synchronous>, transform_indices = @transform_8, window_bounds = array<i64: 1, 1>}, {transform_indices = @transform_9, window_bounds = array<i64: 8, 1>}]} {
    %c0 = arith.constant 0 : index
    %c0_0 = arith.constant 0 : index
    %0 = vector.load %arg1[%c0, %c0_0] : memref<8x1024xf32, #tpu.memory_space<vmem>>, vector<8x1024xf32>
    %c0_1 = arith.constant 0 : index
    %c0_2 = arith.constant 0 : index
    %1 = vector.load %arg2[%c0_1, %c0_2] : memref<1024x512xf32, #tpu.memory_space<vmem>>, vector<1024x512xf32>
    %cst = arith.constant dense<0.000000e+00> : vector<8x512xf32>
    %2 = tpu.matmul %0, %1, %cst {dimension_numbers = #tpu.dot_dimension_numbers<[1], [0], [0], [1], [0, 0, 1, 1], [], []>} : vector<8x1024xf32>, vector<1024x512xf32>, vector<8x512xf32> -> vector<8x512xf32>
    %c0_3 = arith.constant 0 : index
    %c0_4 = arith.constant 0 : index
    %3 = vector.load %arg3[%c0_3, %c0_4] : memref<1x512xf32, #tpu.memory_space<vmem>>, vector<1x512xf32>
    %4 = vector.broadcast %3 : vector<1x512xf32> to vector<8x512xf32>
    %5 = arith.addf %2, %4 : vector<8x512xf32>
    %cst_5 = arith.constant 0.000000e+00 : f32
    %6 = vector.broadcast %cst_5 : f32 to vector<8x512xf32>
    %7 = arith.maximumf %5, %6 : vector<8x512xf32>
    %c0_6 = arith.constant 0 : index
    %c0_7 = arith.constant 0 : index
    %8 = vector.load %arg4[%c0_6, %c0_7] : memref<512x256xf32, #tpu.memory_space<vmem>>, vector<512x256xf32>
    %cst_8 = arith.constant dense<0.000000e+00> : vector<8x256xf32>
    %9 = tpu.matmul %7, %8, %cst_8 {dimension_numbers = #tpu.dot_dimension_numbers<[1], [0], [0], [1], [0, 0, 1, 1], [], []>} : vector<8x512xf32>, vector<512x256xf32>, vector<8x256xf32> -> vector<8x256xf32>
    %c0_9 = arith.constant 0 : index
    %c0_10 = arith.constant 0 : index
    %10 = vector.load %arg5[%c0_9, %c0_10] : memref<1x256xf32, #tpu.memory_space<vmem>>, vector<1x256xf32>
    %11 = vector.broadcast %10 : vector<1x256xf32> to vector<8x256xf32>
    %12 = arith.addf %9, %11 : vector<8x256xf32>
    %cst_11 = arith.constant dense<0xFF800000> : vector<8xf32>
    %13 = vector.multi_reduction <maximumf>, %12, %cst_11 [1] : vector<8x256xf32> to vector<8xf32>
    %14 = vector.shape_cast %13 : vector<8xf32> to vector<8x1xf32>
    %15 = vector.broadcast %14 : vector<8x1xf32> to vector<8x256xf32>
    %16 = arith.subf %12, %15 : vector<8x256xf32>
    %17 = math.exp %16 : vector<8x256xf32>
    %cst_12 = arith.constant dense<0.000000e+00> : vector<8xf32>
    %18 = vector.multi_reduction <add>, %17, %cst_12 [1] : vector<8x256xf32> to vector<8xf32>
    %19 = vector.shape_cast %18 : vector<8xf32> to vector<8x1xf32>
    %20 = vector.broadcast %19 : vector<8x1xf32> to vector<8x256xf32>
    %21 = arith.divf %17, %20 : vector<8x256xf32>
    %c0_13 = arith.constant 0 : index
    %c0_14 = arith.constant 0 : index
    %22 = vector.load %arg6[%c0_13, %c0_14] : memref<256x128xf32, #tpu.memory_space<vmem>>, vector<256x128xf32>
    %cst_15 = arith.constant dense<0.000000e+00> : vector<8x128xf32>
    %23 = tpu.matmul %21, %22, %cst_15 {dimension_numbers = #tpu.dot_dimension_numbers<[1], [0], [0], [1], [0, 0, 1, 1], [], []>} : vector<8x256xf32>, vector<256x128xf32>, vector<8x128xf32> -> vector<8x128xf32>
    %c0_16 = arith.constant 0 : index
    %c0_17 = arith.constant 0 : index
    %24 = vector.load %arg7[%c0_16, %c0_17] : memref<1x128xf32, #tpu.memory_space<vmem>>, vector<1x128xf32>
    %25 = vector.broadcast %24 : vector<1x128xf32> to vector<8x128xf32>
    %26 = arith.addf %23, %25 : vector<8x128xf32>
    %cst_18 = arith.constant 0.000000e+00 : f32
    %27 = vector.broadcast %cst_18 : f32 to vector<8x128xf32>
    %28 = arith.maximumf %26, %27 : vector<8x128xf32>
    %c0_19 = arith.constant 0 : index
    %c0_20 = arith.constant 0 : index
    %29 = vector.load %arg8[%c0_19, %c0_20] : memref<1x128xf32, #tpu.memory_space<vmem>>, vector<1x128xf32>
    %30 = vector.broadcast %29 : vector<1x128xf32> to vector<8x128xf32>
    %31 = arith.mulf %28, %30 : vector<8x128xf32>
    %cst_21 = arith.constant dense<0.000000e+00> : vector<8xf32>
    %32 = vector.multi_reduction <add>, %31, %cst_21 [1] : vector<8x128xf32> to vector<8xf32>
    %33 = vector.shape_cast %32 : vector<8xf32> to vector<8x1xf32>
    %c0_22 = arith.constant 0 : index
    %c0_23 = arith.constant 0 : index
    %34 = vector.load %arg9[%c0_22, %c0_23] : memref<1x1xf32, #tpu.memory_space<vmem>>, vector<1x1xf32>
    %35 = vector.broadcast %34 : vector<1x1xf32> to vector<8x1xf32>
    %36 = arith.addf %33, %35 : vector<8x1xf32>
    %c0_24 = arith.constant 0 : index
    %c0_25 = arith.constant 0 : index
    %37 = vector.load %arg10[%c0_24, %c0_25] : memref<8x1xf32, #tpu.memory_space<vmem>>, vector<8x1xf32>
    tpu.vector_store %arg10[%c0_24, %c0_25], %36 {strides = array<i32>} : memref<8x1xf32, #tpu.memory_space<vmem>>, vector<8x1xf32>,
    return
  }
  func.func @transform_0(%arg0: i32) -> (i32, i32) {
    %c0_i32 = arith.constant 0 : i32
    %c0_i32_0 = arith.constant 0 : i32
    return %arg0, %c0_i32 : i32, i32
  }
  func.func @transform_1(%arg0: i32) -> (i32, i32) {
    %c0_i32 = arith.constant 0 : i32
    %c0_i32_0 = arith.constant 0 : i32
    %c0_i32_1 = arith.constant 0 : i32
    return %c0_i32, %c0_i32_0 : i32, i32
  }
  func.func @transform_2(%arg0: i32) -> (i32, i32) {
    %c0_i32 = arith.constant 0 : i32
    %c0_i32_0 = arith.constant 0 : i32
    %c0_i32_1 = arith.constant 0 : i32
    return %c0_i32, %c0_i32_0 : i32, i32
  }
  func.func @transform_3(%arg0: i32) -> (i32, i32) {
    %c0_i32 = arith.constant 0 : i32
    %c0_i32_0 = arith.constant 0 : i32
    %c0_i32_1 = arith.constant 0 : i32
    return %c0_i32, %c0_i32_0 : i32, i32
  }
  func.func @transform_4(%arg0: i32) -> (i32, i32) {
    %c0_i32 = arith.constant 0 : i32
    %c0_i32_0 = arith.constant 0 : i32
    %c0_i32_1 = arith.constant 0 : i32
    return %c0_i32, %c0_i32_0 : i32, i32
  }
  func.func @transform_5(%arg0: i32) -> (i32, i32) {
    %c0_i32 = arith.constant 0 : i32
    %c0_i32_0 = arith.constant 0 : i32
    %c0_i32_1 = arith.constant 0 : i32
    return %c0_i32, %c0_i32_0 : i32, i32
  }
  func.func @transform_6(%arg0: i32) -> (i32, i32) {
    %c0_i32 = arith.constant 0 : i32
    %c0_i32_0 = arith.constant 0 : i32
    %c0_i32_1 = arith.constant 0 : i32
    return %c0_i32, %c0_i32_0 : i32, i32
  }
  func.func @transform_7(%arg0: i32) -> (i32, i32) {
    %c0_i32 = arith.constant 0 : i32
    %c0_i32_0 = arith.constant 0 : i32
    %c0_i32_1 = arith.constant 0 : i32
    return %c0_i32, %c0_i32_0 : i32, i32
  }
  func.func @transform_8(%arg0: i32) -> (i32, i32) {
    %c0_i32 = arith.constant 0 : i32
    %c0_i32_0 = arith.constant 0 : i32
    %c0_i32_1 = arith.constant 0 : i32
    return %c0_i32, %c0_i32_0 : i32, i32
  }
  func.func @transform_9(%arg0: i32) -> (i32, i32) {
    %c0_i32 = arith.constant 0 : i32
    %c0_i32_0 = arith.constant 0 : i32
    return %arg0, %c0_i32 : i32, i32
  }
}

module attributes {stable_mosaic.version = 11 : i64} {
  func.func @_critic_kernel(%arg0: i32, %arg1: memref<8x1024xf32, #tpu.memory_space<vmem>>, %arg2: memref<1024x512xf32, #tpu.memory_space<vmem>>, %arg3: memref<1x512xf32, #tpu.memory_space<vmem>>, %arg4: memref<512x256xf32, #tpu.memory_space<vmem>>, %arg5: memref<1x256xf32, #tpu.memory_space<vmem>>, %arg6: memref<256x128xf32, #tpu.memory_space<vmem>>, %arg7: memref<1x128xf32, #tpu.memory_space<vmem>>, %arg8: memref<1x128xf32, #tpu.memory_space<vmem>>, %arg9: memref<1x1xf32, #tpu.memory_space<vmem>>, %arg10: memref<8x1xf32, #tpu.memory_space<vmem>>) attributes {dimension_semantics = [#tpu.dimension_semantics<parallel>], iteration_bounds = array<i64: 1>, scalar_prefetch = 0 : i64, scratch_operands = 0 : i64, tpu.core_type = #tpu.core_type<tc>, window_params = [{transform_indices = @transform_0, window_bounds = array<i64: 8, 1024>}, {pipeline_mode = #tpu.pipeline_mode<synchronous>, transform_indices = @transform_1, window_bounds = array<i64: 1024, 512>}, {pipeline_mode = #tpu.pipeline_mode<synchronous>, transform_indices = @transform_2, window_bounds = array<i64: 1, 512>}, {pipeline_mode = #tpu.pipeline_mode<synchronous>, transform_indices = @transform_3, window_bounds = array<i64: 512, 256>}, {pipeline_mode = #tpu.pipeline_mode<synchronous>, transform_indices = @transform_4, window_bounds = array<i64: 1, 256>}, {pipeline_mode = #tpu.pipeline_mode<synchronous>, transform_indices = @transform_5, window_bounds = array<i64: 256, 128>}, {pipeline_mode = #tpu.pipeline_mode<synchronous>, transform_indices = @transform_6, window_bounds = array<i64: 1, 128>}, {pipeline_mode = #tpu.pipeline_mode<synchronous>, transform_indices = @transform_7, window_bounds = array<i64: 1, 128>}, {pipeline_mode = #tpu.pipeline_mode<synchronous>, transform_indices = @transform_8, window_bounds = array<i64: 1, 1>}, {transform_indices = @transform_9, window_bounds = array<i64: 8, 1>}]} {
    %c0 = arith.constant 0 : index
    %c0_0 = arith.constant 0 : index
    %0 = vector.load %arg1[%c0, %c0_0] : memref<8x1024xf32, #tpu.memory_space<vmem>>, vector<8x1024xf32>
    %c0_1 = arith.constant 0 : index
    %c0_2 = arith.constant 0 : index
    %1 = vector.load %arg2[%c0_1, %c0_2] : memref<1024x512xf32, #tpu.memory_space<vmem>>, vector<1024x512xf32>
    %cst = arith.constant dense<0.000000e+00> : vector<8x512xf32>
    %2 = tpu.matmul %0, %1, %cst {dimension_numbers = #tpu.dot_dimension_numbers<[1], [0], [0], [1], [0, 0, 1, 1], [], []>} : vector<8x1024xf32>, vector<1024x512xf32>, vector<8x512xf32> -> vector<8x512xf32>
    %c0_3 = arith.constant 0 : index
    %c0_4 = arith.constant 0 : index
    %3 = vector.load %arg3[%c0_3, %c0_4] : memref<1x512xf32, #tpu.memory_space<vmem>>, vector<1x512xf32>
    %4 = vector.broadcast %3 : vector<1x512xf32> to vector<8x512xf32>
    %5 = arith.addf %2, %4 : vector<8x512xf32>
    %cst_5 = arith.constant 0.000000e+00 : f32
    %6 = vector.broadcast %cst_5 : f32 to vector<8x512xf32>
    %7 = arith.maximumf %5, %6 : vector<8x512xf32>
    %c0_6 = arith.constant 0 : index
    %c0_7 = arith.constant 0 : index
    %8 = vector.load %arg4[%c0_6, %c0_7] : memref<512x256xf32, #tpu.memory_space<vmem>>, vector<512x256xf32>
    %cst_8 = arith.constant dense<0.000000e+00> : vector<8x256xf32>
    %9 = tpu.matmul %7, %8, %cst_8 {dimension_numbers = #tpu.dot_dimension_numbers<[1], [0], [0], [1], [0, 0, 1, 1], [], []>} : vector<8x512xf32>, vector<512x256xf32>, vector<8x256xf32> -> vector<8x256xf32>
    %c0_9 = arith.constant 0 : index
    %c0_10 = arith.constant 0 : index
    %10 = vector.load %arg5[%c0_9, %c0_10] : memref<1x256xf32, #tpu.memory_space<vmem>>, vector<1x256xf32>
    %11 = vector.broadcast %10 : vector<1x256xf32> to vector<8x256xf32>
    %12 = arith.addf %9, %11 : vector<8x256xf32>
    %cst_11 = arith.constant dense<0xFF800000> : vector<8xf32>
    %13 = vector.multi_reduction <maximumf>, %12, %cst_11 [1] : vector<8x256xf32> to vector<8xf32>
    %14 = vector.shape_cast %13 : vector<8xf32> to vector<8x1xf32>
    %15 = vector.broadcast %14 : vector<8x1xf32> to vector<8x256xf32>
    %16 = arith.subf %12, %15 : vector<8x256xf32>
    %17 = math.exp %16 : vector<8x256xf32>
    %cst_12 = arith.constant dense<0.000000e+00> : vector<8xf32>
    %18 = vector.multi_reduction <add>, %17, %cst_12 [1] : vector<8x256xf32> to vector<8xf32>
    %19 = vector.shape_cast %18 : vector<8xf32> to vector<8x1xf32>
    %20 = vector.broadcast %19 : vector<8x1xf32> to vector<8x256xf32>
    %21 = arith.divf %17, %20 : vector<8x256xf32>
    %c0_13 = arith.constant 0 : index
    %c0_14 = arith.constant 0 : index
    %22 = vector.load %arg6[%c0_13, %c0_14] : memref<256x128xf32, #tpu.memory_space<vmem>>, vector<256x128xf32>
    %cst_15 = arith.constant dense<0.000000e+00> : vector<8x128xf32>
    %23 = tpu.matmul %21, %22, %cst_15 {dimension_numbers = #tpu.dot_dimension_numbers<[1], [0], [0], [1], [0, 0, 1, 1], [], []>} : vector<8x256xf32>, vector<256x128xf32>, vector<8x128xf32> -> vector<8x128xf32>
    %c0_16 = arith.constant 0 : index
    %c0_17 = arith.constant 0 : index
    %24 = vector.load %arg7[%c0_16, %c0_17] : memref<1x128xf32, #tpu.memory_space<vmem>>, vector<1x128xf32>
    %25 = vector.broadcast %24 : vector<1x128xf32> to vector<8x128xf32>
    %26 = arith.addf %23, %25 : vector<8x128xf32>
    %cst_18 = arith.constant 0.000000e+00 : f32
    %27 = vector.broadcast %cst_18 : f32 to vector<8x128xf32>
    %28 = arith.maximumf %26, %27 : vector<8x128xf32>
    %c0_19 = arith.constant 0 : index
    %c0_20 = arith.constant 0 : index
    %29 = vector.load %arg8[%c0_19, %c0_20] : memref<1x128xf32, #tpu.memory_space<vmem>>, vector<1x128xf32>
    %30 = vector.broadcast %29 : vector<1x128xf32> to vector<8x128xf32>
    %31 = arith.mulf %28, %30 : vector<8x128xf32>
    %cst_21 = arith.constant dense<0.000000e+00> : vector<8xf32>
    %32 = vector.multi_reduction <add>, %31, %cst_21 [1] : vector<8x128xf32> to vector<8xf32>
    %33 = vector.shape_cast %32 : vector<8xf32> to vector<8x1xf32>
    %c0_22 = arith.constant 0 : index
    %c0_23 = arith.constant 0 : index
    %34 = vector.load %arg9[%c0_22, %c0_23] : memref<1x1xf32, #tpu.memory_space<vmem>>, vector<1x1xf32>
    %35 = vector.broadcast %34 : vector<1x1xf32> to vector<8x1xf32>
    %36 = arith.addf %33, %35 : vector<8x1xf32>
    %c0_24 = arith.constant 0 : index
    %c0_25 = arith.constant 0 : index
    %37 = vector.load %arg10[%c0_24, %c0_25] : memref<8x1xf32, #tpu.memory_space<vmem>>, vector<8x1xf32>
    tpu.vector_store %arg10[%c0_24, %c0_25], %36 {strides = array<i32>} : memref<8x1xf32, #tpu.memory_space<vmem>>, vector<8x1xf32>,
    return
  }
  func.func @transform_0(%arg0: i32) -> (i32, i32) {
    %c0_i32 = arith.constant 0 : i32
    %c0_i32_0 = arith.constant 0 : i32
    return %arg0, %c0_i32 : i32, i32
  }
  func.func @transform_1(%arg0: i32) -> (i32, i32) {
    %c0_i32 = arith.constant 0 : i32
    %c0_i32_0 = arith.constant 0 : i32
    %c0_i32_1 = arith.constant 0 : i32
    return %c0_i32, %c0_i32_0 : i32, i32
  }
  func.func @transform_2(%arg0: i32) -> (i32, i32) {
    %c0_i32 = arith.constant 0 : i32
    %c0_i32_0 = arith.constant 0 : i32
    %c0_i32_1 = arith.constant 0 : i32
    return %c0_i32, %c0_i32_0 : i32, i32
  }
  func.func @transform_3(%arg0: i32) -> (i32, i32) {
    %c0_i32 = arith.constant 0 : i32
    %c0_i32_0 = arith.constant 0 : i32
    %c0_i32_1 = arith.constant 0 : i32
    return %c0_i32, %c0_i32_0 : i32, i32
  }
  func.func @transform_4(%arg0: i32) -> (i32, i32) {
    %c0_i32 = arith.constant 0 : i32
    %c0_i32_0 = arith.constant 0 : i32
    %c0_i32_1 = arith.constant 0 : i32
    return %c0_i32, %c0_i32_0 : i32, i32
  }
  func.func @transform_5(%arg0: i32) -> (i32, i32) {
    %c0_i32 = arith.constant 0 : i32
    %c0_i32_0 = arith.constant 0 : i32
    %c0_i32_1 = arith.constant 0 : i32
    return %c0_i32, %c0_i32_0 : i32, i32
  }
  func.func @transform_6(%arg0: i32) -> (i32, i32) {
    %c0_i32 = arith.constant 0 : i32
    %c0_i32_0 = arith.constant 0 : i32
    %c0_i32_1 = arith.constant 0 : i32
    return %c0_i32, %c0_i32_0 : i32, i32
  }
  func.func @transform_7(%arg0: i32) -> (i32, i32) {
    %c0_i32 = arith.constant 0 : i32
    %c0_i32_0 = arith.constant 0 : i32
    %c0_i32_1 = arith.constant 0 : i32
    return %c0_i32, %c0_i32_0 : i32, i32
  }
  func.func @transform_8(%arg0: i32) -> (i32, i32) {
    %c0_i32 = arith.constant 0 : i32
    %c0_i32_0 = arith.constant 0 : i32
    %c0_i32_1 = arith.constant 0 : i32
    return %c0_i32, %c0_i32_0 : i32, i32
  }
  func.func @transform_9(%arg0: i32) -> (i32, i32) {
    %c0_i32 = arith.constant 0 : i32
    %c0_i32_0 = arith.constant 0 : i32
    return %arg0, %c0_i32 : i32, i32
  }
}

</mosaic_0001>

<bundles_post_ra>
// kernel: tpu_custom_call.1
= control target key start
LH: loop header
LB: loop body
LE: loop exit
PB: predicated region body
PF: predicated region fallthrough
CT: control target
= control target key end

     0   :  { %s2162_s0 = inlined_call_operand.hbm [shape: f32[8,1024], index: 0, kind: input, shape index: {}]   ;;  %s2163_s1 = inlined_call_operand.hbm [shape: f32[1024,512], index: 1, kind: input, shape index: {}]   ;;  %s2164_s2 = inlined_call_operand.hbm [shape: f32[1,512], index: 2, kind: input, shape index: {}]   ;;  %s2165_s3 = inlined_call_operand.hbm [shape: f32[512,256], index: 3, kind: input, shape index: {}]   ;;  %s2166_s4 = inlined_call_operand.hbm [shape: f32[1,256], index: 4, kind: input, shape index: {}]   ;;  %s2167_s5 = inlined_call_operand.hbm [shape: f32[256,128], index: 5, kind: input, shape index: {}]   ;;  %s2168_s6 = inlined_call_operand.hbm [shape: f32[1,128], index: 6, kind: input, shape index: {}]   ;;  %s2169_s7 = inlined_call_operand.hbm [shape: f32[1,128], index: 7, kind: input, shape index: {}]   ;;  %s2170_s8 = inlined_call_operand.<no memory space> [shape: f32[1,1], index: 8, kind: input, shape index: {}]   ;;  %s2171_s9 = inlined_call_operand.vmem [shape: f32[8,1], index: 9, kind: output, shape index: {}]  }
   0x1   :  { %v14_v0 = vstv %s2170_s8 }
   0x2   :  { %15 = vst [vmem:[#allocation2] sm:$0x1] %v14_v0 }
   0x3   :  { %16 = vsyncpa [#allocation4], 0 }
   0x4   :  { %17 = vsyncpa [#allocation6], 0 }
   0x5   :  { %18 = vsyncpa [#allocation9], 0 }
   0x6   :  { %19 = vsyncpa [#allocation12], 0  ;;  %s36_s13 = sshll.u32 %s2163_s1, 4  ;;  %s37_s13 = int_to_ptr.hbm [resolvable:$true] %s36_s13 }
   0x7   :  { %20 = vsyncpa [#allocation15], 0  ;;  %s1978_s14 = smov [#allocation5]   ;;  %s60_s18 = sshll.u32 %s2165_s3, 4  ;;  %s61_s18 = int_to_ptr.hbm [resolvable:$true] %s60_s18 }
   0x8   :  { %s38_s15 = sshll.u32 %s1978_s14, 4  ;;  %s1979_s19 = smov 512   ;;  %s39_s15 = int_to_ptr.vmem [resolvable:$true] %s38_s15 }
   0x9   :  { %s1980_s8 = smov 32   ;;  %s1981_s20 = smov [#allocation8]  }
   0xa   :  { %44 = dma.hbm_to_vmem [thread:$0]  %s37_s13, 65536, %s39_s15, [#allocation6], %s1979_s19, %s1979_s19, %s1980_s8  }
   0xb   :  { %s62_s21 = sshll.u32 %s1981_s20, 4  ;;  %s1982_s22 = smov 256   ;;  %s63_s21 = int_to_ptr.vmem [resolvable:$true] %s62_s21 }
   0xc   :  { %s1983_s23 = smov 16   ;;  %s84_s25 = sshll.u32 %s2167_s5, 4  ;;  %s85_s25 = int_to_ptr.hbm [resolvable:$true] %s84_s25 }
   0xd   :  { %68 = dma.hbm_to_vmem [thread:$0]  %s61_s18, 16384, %s63_s21, [#allocation9], %s1982_s22, %s1982_s22, %s1983_s23  }
   0xe   :  { %s1984_s26 = smov [#allocation11]   ;;  %s26_s29 = sshll.u32 %s2162_s0, 4  ;;  %s27_s29 = int_to_ptr.hbm [resolvable:$true] %s26_s29 }
   0xf   :  { %s86_s27 = sshll.u32 %s1984_s26, 4  ;;  %s1985_s30 = smov 128   ;;  %s87_s27 = int_to_ptr.vmem [resolvable:$true] %s86_s27 }
  0x10   :  { %s1986_s10 = smov 8   ;;  %s1987_s11 = smov [#allocation3]  }
  0x11   :  { %92 = dma.hbm_to_vmem [thread:$0]  %s85_s25, 4096, %s87_s27, [#allocation12], %s1985_s30, %s1985_s30, %s1986_s10  }
  0x12   :  { %s28_s12 = sshll.u32 %s1987_s11, 4  ;;  %s50_s15 = sshll.u32 %s2164_s2, 4  ;;  %s29_s12 = int_to_ptr.vmem [resolvable:$true] %s28_s12  ;;  %s51_s15 = int_to_ptr.hbm [resolvable:$true] %s50_s15 }
  0x13   :  { %31 = dma.hbm_to_vmem [thread:$0]  %s27_s29, 1024, %s29_s12, [#allocation4]  }
  0x14   :  { %s74_s17 = sshll.u32 %s2166_s4, 4  ;;  %s1988_s18 = smov [#allocation7]   ;;  %s75_s17 = int_to_ptr.hbm [resolvable:$true] %s74_s17 }
  0x15   :  { %s52_s19 = sshll.u32 %s1988_s18, 4  ;;  %s1989_s0 = smov [#allocation10]   ;;  %s53_s19 = int_to_ptr.vmem [resolvable:$true] %s52_s19 }
  0x16   :  { %55 = dma.hbm_to_vmem [thread:$0]  %s51_s15, 64, %s53_s19, [#allocation6]  }
  0x17   :  { %s76_s8 = sshll.u32 %s1989_s0, 4  ;;  %s98_s22 = sshll.u32 %s2168_s6, 4  ;;  %s77_s8 = int_to_ptr.vmem [resolvable:$true] %s76_s8  ;;  %s99_s22 = int_to_ptr.hbm [resolvable:$true] %s98_s22 }
  0x18   :  { %79 = dma.hbm_to_vmem [thread:$0]  %s75_s17, 32, %s77_s8, [#allocation9]  }
  0x19   :  { %s109_s1 = sshll.u32 %s2169_s7, 4  ;;  %s1990_s24 = smov [#allocation13]   ;;  %s110_s1 = int_to_ptr.hbm [resolvable:$true] %s109_s1 }
  0x1a   :  { %s100_s4 = sshll.u32 %s1990_s24, 4  ;;  %s1991_s25 = smov [#allocation14]   ;;  %s101_s4 = int_to_ptr.vmem [resolvable:$true] %s100_s4 }
  0x1b   :  { %103 = dma.hbm_to_vmem [thread:$0]  %s99_s22, 16, %s101_s4, [#allocation12]  }
  0x1c   :  { %s111_s26 = sshll.u32 %s1991_s25, 4  ;;  %s112_s26 = int_to_ptr.vmem [resolvable:$true] %s111_s26 }
  0x1d   :  { %114 = dma.hbm_to_vmem [thread:$0]  %s110_s1, 16, %s112_s26, [#allocation15]  }
  0x1e   :  { %1968 = dma.done.wait [#allocation4], 1024  }
  0x1f   :  { %1969 = vsyncadd [#allocation4], 4294966272 }
  0x20   :  { %1970 = dma.done.wait [#allocation6], 65600  }
  0x21   :  { %1971 = vsyncadd [#allocation6], 4294901696 }
  0x22   :  { %1972 = dma.done.wait [#allocation9], 16416  }
  0x23   :  { %1973 = vsyncadd [#allocation9], 4294950880 }
  0x24   :  { %1974 = dma.done.wait [#allocation12], 4112  }
  0x25   :  { %1975 = vsyncadd [#allocation12], 4294963184 }
  0x26   :  { %1976 = dma.done.wait [#allocation15], 16  }
  0x27   :  { %1977 = vsyncadd [#allocation15], 4294967280  ;;  %v217_v1 = vld [vmem:[#allocation5 + $0x1e0] sm:$0xff]  ;;  %vm1734_vm4 = vcmask 7168  }
  0x28   :  { %v281_v2 = vld [vmem:[#allocation5 + $0x3e0] sm:$0xff]  ;;  %679 = vmatpush.msra.mxu0 %v217_v1 }
  0x29   :  { %v345_v3 = vld [vmem:[#allocation5 + $0x5e0] sm:$0xff]  ;;  %699 = vmatpush.msra.mxu1 %v281_v2 }
  0x2a   :  { %v213_v4 = vld [vmem:[#allocation5 + $0x1c0] sm:$0xff]  ;;  %719 = vmatpush.msra.mxu2 %v345_v3 }
  0x2b   :  { %v277_v5 = vld [vmem:[#allocation5 + $0x3c0] sm:$0xff]  ;;  %680 = vmatpush.msra.mxu0 %v213_v4 }
  0x2c   :  { %v341_v6 = vld [vmem:[#allocation5 + $0x5c0] sm:$0xff]  ;;  %700 = vmatpush.msra.mxu1 %v277_v5 }
  0x2d   :  { %v409_v7 = vld [vmem:[#allocation5 + $0x7e0] sm:$0xff]  ;;  %720 = vmatpush.msra.mxu2 %v341_v6 }
  0x2e   :  { %v209_v8 = vld [vmem:[#allocation5 + $0x1a0] sm:$0xff]  ;;  %739 = vmatpush.msra.mxu3 %v409_v7 }
  0x2f   :  { %v273_v9 = vld [vmem:[#allocation5 + $0x3a0] sm:$0xff]  ;;  %681 = vmatpush.msra.mxu0 %v209_v8 }
  0x30   :  { %v337_v10 = vld [vmem:[#allocation5 + $0x5a0] sm:$0xff]  ;;  %701 = vmatpush.msra.mxu1 %v273_v9 }
  0x31   :  { %v405_v11 = vld [vmem:[#allocation5 + $0x7c0] sm:$0xff]  ;;  %721 = vmatpush.msra.mxu2 %v337_v10 }
  0x32   :  { %v205_v12 = vld [vmem:[#allocation5 + $0x180] sm:$0xff]  ;;  %740 = vmatpush.msra.mxu3 %v405_v11 }
  0x33   :  { %v269_v13 = vld [vmem:[#allocation5 + $0x380] sm:$0xff]  ;;  %682 = vmatpush.msra.mxu0 %v205_v12 }
  0x34   :  { %v333_v14 = vld [vmem:[#allocation5 + $0x580] sm:$0xff]  ;;  %702 = vmatpush.msra.mxu1 %v269_v13 }
  0x35   :  { %v401_v15 = vld [vmem:[#allocation5 + $0x7a0] sm:$0xff]  ;;  %722 = vmatpush.msra.mxu2 %v333_v14 }
  0x36   :  { %v201_v16 = vld [vmem:[#allocation5 + $0x160] sm:$0xff]  ;;  %741 = vmatpush.msra.mxu3 %v401_v15 }
  0x37   :  { %v265_v17 = vld [vmem:[#allocation5 + $0x360] sm:$0xff]  ;;  %683 = vmatpush.msra.mxu0 %v201_v16 }
  0x38   :  { %v329_v18 = vld [vmem:[#allocation5 + $0x560] sm:$0xff]  ;;  %703 = vmatpush.msra.mxu1 %v265_v17 }
  0x39   :  { %v397_v19 = vld [vmem:[#allocation5 + $0x780] sm:$0xff]  ;;  %723 = vmatpush.msra.mxu2 %v329_v18 }
  0x3a   :  { %v197_v20 = vld [vmem:[#allocation5 + $0x140] sm:$0xff]  ;;  %742 = vmatpush.msra.mxu3 %v397_v19 }
  0x3b   :  { %v261_v21 = vld [vmem:[#allocation5 + $0x340] sm:$0xff]  ;;  %684 = vmatpush.msra.mxu0 %v197_v20 }
  0x3c   :  { %v325_v22 = vld [vmem:[#allocation5 + $0x540] sm:$0xff]  ;;  %704 = vmatpush.msra.mxu1 %v261_v21 }
  0x3d   :  { %v393_v23 = vld [vmem:[#allocation5 + $0x760] sm:$0xff]  ;;  %724 = vmatpush.msra.mxu2 %v325_v22 }
  0x3e   :  { %v193_v24 = vld [vmem:[#allocation5 + $0x120] sm:$0xff]  ;;  %743 = vmatpush.msra.mxu3 %v393_v23 }
  0x3f   :  { %v257_v25 = vld [vmem:[#allocation5 + $0x320] sm:$0xff]  ;;  %685 = vmatpush.msra.mxu0 %v193_v24 }
  0x40   :  { %v321_v26 = vld [vmem:[#allocation5 + $0x520] sm:$0xff]  ;;  %705 = vmatpush.msra.mxu1 %v257_v25 }
  0x41   :  { %v389_v27 = vld [vmem:[#allocation5 + $0x740] sm:$0xff]  ;;  %725 = vmatpush.msra.mxu2 %v321_v26 }
  0x42   :  { %v189_v28 = vld [vmem:[#allocation5 + $0x100] sm:$0xff]  ;;  %744 = vmatpush.msra.mxu3 %v389_v27 }
  0x43   :  { %v253_v29 = vld [vmem:[#allocation5 + $0x300] sm:$0xff]  ;;  %686 = vmatpush.msra.mxu0 %v189_v28 }
  0x44   :  { %v317_v30 = vld [vmem:[#allocation5 + $0x500] sm:$0xff]  ;;  %706 = vmatpush.msra.mxu1 %v253_v29 }
  0x45   :  { %v385_v31 = vld [vmem:[#allocation5 + $0x720] sm:$0xff]  ;;  %726 = vmatpush.msra.mxu2 %v317_v30 }
  0x46   :  { %v185_v32 = vld [vmem:[#allocation5 + $0xe0] sm:$0xff]  ;;  %745 = vmatpush.msra.mxu3 %v385_v31 }
  0x47   :  { %v249_v33 = vld [vmem:[#allocation5 + $0x2e0] sm:$0xff]  ;;  %687 = vmatpush.msra.mxu0 %v185_v32 }
  0x48   :  { %v313_v34 = vld [vmem:[#allocation5 + $0x4e0] sm:$0xff]  ;;  %707 = vmatpush.msra.mxu1 %v249_v33 }
  0x49   :  { %v381_v35 = vld [vmem:[#allocation5 + $0x700] sm:$0xff]  ;;  %727 = vmatpush.msra.mxu2 %v313_v34 }
  0x4a   :  { %v181_v36 = vld [vmem:[#allocation5 + $0xc0] sm:$0xff]  ;;  %746 = vmatpush.msra.mxu3 %v381_v35 }
  0x4b   :  { %v245_v37 = vld [vmem:[#allocation5 + $0x2c0] sm:$0xff]  ;;  %688 = vmatpush.msra.mxu0 %v181_v36 }
  0x4c   :  { %v309_v38 = vld [vmem:[#allocation5 + $0x4c0] sm:$0xff]  ;;  %708 = vmatpush.msra.mxu1 %v245_v37 }
  0x4d   :  { %v377_v39 = vld [vmem:[#allocation5 + $0x6e0] sm:$0xff]  ;;  %728 = vmatpush.msra.mxu2 %v309_v38 }
  0x4e   :  { %v177_v40 = vld [vmem:[#allocation5 + $0xa0] sm:$0xff]  ;;  %747 = vmatpush.msra.mxu3 %v377_v39 }
  0x4f   :  { %v241_v41 = vld [vmem:[#allocation5 + $0x2a0] sm:$0xff]  ;;  %689 = vmatpush.msra.mxu0 %v177_v40 }
  0x50   :  { %v305_v42 = vld [vmem:[#allocation5 + $0x4a0] sm:$0xff]  ;;  %709 = vmatpush.msra.mxu1 %v241_v41 }
  0x51   :  { %v373_v43 = vld [vmem:[#allocation5 + $0x6c0] sm:$0xff]  ;;  %729 = vmatpush.msra.mxu2 %v305_v42 }
  0x52   :  { %v173_v44 = vld [vmem:[#allocation5 + $0x80] sm:$0xff]  ;;  %748 = vmatpush.msra.mxu3 %v373_v43 }
  0x53   :  { %v237_v45 = vld [vmem:[#allocation5 + $0x280] sm:$0xff]  ;;  %690 = vmatpush.msra.mxu0 %v173_v44 }
  0x54   :  { %v301_v46 = vld [vmem:[#allocation5 + $0x480] sm:$0xff]  ;;  %710 = vmatpush.msra.mxu1 %v237_v45 }
  0x55   :  { %v369_v47 = vld [vmem:[#allocation5 + $0x6a0] sm:$0xff]  ;;  %730 = vmatpush.msra.mxu2 %v301_v46 }
  0x56   :  { %v169_v48 = vld [vmem:[#allocation5 + $0x60] sm:$0xff]  ;;  %749 = vmatpush.msra.mxu3 %v369_v47 }
  0x57   :  { %v233_v49 = vld [vmem:[#allocation5 + $0x260] sm:$0xff]  ;;  %691 = vmatpush.msra.mxu0 %v169_v48 }
  0x58   :  { %v297_v50 = vld [vmem:[#allocation5 + $0x460] sm:$0xff]  ;;  %711 = vmatpush.msra.mxu1 %v233_v49 }
  0x59   :  { %v365_v51 = vld [vmem:[#allocation5 + $0x680] sm:$0xff]  ;;  %731 = vmatpush.msra.mxu2 %v297_v50 }
  0x5a   :  { %v165_v52 = vld [vmem:[#allocation5 + $0x40] sm:$0xff]  ;;  %750 = vmatpush.msra.mxu3 %v365_v51 }
  0x5b   :  { %v229_v53 = vld [vmem:[#allocation5 + $0x240] sm:$0xff]  ;;  %692 = vmatpush.msra.mxu0 %v165_v52 }
  0x5c   :  { %v293_v54 = vld [vmem:[#allocation5 + $0x440] sm:$0xff]  ;;  %712 = vmatpush.msra.mxu1 %v229_v53 }
  0x5d   :  { %v361_v55 = vld [vmem:[#allocation5 + $0x660] sm:$0xff]  ;;  %732 = vmatpush.msra.mxu2 %v293_v54 }
  0x5e   :  { %v161_v56 = vld [vmem:[#allocation5 + $0x20] sm:$0xff]  ;;  %751 = vmatpush.msra.mxu3 %v361_v55 }
  0x5f   :  { %v225_v57 = vld [vmem:[#allocation5 + $0x220] sm:$0xff]  ;;  %693 = vmatpush.msra.mxu0 %v161_v56 }
  0x60   :  { %v289_v58 = vld [vmem:[#allocation5 + $0x420] sm:$0xff]  ;;  %713 = vmatpush.msra.mxu1 %v225_v57 }
  0x61   :  { %v357_v59 = vld [vmem:[#allocation5 + $0x640] sm:$0xff]  ;;  %733 = vmatpush.msra.mxu2 %v289_v58 }
  0x62   :  { %v157_v60 = vld [vmem:[#allocation5] sm:$0xff]  ;;  %752 = vmatpush.msra.mxu3 %v357_v59 }
  0x63   :  { %v221_v61 = vld [vmem:[#allocation5 + $0x200] sm:$0xff]  ;;  %694 = vmatpush.msra.mxu0 %v157_v60 }
  0x64   :  { %v285_v62 = vld [vmem:[#allocation5 + $0x400] sm:$0xff]  ;;  %714 = vmatpush.msra.mxu1 %v221_v61 }
  0x65   :  { %v353_v63 = vld [vmem:[#allocation5 + $0x620] sm:$0xff]  ;;  %734 = vmatpush.msra.mxu2 %v285_v62 }
  0x66   :  { %v473_v0 = vld [vmem:[#allocation5 + $0x9e0] sm:$0xff]  ;;  %753 = vmatpush.msra.mxu3 %v353_v63 }
  0x67   :  { %v537_v1 = vld [vmem:[#allocation5 + $0xbe0] sm:$0xff]  ;;  %759 = vmatpush.msrb.mxu0 %v473_v0 }
  0x68   :  { %v601_v2 = vld [vmem:[#allocation5 + $0xde0] sm:$0xff]  ;;  %779 = vmatpush.msrb.mxu1 %v537_v1  ;;  %v2071_v1 = vld [vmem:[#allocation3 + $0x8] sm:$0xff] }
  0x69   :  { %v349_v3 = vld [vmem:[#allocation5 + $0x600] sm:$0xff]  ;;  %799 = vmatpush.msrb.mxu2 %v601_v2  ;;  %v2073_v2 = vld [vmem:[#allocation3 + $0x10] sm:$0xff]  ;;  %715 = vmatmul.f32.vlgmr.msra.gmra.mxu1 %v2071_v1 }
  0x6a   :  { %v469_v4 = vld [vmem:[#allocation5 + $0x9c0] sm:$0xff]  ;;  %754 = vmatpush.msra.mxu3 %v349_v3  ;;  %v218_v3 = vld [vmem:[#allocation5 + $0x1e8] sm:$0xff]  ;;  %735 = vmatmul.f32.vlgmr.msra.gmra.mxu2 %v2073_v2 }
  0x6b   :  { %v533_v5 = vld [vmem:[#allocation5 + $0xbc0] sm:$0xff]  ;;  %760 = vmatpush.msrb.mxu0 %v469_v4  ;;  %v282_v4 = vld [vmem:[#allocation5 + $0x3e8] sm:$0xff] }
  0x6c   :  { %v597_v6 = vld [vmem:[#allocation5 + $0xdc0] sm:$0xff]  ;;  %780 = vmatpush.msrb.mxu1 %v533_v5  ;;  %v346_v5 = vld [vmem:[#allocation5 + $0x5e8] sm:$0xff] }
  0x6d   :  { %v665_v7 = vld [vmem:[#allocation5 + $0xfe0] sm:$0xff]  ;;  %800 = vmatpush.msrb.mxu2 %v597_v6 }
  0x6e   :  { %v465_v8 = vld [vmem:[#allocation5 + $0x9a0] sm:$0xff]  ;;  %819 = vmatpush.msrb.mxu3 %v665_v7  ;;  %v214_v7 = vld [vmem:[#allocation5 + $0x1c8] sm:$0xff] }
  0x6f   :  { %v529_v9 = vld [vmem:[#allocation5 + $0xba0] sm:$0xff]  ;;  %761 = vmatpush.msrb.mxu0 %v465_v8  ;;  %v2078_v8 = vld [vmem:[#allocation3 + $0x18] sm:$0xff] }
  0x70   :  { %v593_v10 = vld [vmem:[#allocation5 + $0xda0] sm:$0xff]  ;;  %781 = vmatpush.msrb.mxu1 %v529_v9  ;;  %v278_v9 = vld [vmem:[#allocation5 + $0x3c8] sm:$0xff]  ;;  %755 = vmatmul.f32.vlgmr.msra.gmra.mxu3 %v2078_v8 }
  0x71   :  { %v661_v11 = vld [vmem:[#allocation5 + $0xfc0] sm:$0xff]  ;;  %801 = vmatpush.msrb.mxu2 %v593_v10  ;;  %v342_v10 = vld [vmem:[#allocation5 + $0x5c8] sm:$0xff] }
  0x72   :  { %v461_v12 = vld [vmem:[#allocation5 + $0x980] sm:$0xff]  ;;  %820 = vmatpush.msrb.mxu3 %v661_v11  ;;  %v410_v11 = vld [vmem:[#allocation5 + $0x7e8] sm:$0xff] }
  0x73   :  { %v525_v13 = vld [vmem:[#allocation5 + $0xb80] sm:$0xff]  ;;  %762 = vmatpush.msrb.mxu0 %v461_v12  ;;  %v210_v12 = vld [vmem:[#allocation5 + $0x1a8] sm:$0xff] }
  0x74   :  { %v589_v14 = vld [vmem:[#allocation5 + $0xd80] sm:$0xff]  ;;  %782 = vmatpush.msrb.mxu1 %v525_v13  ;;  %v274_v13 = vld [vmem:[#allocation5 + $0x3a8] sm:$0xff] }
  0x75   :  { %v657_v15 = vld [vmem:[#allocation5 + $0xfa0] sm:$0xff]  ;;  %802 = vmatpush.msrb.mxu2 %v589_v14  ;;  %v338_v14 = vld [vmem:[#allocation5 + $0x5a8] sm:$0xff] }
  0x76   :  { %v457_v16 = vld [vmem:[#allocation5 + $0x960] sm:$0xff]  ;;  %821 = vmatpush.msrb.mxu3 %v657_v15  ;;  %v406_v15 = vld [vmem:[#allocation5 + $0x7c8] sm:$0xff] }
  0x77   :  { %v521_v17 = vld [vmem:[#allocation5 + $0xb60] sm:$0xff]  ;;  %763 = vmatpush.msrb.mxu0 %v457_v16  ;;  %v206_v16 = vld [vmem:[#allocation5 + $0x188] sm:$0xff] }
  0x78   :  { %v585_v18 = vld [vmem:[#allocation5 + $0xd60] sm:$0xff]  ;;  %783 = vmatpush.msrb.mxu1 %v521_v17  ;;  %v270_v17 = vld [vmem:[#allocation5 + $0x388] sm:$0xff] }
  0x79   :  { %v653_v19 = vld [vmem:[#allocation5 + $0xf80] sm:$0xff]  ;;  %803 = vmatpush.msrb.mxu2 %v585_v18  ;;  %v334_v18 = vld [vmem:[#allocation5 + $0x588] sm:$0xff] }
  0x7a   :  { %v453_v20 = vld [vmem:[#allocation5 + $0x940] sm:$0xff]  ;;  %822 = vmatpush.msrb.mxu3 %v653_v19  ;;  %v402_v19 = vld [vmem:[#allocation5 + $0x7a8] sm:$0xff] }
  0x7b   :  { %v517_v21 = vld [vmem:[#allocation5 + $0xb40] sm:$0xff]  ;;  %764 = vmatpush.msrb.mxu0 %v453_v20  ;;  %v2081_v20 = vld [vmem:[#allocation3 + $0x30] sm:$0xff] }
  0x7c   :  { %v581_v22 = vld [vmem:[#allocation5 + $0xd40] sm:$0xff]  ;;  %784 = vmatpush.msrb.mxu1 %v517_v21  ;;  %v202_v21 = vld [vmem:[#allocation5 + $0x168] sm:$0xff] }
  0x7d   :  { %v649_v23 = vld [vmem:[#allocation5 + $0xf60] sm:$0xff]  ;;  %804 = vmatpush.msrb.mxu2 %v581_v22  ;;  %v266_v22 = vld [vmem:[#allocation5 + $0x368] sm:$0xff] }
  0x7e   :  { %v449_v24 = vld [vmem:[#allocation5 + $0x920] sm:$0xff]  ;;  %823 = vmatpush.msrb.mxu3 %v649_v23  ;;  %v330_v23 = vld [vmem:[#allocation5 + $0x568] sm:$0xff] }
  0x7f   :  { %v513_v25 = vld [vmem:[#allocation5 + $0xb20] sm:$0xff]  ;;  %765 = vmatpush.msrb.mxu0 %v449_v24  ;;  %v398_v24 = vld [vmem:[#allocation5 + $0x788] sm:$0xff] }
  0x80   :  { %v577_v26 = vld [vmem:[#allocation5 + $0xd20] sm:$0xff]  ;;  %785 = vmatpush.msrb.mxu1 %v513_v25 }
  0x81   :  { %v645_v27 = vld [vmem:[#allocation5 + $0xf40] sm:$0xff]  ;;  %805 = vmatpush.msrb.mxu2 %v577_v26  ;;  %v2086_v26 = vld [vmem:[#allocation3 + $0x38] sm:$0xff] }
  0x82   :  { %v445_v28 = vld [vmem:[#allocation5 + $0x900] sm:$0xff]  ;;  %824 = vmatpush.msrb.mxu3 %v645_v27  ;;  %v198_v27 = vld [vmem:[#allocation5 + $0x148] sm:$0xff] }
  0x83   :  { %v509_v29 = vld [vmem:[#allocation5 + $0xb00] sm:$0xff]  ;;  %766 = vmatpush.msrb.mxu0 %v445_v28  ;;  %v262_v28 = vld [vmem:[#allocation5 + $0x348] sm:$0xff] }
  0x84   :  { %v573_v30 = vld [vmem:[#allocation5 + $0xd00] sm:$0xff]  ;;  %786 = vmatpush.msrb.mxu1 %v509_v29  ;;  %v326_v29 = vld [vmem:[#allocation5 + $0x548] sm:$0xff] }
  0x85   :  { %v641_v31 = vld [vmem:[#allocation5 + $0xf20] sm:$0xff]  ;;  %806 = vmatpush.msrb.mxu2 %v573_v30  ;;  %v394_v30 = vld [vmem:[#allocation5 + $0x768] sm:$0xff] }
  0x86   :  { %v441_v32 = vld [vmem:[#allocation5 + $0x8e0] sm:$0xff]  ;;  %825 = vmatpush.msrb.mxu3 %v641_v31  ;;  %v2089_v31 = vld [vmem:[#allocation3 + $0x28] sm:$0xff] }
  0x87   :  { %v505_v33 = vld [vmem:[#allocation5 + $0xae0] sm:$0xff]  ;;  %767 = vmatpush.msrb.mxu0 %v441_v32  ;;  %v194_v32 = vld [vmem:[#allocation5 + $0x128] sm:$0xff] }
  0x88   :  { %v569_v34 = vld [vmem:[#allocation5 + $0xce0] sm:$0xff]  ;;  %787 = vmatpush.msrb.mxu1 %v505_v33  ;;  %v258_v33 = vld [vmem:[#allocation5 + $0x328] sm:$0xff] }
  0x89   :  { %v637_v35 = vld [vmem:[#allocation5 + $0xf00] sm:$0xff]  ;;  %807 = vmatpush.msrb.mxu2 %v569_v34  ;;  %v322_v34 = vld [vmem:[#allocation5 + $0x528] sm:$0xff] }
  0x8a   :  { %v437_v36 = vld [vmem:[#allocation5 + $0x8c0] sm:$0xff]  ;;  %826 = vmatpush.msrb.mxu3 %v637_v35  ;;  %v390_v35 = vld [vmem:[#allocation5 + $0x748] sm:$0xff] }
  0x8b   :  { %v501_v37 = vld [vmem:[#allocation5 + $0xac0] sm:$0xff]  ;;  %768 = vmatpush.msrb.mxu0 %v437_v36  ;;  %v190_v36 = vld [vmem:[#allocation5 + $0x108] sm:$0xff] }
  0x8c   :  { %v565_v38 = vld [vmem:[#allocation5 + $0xcc0] sm:$0xff]  ;;  %788 = vmatpush.msrb.mxu1 %v501_v37  ;;  %v254_v37 = vld [vmem:[#allocation5 + $0x308] sm:$0xff] }
  0x8d   :  { %v633_v39 = vld [vmem:[#allocation5 + $0xee0] sm:$0xff]  ;;  %808 = vmatpush.msrb.mxu2 %v565_v38  ;;  %v318_v38 = vld [vmem:[#allocation5 + $0x508] sm:$0xff] }
  0x8e   :  { %v433_v40 = vld [vmem:[#allocation5 + $0x8a0] sm:$0xff]  ;;  %827 = vmatpush.msrb.mxu3 %v633_v39  ;;  %v386_v39 = vld [vmem:[#allocation5 + $0x728] sm:$0xff] }
  0x8f   :  { %v497_v41 = vld [vmem:[#allocation5 + $0xaa0] sm:$0xff]  ;;  %769 = vmatpush.msrb.mxu0 %v433_v40  ;;  %v186_v40 = vld [vmem:[#allocation5 + $0xe8] sm:$0xff] }
  0x90   :  { %v561_v42 = vld [vmem:[#allocation5 + $0xca0] sm:$0xff]  ;;  %789 = vmatpush.msrb.mxu1 %v497_v41  ;;  %v250_v41 = vld [vmem:[#allocation5 + $0x2e8] sm:$0xff] }
  0x91   :  { %v629_v43 = vld [vmem:[#allocation5 + $0xec0] sm:$0xff]  ;;  %809 = vmatpush.msrb.mxu2 %v561_v42  ;;  %v314_v42 = vld [vmem:[#allocation5 + $0x4e8] sm:$0xff] }
  0x92   :  { %v429_v44 = vld [vmem:[#allocation5 + $0x880] sm:$0xff]  ;;  %828 = vmatpush.msrb.mxu3 %v629_v43  ;;  %v382_v43 = vld [vmem:[#allocation5 + $0x708] sm:$0xff] }
  0x93   :  { %v493_v45 = vld [vmem:[#allocation5 + $0xa80] sm:$0xff]  ;;  %770 = vmatpush.msrb.mxu0 %v429_v44  ;;  %v182_v44 = vld [vmem:[#allocation5 + $0xc8] sm:$0xff] }
  0x94   :  { %v557_v46 = vld [vmem:[#allocation5 + $0xc80] sm:$0xff]  ;;  %790 = vmatpush.msrb.mxu1 %v493_v45  ;;  %v246_v45 = vld [vmem:[#allocation5 + $0x2c8] sm:$0xff] }
  0x95   :  { %v625_v47 = vld [vmem:[#allocation5 + $0xea0] sm:$0xff]  ;;  %810 = vmatpush.msrb.mxu2 %v557_v46  ;;  %v310_v46 = vld [vmem:[#allocation5 + $0x4c8] sm:$0xff] }
  0x96   :  { %v425_v48 = vld [vmem:[#allocation5 + $0x860] sm:$0xff]  ;;  %829 = vmatpush.msrb.mxu3 %v625_v47  ;;  %v378_v47 = vld [vmem:[#allocation5 + $0x6e8] sm:$0xff] }
  0x97   :  { %v489_v49 = vld [vmem:[#allocation5 + $0xa60] sm:$0xff]  ;;  %771 = vmatpush.msrb.mxu0 %v425_v48  ;;  %v178_v48 = vld [vmem:[#allocation5 + $0xa8] sm:$0xff] }
  0x98   :  { %v553_v50 = vld [vmem:[#allocation5 + $0xc60] sm:$0xff]  ;;  %791 = vmatpush.msrb.mxu1 %v489_v49  ;;  %v242_v49 = vld [vmem:[#allocation5 + $0x2a8] sm:$0xff] }
  0x99   :  { %v621_v51 = vld [vmem:[#allocation5 + $0xe80] sm:$0xff]  ;;  %811 = vmatpush.msrb.mxu2 %v553_v50  ;;  %v306_v50 = vld [vmem:[#allocation5 + $0x4a8] sm:$0xff] }
  0x9a   :  { %v421_v52 = vld [vmem:[#allocation5 + $0x840] sm:$0xff]  ;;  %830 = vmatpush.msrb.mxu3 %v621_v51  ;;  %v374_v51 = vld [vmem:[#allocation5 + $0x6c8] sm:$0xff] }
  0x9b   :  { %v485_v53 = vld [vmem:[#allocation5 + $0xa40] sm:$0xff]  ;;  %772 = vmatpush.msrb.mxu0 %v421_v52  ;;  %v174_v52 = vld [vmem:[#allocation5 + $0x88] sm:$0xff] }
  0x9c   :  { %v549_v54 = vld [vmem:[#allocation5 + $0xc40] sm:$0xff]  ;;  %792 = vmatpush.msrb.mxu1 %v485_v53  ;;  %v238_v53 = vld [vmem:[#allocation5 + $0x288] sm:$0xff] }
  0x9d   :  { %v617_v55 = vld [vmem:[#allocation5 + $0xe60] sm:$0xff]  ;;  %812 = vmatpush.msrb.mxu2 %v549_v54  ;;  %v302_v54 = vld [vmem:[#allocation5 + $0x488] sm:$0xff] }
  0x9e   :  { %v417_v56 = vld [vmem:[#allocation5 + $0x820] sm:$0xff]  ;;  %831 = vmatpush.msrb.mxu3 %v617_v55  ;;  %v370_v55 = vld [vmem:[#allocation5 + $0x6a8] sm:$0xff] }
  0x9f   :  { %v481_v57 = vld [vmem:[#allocation5 + $0xa20] sm:$0xff]  ;;  %773 = vmatpush.msrb.mxu0 %v417_v56  ;;  %v170_v56 = vld [vmem:[#allocation5 + $0x68] sm:$0xff] }
  0xa0   :  { %v545_v58 = vld [vmem:[#allocation5 + $0xc20] sm:$0xff]  ;;  %793 = vmatpush.msrb.mxu1 %v481_v57  ;;  %v234_v57 = vld [vmem:[#allocation5 + $0x268] sm:$0xff] }
  0xa1   :  { %v613_v59 = vld [vmem:[#allocation5 + $0xe40] sm:$0xff]  ;;  %813 = vmatpush.msrb.mxu2 %v545_v58  ;;  %v298_v58 = vld [vmem:[#allocation5 + $0x468] sm:$0xff] }
  0xa2   :  { %v413_v60 = vld [vmem:[#allocation5 + $0x800] sm:$0xff]  ;;  %832 = vmatpush.msrb.mxu3 %v613_v59  ;;  %v366_v59 = vld [vmem:[#allocation5 + $0x688] sm:$0xff] }
  0xa3   :  { %v477_v61 = vld [vmem:[#allocation5 + $0xa00] sm:$0xff]  ;;  %774 = vmatpush.msrb.mxu0 %v413_v60  ;;  %v166_v60 = vld [vmem:[#allocation5 + $0x48] sm:$0xff] }
  0xa4   :  { %v541_v62 = vld [vmem:[#allocation5 + $0xc00] sm:$0xff]  ;;  %794 = vmatpush.msrb.mxu1 %v477_v61  ;;  %v230_v61 = vld [vmem:[#allocation5 + $0x248] sm:$0xff] }
  0xa5   :  { %v609_v63 = vld [vmem:[#allocation5 + $0xe20] sm:$0xff]  ;;  %814 = vmatpush.msrb.mxu2 %v541_v62  ;;  %795 = vmatmul.f32.vlgmr.msrb.gmra.mxu1 %v2089_v31  ;;  %v294_v62 = vld [vmem:[#allocation5 + $0x448] sm:$0xff] }
  0xa6   :  { %v2069_v0 = vld [vmem:[#allocation3] sm:$0xff]  ;;  %833 = vmatpush.msrb.mxu3 %v609_v63  ;;  %859 = vmatpush.msra.mxu1 %v282_v4  ;;  %v362_v63 = vld [vmem:[#allocation5 + $0x668] sm:$0xff] }
  0xa7   :  { %695 = vmatmul.f32.vlgmr.msra.gmra.mxu0 %v2069_v0  ;;  %v605_v6 = vld [vmem:[#allocation5 + $0xe00] sm:$0xff]  ;;  %879 = vmatpush.msra.mxu2 %v346_v5  ;;  %v226_v4 = vld [vmem:[#allocation5 + $0x228] sm:$0xff] }
  0xa8   :  { %839 = vmatpush.msra.mxu0 %v218_v3  ;;  %834 = vmatpush.msrb.mxu3 %v605_v6  ;;  %v2083_v25 = vld [vmem:[#allocation3 + $0x20] sm:$0xff]  ;;  %v162_v3 = vld [vmem:[#allocation5 + $0x28] sm:$0xff] }
  0xa9   :  { %860 = vmatpush.msra.mxu1 %v278_v9  ;;  %880 = vmatpush.msra.mxu2 %v342_v10  ;;  %v290_v5 = vld [vmem:[#allocation5 + $0x428] sm:$0xff] }
  0xaa   :  { %840 = vmatpush.msra.mxu0 %v214_v7  ;;  %899 = vmatpush.msra.mxu3 %v410_v11  ;;  %v358_v6 = vld [vmem:[#allocation5 + $0x648] sm:$0xff] }
  0xab   :  { %861 = vmatpush.msra.mxu1 %v274_v13  ;;  %881 = vmatpush.msra.mxu2 %v338_v14  ;;  %v158_v7 = vld [vmem:[#allocation5 + $0x8] sm:$0xff] }
  0xac   :  { %841 = vmatpush.msra.mxu0 %v210_v12  ;;  %900 = vmatpush.msra.mxu3 %v406_v15  ;;  %v222_v9 = vld [vmem:[#allocation5 + $0x208] sm:$0xff] }
  0xad   :  { %862 = vmatpush.msra.mxu1 %v270_v17  ;;  %882 = vmatpush.msra.mxu2 %v334_v18  ;;  %v286_v10 = vld [vmem:[#allocation5 + $0x408] sm:$0xff] }
  0xae   :  { %842 = vmatpush.msra.mxu0 %v206_v16  ;;  %901 = vmatpush.msra.mxu3 %v402_v19  ;;  %v354_v11 = vld [vmem:[#allocation5 + $0x628] sm:$0xff] }
  0xaf   :  { %815 = vmatmul.f32.vlgmr.msrb.gmra.mxu2 %v2081_v20  ;;  %863 = vmatpush.msra.mxu1 %v266_v22  ;;  %v474_v12 = vld [vmem:[#allocation5 + $0x9e8] sm:$0xff] }
  0xb0   :  { %843 = vmatpush.msra.mxu0 %v202_v21  ;;  %883 = vmatpush.msra.mxu2 %v330_v23  ;;  %v538_v13 = vld [vmem:[#allocation5 + $0xbe8] sm:$0xff] }
  0xb1   :  { %902 = vmatpush.msra.mxu3 %v398_v24  ;;  %775 = vmatmul.f32.vlgmr.msrb.gmra.mxu0 %v2083_v25  ;;  %v602_v14 = vld [vmem:[#allocation5 + $0xde8] sm:$0xff] }
  0xb2   :  { %835 = vmatmul.f32.vlgmr.msrb.gmra.mxu3 %v2086_v26  ;;  %844 = vmatpush.msra.mxu0 %v198_v27  ;;  %v350_v15 = vld [vmem:[#allocation5 + $0x608] sm:$0xff] }
  0xb3   :  { %864 = vmatpush.msra.mxu1 %v262_v28  ;;  %884 = vmatpush.msra.mxu2 %v326_v29  ;;  %v470_v16 = vld [vmem:[#allocation5 + $0x9c8] sm:$0xff] }
  0xb4   :  { %903 = vmatpush.msra.mxu3 %v394_v30  ;;  %845 = vmatpush.msra.mxu0 %v194_v32  ;;  %v534_v17 = vld [vmem:[#allocation5 + $0xbc8] sm:$0xff] }
  0xb5   :  { %865 = vmatpush.msra.mxu1 %v258_v33  ;;  %885 = vmatpush.msra.mxu2 %v322_v34  ;;  %v598_v18 = vld [vmem:[#allocation5 + $0xdc8] sm:$0xff] }
  0xb6   :  { %904 = vmatpush.msra.mxu3 %v390_v35  ;;  %846 = vmatpush.msra.mxu0 %v190_v36  ;;  %v666_v19 = vld [vmem:[#allocation5 + $0xfe8] sm:$0xff] }
  0xb7   :  { %866 = vmatpush.msra.mxu1 %v254_v37  ;;  %886 = vmatpush.msra.mxu2 %v318_v38  ;;  %v466_v21 = vld [vmem:[#allocation5 + $0x9a8] sm:$0xff] }
  0xb8   :  { %905 = vmatpush.msra.mxu3 %v386_v39  ;;  %847 = vmatpush.msra.mxu0 %v186_v40  ;;  %v530_v22 = vld [vmem:[#allocation5 + $0xba8] sm:$0xff] }
  0xb9   :  { %867 = vmatpush.msra.mxu1 %v250_v41  ;;  %887 = vmatpush.msra.mxu2 %v314_v42  ;;  %v594_v23 = vld [vmem:[#allocation5 + $0xda8] sm:$0xff] }
  0xba   :  { %906 = vmatpush.msra.mxu3 %v382_v43  ;;  %848 = vmatpush.msra.mxu0 %v182_v44  ;;  %v662_v24 = vld [vmem:[#allocation5 + $0xfc8] sm:$0xff] }
  0xbb   :  { %868 = vmatpush.msra.mxu1 %v246_v45  ;;  %888 = vmatpush.msra.mxu2 %v310_v46  ;;  %v462_v27 = vld [vmem:[#allocation5 + $0x988] sm:$0xff] }
  0xbc   :  { %907 = vmatpush.msra.mxu3 %v378_v47  ;;  %849 = vmatpush.msra.mxu0 %v178_v48  ;;  %v526_v28 = vld [vmem:[#allocation5 + $0xb88] sm:$0xff] }
  0xbd   :  { %869 = vmatpush.msra.mxu1 %v242_v49  ;;  %889 = vmatpush.msra.mxu2 %v306_v50  ;;  %v590_v29 = vld [vmem:[#allocation5 + $0xd88] sm:$0xff] }
  0xbe   :  { %908 = vmatpush.msra.mxu3 %v374_v51  ;;  %850 = vmatpush.msra.mxu0 %v174_v52  ;;  %v658_v30 = vld [vmem:[#allocation5 + $0xfa8] sm:$0xff] }
  0xbf   :  { %870 = vmatpush.msra.mxu1 %v238_v53  ;;  %890 = vmatpush.msra.mxu2 %v302_v54  ;;  %v458_v32 = vld [vmem:[#allocation5 + $0x968] sm:$0xff] }
  0xc0   :  { %909 = vmatpush.msra.mxu3 %v370_v55  ;;  %851 = vmatpush.msra.mxu0 %v170_v56  ;;  %v522_v33 = vld [vmem:[#allocation5 + $0xb68] sm:$0xff] }
  0xc1   :  { %871 = vmatpush.msra.mxu1 %v234_v57  ;;  %891 = vmatpush.msra.mxu2 %v298_v58  ;;  %v586_v34 = vld [vmem:[#allocation5 + $0xd68] sm:$0xff] }
  0xc2   :  { %910 = vmatpush.msra.mxu3 %v366_v59  ;;  %852 = vmatpush.msra.mxu0 %v166_v60  ;;  %v654_v35 = vld [vmem:[#allocation5 + $0xf88] sm:$0xff] }
  0xc3   :  { %872 = vmatpush.msra.mxu1 %v230_v61  ;;  %892 = vmatpush.msra.mxu2 %v294_v62  ;;  %v454_v36 = vld [vmem:[#allocation5 + $0x948] sm:$0xff] }
  0xc4   :  { %911 = vmatpush.msra.mxu3 %v362_v63  ;;  %853 = vmatpush.msra.mxu0 %v162_v3  ;;  %v518_v37 = vld [vmem:[#allocation5 + $0xb48] sm:$0xff] }
  0xc5   :  { %873 = vmatpush.msra.mxu1 %v226_v4  ;;  %893 = vmatpush.msra.mxu2 %v290_v5  ;;  %v582_v38 = vld [vmem:[#allocation5 + $0xd48] sm:$0xff] }
  0xc6   :  { %912 = vmatpush.msra.mxu3 %v358_v6  ;;  %854 = vmatpush.msra.mxu0 %v158_v7  ;;  %v650_v39 = vld [vmem:[#allocation5 + $0xf68] sm:$0xff] }
  0xc7   :  { %874 = vmatpush.msra.mxu1 %v222_v9  ;;  %894 = vmatpush.msra.mxu2 %v286_v10  ;;  %v450_v40 = vld [vmem:[#allocation5 + $0x928] sm:$0xff] }
  0xc8   :  { %913 = vmatpush.msra.mxu3 %v354_v11  ;;  %919 = vmatpush.msrb.mxu0 %v474_v12  ;;  %v514_v41 = vld [vmem:[#allocation5 + $0xb28] sm:$0xff] }
  0xc9   :  { %939 = vmatpush.msrb.mxu1 %v538_v13  ;;  %959 = vmatpush.msrb.mxu2 %v602_v14  ;;  %v578_v42 = vld [vmem:[#allocation5 + $0xd28] sm:$0xff] }
  0xca   :  { %914 = vmatpush.msra.mxu3 %v350_v15  ;;  %920 = vmatpush.msrb.mxu0 %v470_v16  ;;  %v646_v43 = vld [vmem:[#allocation5 + $0xf48] sm:$0xff] }
  0xcb   :  { %940 = vmatpush.msrb.mxu1 %v534_v17  ;;  %960 = vmatpush.msrb.mxu2 %v598_v18  ;;  %v446_v44 = vld [vmem:[#allocation5 + $0x908] sm:$0xff] }
  0xcc   :  { %979 = vmatpush.msrb.mxu3 %v666_v19  ;;  %921 = vmatpush.msrb.mxu0 %v466_v21  ;;  %v510_v45 = vld [vmem:[#allocation5 + $0xb08] sm:$0xff]  ;;  %v219_v21 = vld [vmem:[#allocation5 + $0x1f0] sm:$0xff] }
  0xcd   :  { %941 = vmatpush.msrb.mxu1 %v530_v22  ;;  %961 = vmatpush.msrb.mxu2 %v594_v23  ;;  %v574_v46 = vld [vmem:[#allocation5 + $0xd08] sm:$0xff]  ;;  %v283_v22 = vld [vmem:[#allocation5 + $0x3f0] sm:$0xff] }
  0xce   :  { %980 = vmatpush.msrb.mxu3 %v662_v24  ;;  %922 = vmatpush.msrb.mxu0 %v462_v27  ;;  %v642_v47 = vld [vmem:[#allocation5 + $0xf28] sm:$0xff]  ;;  %v347_v23 = vld [vmem:[#allocation5 + $0x5f0] sm:$0xff] }
  0xcf   :  { %942 = vmatpush.msrb.mxu1 %v526_v28  ;;  %962 = vmatpush.msrb.mxu2 %v590_v29  ;;  %v442_v48 = vld [vmem:[#allocation5 + $0x8e8] sm:$0xff]  ;;  %v215_v27 = vld [vmem:[#allocation5 + $0x1d0] sm:$0xff] }
  0xd0   :  { %981 = vmatpush.msrb.mxu3 %v658_v30  ;;  %923 = vmatpush.msrb.mxu0 %v458_v32  ;;  %v506_v49 = vld [vmem:[#allocation5 + $0xae8] sm:$0xff]  ;;  %v279_v28 = vld [vmem:[#allocation5 + $0x3d0] sm:$0xff] }
  0xd1   :  { %943 = vmatpush.msrb.mxu1 %v522_v33  ;;  %963 = vmatpush.msrb.mxu2 %v586_v34  ;;  %v570_v50 = vld [vmem:[#allocation5 + $0xce8] sm:$0xff]  ;;  %v343_v29 = vld [vmem:[#allocation5 + $0x5d0] sm:$0xff] }
  0xd2   :  { %982 = vmatpush.msrb.mxu3 %v654_v35  ;;  %924 = vmatpush.msrb.mxu0 %v454_v36  ;;  %v638_v51 = vld [vmem:[#allocation5 + $0xf08] sm:$0xff]  ;;  %v411_v30 = vld [vmem:[#allocation5 + $0x7f0] sm:$0xff] }
  0xd3   :  { %944 = vmatpush.msrb.mxu1 %v518_v37  ;;  %964 = vmatpush.msrb.mxu2 %v582_v38  ;;  %v438_v52 = vld [vmem:[#allocation5 + $0x8c8] sm:$0xff]  ;;  %v211_v32 = vld [vmem:[#allocation5 + $0x1b0] sm:$0xff] }
  0xd4   :  { %983 = vmatpush.msrb.mxu3 %v650_v39  ;;  %925 = vmatpush.msrb.mxu0 %v450_v40  ;;  %v502_v53 = vld [vmem:[#allocation5 + $0xac8] sm:$0xff]  ;;  %v275_v33 = vld [vmem:[#allocation5 + $0x3b0] sm:$0xff] }
  0xd5   :  { %945 = vmatpush.msrb.mxu1 %v514_v41  ;;  %965 = vmatpush.msrb.mxu2 %v578_v42  ;;  %v566_v54 = vld [vmem:[#allocation5 + $0xcc8] sm:$0xff]  ;;  %v407_v34 = vld [vmem:[#allocation5 + $0x7d0] sm:$0xff] }
  0xd6   :  { %984 = vmatpush.msrb.mxu3 %v646_v43  ;;  %926 = vmatpush.msrb.mxu0 %v446_v44  ;;  %v634_v55 = vld [vmem:[#allocation5 + $0xee8] sm:$0xff]  ;;  %v271_v35 = vld [vmem:[#allocation5 + $0x390] sm:$0xff] }
  0xd7   :  { %946 = vmatpush.msrb.mxu1 %v510_v45  ;;  %966 = vmatpush.msrb.mxu2 %v574_v46  ;;  %v434_v56 = vld [vmem:[#allocation5 + $0x8a8] sm:$0xff]  ;;  %v335_v36 = vld [vmem:[#allocation5 + $0x590] sm:$0xff] }
  0xd8   :  { %985 = vmatpush.msrb.mxu3 %v642_v47  ;;  %927 = vmatpush.msrb.mxu0 %v442_v48  ;;  %v498_v57 = vld [vmem:[#allocation5 + $0xaa8] sm:$0xff]  ;;  %v403_v37 = vld [vmem:[#allocation5 + $0x7b0] sm:$0xff] }
  0xd9   :  { %947 = vmatpush.msrb.mxu1 %v506_v49  ;;  %967 = vmatpush.msrb.mxu2 %v570_v50  ;;  %v562_v58 = vld [vmem:[#allocation5 + $0xca8] sm:$0xff]  ;;  %v203_v38 = vld [vmem:[#allocation5 + $0x170] sm:$0xff] }
  0xda   :  { %986 = vmatpush.msrb.mxu3 %v638_v51  ;;  %928 = vmatpush.msrb.mxu0 %v438_v52  ;;  %v630_v59 = vld [vmem:[#allocation5 + $0xec8] sm:$0xff]  ;;  %v267_v39 = vld [vmem:[#allocation5 + $0x370] sm:$0xff] }
  0xdb   :  { %948 = vmatpush.msrb.mxu1 %v502_v53  ;;  %968 = vmatpush.msrb.mxu2 %v566_v54  ;;  %v430_v60 = vld [vmem:[#allocation5 + $0x888] sm:$0xff]  ;;  %v331_v40 = vld [vmem:[#allocation5 + $0x570] sm:$0xff] }
  0xdc   :  { %987 = vmatpush.msrb.mxu3 %v634_v55  ;;  %v494_v61 = vld [vmem:[#allocation5 + $0xa88] sm:$0xff]  ;;  %929 = vmatpush.msrb.mxu0 %v434_v56  ;;  %v399_v41 = vld [vmem:[#allocation5 + $0x790] sm:$0xff] }
  0xdd   :  { %949 = vmatpush.msrb.mxu1 %v498_v57  ;;  %v558_v62 = vld [vmem:[#allocation5 + $0xc88] sm:$0xff]  ;;  %969 = vmatpush.msrb.mxu2 %v562_v58  ;;  %v199_v42 = vld [vmem:[#allocation5 + $0x150] sm:$0xff] }
  0xde   :  { %v626_v63 = vld [vmem:[#allocation5 + $0xea8] sm:$0xff]  ;;  %988 = vmatpush.msrb.mxu3 %v630_v59  ;;  %930 = vmatpush.msrb.mxu0 %v430_v60  ;;  %v263_v43 = vld [vmem:[#allocation5 + $0x350] sm:$0xff] }
  0xdf   :  { %v426_v3 = vld [vmem:[#allocation5 + $0x868] sm:$0xff]  ;;  %950 = vmatpush.msrb.mxu1 %v494_v61  ;;  %970 = vmatpush.msrb.mxu2 %v558_v62  ;;  %v327_v44 = vld [vmem:[#allocation5 + $0x550] sm:$0xff] }
  0xe0   :  { %v490_v4 = vld [vmem:[#allocation5 + $0xa68] sm:$0xff]  ;;  %989 = vmatpush.msrb.mxu3 %v626_v63  ;;  %931 = vmatpush.msrb.mxu0 %v426_v3  ;;  %v395_v45 = vld [vmem:[#allocation5 + $0x770] sm:$0xff] }
  0xe1   :  { %v554_v5 = vld [vmem:[#allocation5 + $0xc68] sm:$0xff]  ;;  %951 = vmatpush.msrb.mxu1 %v490_v4  ;;  %855 = vmatmul.f32.vlgmr.msra.gmra.mxu0 %v2069_v0  ;;  %v339_v0 = vld [vmem:[#allocation5 + $0x5b0] sm:$0xff] }
  0xe2   :  { %v622_v6 = vld [vmem:[#allocation5 + $0xe88] sm:$0xff]  ;;  %971 = vmatpush.msrb.mxu2 %v554_v5  ;;  %875 = vmatmul.f32.vlgmr.msra.gmra.mxu1 %v2071_v1  ;;  %v207_v1 = vld [vmem:[#allocation5 + $0x190] sm:$0xff] }
  0xe3   :  { %v422_v7 = vld [vmem:[#allocation5 + $0x848] sm:$0xff]  ;;  %990 = vmatpush.msrb.mxu3 %v622_v6  ;;  %895 = vmatmul.f32.vlgmr.msra.gmra.mxu2 %v2073_v2  ;;  %v195_v46 = vld [vmem:[#allocation5 + $0x130] sm:$0xff] }
  0xe4   :  { %v486_v9 = vld [vmem:[#allocation5 + $0xa48] sm:$0xff]  ;;  %932 = vmatpush.msrb.mxu0 %v422_v7  ;;  %915 = vmatmul.f32.vlgmr.msra.gmra.mxu3 %v2078_v8  ;;  %v259_v47 = vld [vmem:[#allocation5 + $0x330] sm:$0xff] }
  0xe5   :  { %v550_v10 = vld [vmem:[#allocation5 + $0xc48] sm:$0xff]  ;;  %952 = vmatpush.msrb.mxu1 %v486_v9  ;;  %v323_v48 = vld [vmem:[#allocation5 + $0x530] sm:$0xff] }
  0xe6   :  { %v618_v11 = vld [vmem:[#allocation5 + $0xe68] sm:$0xff]  ;;  %972 = vmatpush.msrb.mxu2 %v550_v10  ;;  %v391_v49 = vld [vmem:[#allocation5 + $0x750] sm:$0xff] }
  0xe7   :  { %v418_v12 = vld [vmem:[#allocation5 + $0x828] sm:$0xff]  ;;  %991 = vmatpush.msrb.mxu3 %v618_v11  ;;  %v191_v50 = vld [vmem:[#allocation5 + $0x110] sm:$0xff] }
  0xe8   :  { %v482_v13 = vld [vmem:[#allocation5 + $0xa28] sm:$0xff]  ;;  %933 = vmatpush.msrb.mxu0 %v418_v12  ;;  %v255_v51 = vld [vmem:[#allocation5 + $0x310] sm:$0xff] }
  0xe9   :  { %v546_v14 = vld [vmem:[#allocation5 + $0xc28] sm:$0xff]  ;;  %953 = vmatpush.msrb.mxu1 %v482_v13  ;;  %v319_v52 = vld [vmem:[#allocation5 + $0x510] sm:$0xff] }
  0xea   :  { %v614_v15 = vld [vmem:[#allocation5 + $0xe48] sm:$0xff]  ;;  %973 = vmatpush.msrb.mxu2 %v546_v14  ;;  %v387_v53 = vld [vmem:[#allocation5 + $0x730] sm:$0xff] }
  0xeb   :  { %v414_v16 = vld [vmem:[#allocation5 + $0x808] sm:$0xff]  ;;  %992 = vmatpush.msrb.mxu3 %v614_v15  ;;  %v187_v54 = vld [vmem:[#allocation5 + $0xf0] sm:$0xff] }
  0xec   :  { %v478_v17 = vld [vmem:[#allocation5 + $0xa08] sm:$0xff]  ;;  %934 = vmatpush.msrb.mxu0 %v414_v16  ;;  %v251_v55 = vld [vmem:[#allocation5 + $0x2f0] sm:$0xff] }
  0xed   :  { %v542_v18 = vld [vmem:[#allocation5 + $0xc08] sm:$0xff]  ;;  %954 = vmatpush.msrb.mxu1 %v478_v17  ;;  %935 = vmatmul.f32.vlgmr.msrb.gmra.mxu0 %v2083_v25  ;;  %v315_v56 = vld [vmem:[#allocation5 + $0x4f0] sm:$0xff] }
  0xee   :  { %v610_v19 = vld [vmem:[#allocation5 + $0xe28] sm:$0xff]  ;;  %974 = vmatpush.msrb.mxu2 %v542_v18  ;;  %999 = vmatpush.msra.mxu0 %v219_v21  ;;  %v383_v57 = vld [vmem:[#allocation5 + $0x710] sm:$0xff] }
  0xef   :  { %993 = vmatpush.msrb.mxu3 %v610_v19  ;;  %v606_v24 = vld [vmem:[#allocation5 + $0xe08] sm:$0xff]  ;;  %1019 = vmatpush.msra.mxu1 %v283_v22  ;;  %v183_v58 = vld [vmem:[#allocation5 + $0xd0] sm:$0xff] }
  0xf0   :  { %1039 = vmatpush.msra.mxu2 %v347_v23  ;;  %1000 = vmatpush.msra.mxu0 %v215_v27  ;;  %v247_v59 = vld [vmem:[#allocation5 + $0x2d0] sm:$0xff] }
  0xf1   :  { %994 = vmatpush.msrb.mxu3 %v606_v24  ;;  %1020 = vmatpush.msra.mxu1 %v279_v28  ;;  %v311_v60 = vld [vmem:[#allocation5 + $0x4d0] sm:$0xff] }
  0xf2   :  { %1040 = vmatpush.msra.mxu2 %v343_v29  ;;  %1001 = vmatpush.msra.mxu0 %v211_v32  ;;  %v379_v61 = vld [vmem:[#allocation5 + $0x6f0] sm:$0xff] }
  0xf3   :  { %1059 = vmatpush.msra.mxu3 %v411_v30  ;;  %1021 = vmatpush.msra.mxu1 %v275_v33  ;;  %v179_v62 = vld [vmem:[#allocation5 + $0xb0] sm:$0xff] }
  0xf4   :  { %1041 = vmatpush.msra.mxu2 %v339_v0  ;;  %1002 = vmatpush.msra.mxu0 %v207_v1  ;;  %v243_v63 = vld [vmem:[#allocation5 + $0x2b0] sm:$0xff] }
  0xf5   :  { %1060 = vmatpush.msra.mxu3 %v407_v34  ;;  %1022 = vmatpush.msra.mxu1 %v271_v35  ;;  %v307_v3 = vld [vmem:[#allocation5 + $0x4b0] sm:$0xff] }
  0xf6   :  { %1042 = vmatpush.msra.mxu2 %v335_v36  ;;  %1003 = vmatpush.msra.mxu0 %v203_v38  ;;  %v375_v4 = vld [vmem:[#allocation5 + $0x6d0] sm:$0xff] }
  0xf7   :  { %1061 = vmatpush.msra.mxu3 %v403_v37  ;;  %975 = vmatmul.f32.vlgmr.msrb.gmra.mxu2 %v2081_v20  ;;  %v175_v5 = vld [vmem:[#allocation5 + $0x90] sm:$0xff] }
  0xf8   :  { %1023 = vmatpush.msra.mxu1 %v267_v39  ;;  %1043 = vmatpush.msra.mxu2 %v331_v40  ;;  %v239_v6 = vld [vmem:[#allocation5 + $0x290] sm:$0xff] }
  0xf9   :  { %1062 = vmatpush.msra.mxu3 %v399_v41  ;;  %1004 = vmatpush.msra.mxu0 %v199_v42  ;;  %v303_v7 = vld [vmem:[#allocation5 + $0x490] sm:$0xff] }
  0xfa   :  { %995 = vmatmul.f32.vlgmr.msrb.gmra.mxu3 %v2086_v26  ;;  %1024 = vmatpush.msra.mxu1 %v263_v43  ;;  %v371_v9 = vld [vmem:[#allocation5 + $0x6b0] sm:$0xff] }
  0xfb   :  { %1044 = vmatpush.msra.mxu2 %v327_v44  ;;  %1063 = vmatpush.msra.mxu3 %v395_v45  ;;  %v171_v10 = vld [vmem:[#allocation5 + $0x70] sm:$0xff] }
  0xfc   :  { %955 = vmatmul.f32.vlgmr.msrb.gmra.mxu1 %v2089_v31  ;;  %1005 = vmatpush.msra.mxu0 %v195_v46  ;;  %v235_v11 = vld [vmem:[#allocation5 + $0x270] sm:$0xff] }
  0xfd   :  { %1025 = vmatpush.msra.mxu1 %v259_v47  ;;  %1045 = vmatpush.msra.mxu2 %v323_v48  ;;  %v299_v12 = vld [vmem:[#allocation5 + $0x470] sm:$0xff] }
  0xfe   :  { %1064 = vmatpush.msra.mxu3 %v391_v49  ;;  %1006 = vmatpush.msra.mxu0 %v191_v50  ;;  %v367_v13 = vld [vmem:[#allocation5 + $0x690] sm:$0xff] }
  0xff   :  { %1026 = vmatpush.msra.mxu1 %v255_v51  ;;  %1046 = vmatpush.msra.mxu2 %v319_v52  ;;  %v167_v14 = vld [vmem:[#allocation5 + $0x50] sm:$0xff] }
 0x100   :  { %1065 = vmatpush.msra.mxu3 %v387_v53  ;;  %1007 = vmatpush.msra.mxu0 %v187_v54  ;;  %v231_v15 = vld [vmem:[#allocation5 + $0x250] sm:$0xff] }
 0x101   :  { %1027 = vmatpush.msra.mxu1 %v251_v55  ;;  %1047 = vmatpush.msra.mxu2 %v315_v56  ;;  %v295_v16 = vld [vmem:[#allocation5 + $0x450] sm:$0xff] }
 0x102   :  { %1066 = vmatpush.msra.mxu3 %v383_v57  ;;  %1008 = vmatpush.msra.mxu0 %v183_v58  ;;  %v363_v17 = vld [vmem:[#allocation5 + $0x670] sm:$0xff] }
 0x103   :  { %1028 = vmatpush.msra.mxu1 %v247_v59  ;;  %1048 = vmatpush.msra.mxu2 %v311_v60  ;;  %v163_v18 = vld [vmem:[#allocation5 + $0x30] sm:$0xff] }
 0x104   :  { %1067 = vmatpush.msra.mxu3 %v379_v61  ;;  %1009 = vmatpush.msra.mxu0 %v179_v62  ;;  %v227_v19 = vld [vmem:[#allocation5 + $0x230] sm:$0xff] }
 0x105   :  { %1029 = vmatpush.msra.mxu1 %v243_v63  ;;  %1049 = vmatpush.msra.mxu2 %v307_v3  ;;  %v291_v21 = vld [vmem:[#allocation5 + $0x430] sm:$0xff] }
 0x106   :  { %1068 = vmatpush.msra.mxu3 %v375_v4  ;;  %1010 = vmatpush.msra.mxu0 %v175_v5  ;;  %v359_v22 = vld [vmem:[#allocation5 + $0x650] sm:$0xff] }
 0x107   :  { %1030 = vmatpush.msra.mxu1 %v239_v6  ;;  %1050 = vmatpush.msra.mxu2 %v303_v7  ;;  %v159_v23 = vld [vmem:[#allocation5 + $0x10] sm:$0xff] }
 0x108   :  { %1069 = vmatpush.msra.mxu3 %v371_v9  ;;  %1011 = vmatpush.msra.mxu0 %v171_v10  ;;  %v223_v24 = vld [vmem:[#allocation5 + $0x210] sm:$0xff] }
 0x109   :  { %1031 = vmatpush.msra.mxu1 %v235_v11  ;;  %1051 = vmatpush.msra.mxu2 %v299_v12  ;;  %v287_v27 = vld [vmem:[#allocation5 + $0x410] sm:$0xff] }
 0x10a   :  { %1070 = vmatpush.msra.mxu3 %v367_v13  ;;  %1012 = vmatpush.msra.mxu0 %v167_v14  ;;  %v355_v28 = vld [vmem:[#allocation5 + $0x630] sm:$0xff] }
 0x10b   :  { %1032 = vmatpush.msra.mxu1 %v231_v15  ;;  %1052 = vmatpush.msra.mxu2 %v295_v16  ;;  %v475_v29 = vld [vmem:[#allocation5 + $0x9f0] sm:$0xff] }
 0x10c   :  { %1071 = vmatpush.msra.mxu3 %v363_v17  ;;  %1013 = vmatpush.msra.mxu0 %v163_v18  ;;  %v539_v30 = vld [vmem:[#allocation5 + $0xbf0] sm:$0xff] }
 0x10d   :  { %1033 = vmatpush.msra.mxu1 %v227_v19  ;;  %1053 = vmatpush.msra.mxu2 %v291_v21  ;;  %v603_v32 = vld [vmem:[#allocation5 + $0xdf0] sm:$0xff] }
 0x10e   :  { %1072 = vmatpush.msra.mxu3 %v359_v22  ;;  %1014 = vmatpush.msra.mxu0 %v159_v23  ;;  %v351_v33 = vld [vmem:[#allocation5 + $0x610] sm:$0xff] }
 0x10f   :  { %1034 = vmatpush.msra.mxu1 %v223_v24  ;;  %1054 = vmatpush.msra.mxu2 %v287_v27  ;;  %v471_v0 = vld [vmem:[#allocation5 + $0x9d0] sm:$0xff]  ;;  %v2102_v24 = vld [vmem:[#allocation3] sm:$0xff] }
 0x110   :  { %1073 = vmatpush.msra.mxu3 %v355_v28  ;;  %v535_v34 = vld [vmem:[#allocation5 + $0xbd0] sm:$0xff]  ;;  %1079 = vmatpush.msrb.mxu0 %v475_v29 }
 0x111   :  { %1099 = vmatpush.msrb.mxu1 %v539_v30  ;;  %v599_v1 = vld [vmem:[#allocation5 + $0xdd0] sm:$0xff]  ;;  %1119 = vmatpush.msrb.mxu2 %v603_v32  ;;  %v2106_v32 = vld [vmem:[#allocation3 + $0x8] sm:$0xff] }
 0x112   :  { %v667_v35 = vld [vmem:[#allocation5 + $0xff0] sm:$0xff]  ;;  %1074 = vmatpush.msra.mxu3 %v351_v33  ;;  %1080 = vmatpush.msrb.mxu0 %v471_v0 }
 0x113   :  { %v467_v36 = vld [vmem:[#allocation5 + $0x9b0] sm:$0xff]  ;;  %1100 = vmatpush.msrb.mxu1 %v535_v34  ;;  %1120 = vmatpush.msrb.mxu2 %v599_v1 }
 0x114   :  { %v531_v37 = vld [vmem:[#allocation5 + $0xbb0] sm:$0xff]  ;;  %1139 = vmatpush.msrb.mxu3 %v667_v35  ;;  %1081 = vmatpush.msrb.mxu0 %v467_v36  ;;  %v284_v35 = vld [vmem:[#allocation5 + $0x3f8] sm:$0xff] }
 0x115   :  { %v595_v38 = vld [vmem:[#allocation5 + $0xdb0] sm:$0xff]  ;;  %1101 = vmatpush.msrb.mxu1 %v531_v37  ;;  %1055 = vmatmul.f32.vlgmr.msra.gmra.mxu2 %v2073_v2  ;;  %v348_v36 = vld [vmem:[#allocation5 + $0x5f8] sm:$0xff] }
 0x116   :  { %v663_v39 = vld [vmem:[#allocation5 + $0xfd0] sm:$0xff]  ;;  %1121 = vmatpush.msrb.mxu2 %v595_v38  ;;  %1015 = vmatmul.f32.vlgmr.msra.gmra.mxu0 %v2102_v24  ;;  %v216_v38 = vld [vmem:[#allocation5 + $0x1d8] sm:$0xff] }
 0x117   :  { %v463_v40 = vld [vmem:[#allocation5 + $0x990] sm:$0xff]  ;;  %1140 = vmatpush.msrb.mxu3 %v663_v39  ;;  %1035 = vmatmul.f32.vlgmr.msra.gmra.mxu1 %v2106_v32  ;;  %v280_v39 = vld [vmem:[#allocation5 + $0x3d8] sm:$0xff] }
 0x118   :  { %v527_v41 = vld [vmem:[#allocation5 + $0xb90] sm:$0xff]  ;;  %1082 = vmatpush.msrb.mxu0 %v463_v40  ;;  %1075 = vmatmul.f32.vlgmr.msra.gmra.mxu3 %v2078_v8  ;;  %v220_v8 = vld [vmem:[#allocation5 + $0x1f8] sm:$0xff] }
 0x119   :  { %v591_v42 = vld [vmem:[#allocation5 + $0xd90] sm:$0xff]  ;;  %1102 = vmatpush.msrb.mxu1 %v527_v41  ;;  %v344_v40 = vld [vmem:[#allocation5 + $0x5d8] sm:$0xff] }
 0x11a   :  { %v659_v43 = vld [vmem:[#allocation5 + $0xfb0] sm:$0xff]  ;;  %1122 = vmatpush.msrb.mxu2 %v591_v42  ;;  %v412_v41 = vld [vmem:[#allocation5 + $0x7f8] sm:$0xff] }
 0x11b   :  { %v459_v44 = vld [vmem:[#allocation5 + $0x970] sm:$0xff]  ;;  %1141 = vmatpush.msrb.mxu3 %v659_v43  ;;  %v212_v42 = vld [vmem:[#allocation5 + $0x1b8] sm:$0xff] }
 0x11c   :  { %v523_v45 = vld [vmem:[#allocation5 + $0xb70] sm:$0xff]  ;;  %1083 = vmatpush.msrb.mxu0 %v459_v44  ;;  %v276_v43 = vld [vmem:[#allocation5 + $0x3b8] sm:$0xff] }
 0x11d   :  { %v587_v46 = vld [vmem:[#allocation5 + $0xd70] sm:$0xff]  ;;  %1103 = vmatpush.msrb.mxu1 %v523_v45  ;;  %v340_v44 = vld [vmem:[#allocation5 + $0x5b8] sm:$0xff] }
 0x11e   :  { %v655_v47 = vld [vmem:[#allocation5 + $0xf90] sm:$0xff]  ;;  %1123 = vmatpush.msrb.mxu2 %v587_v46  ;;  %v408_v45 = vld [vmem:[#allocation5 + $0x7d8] sm:$0xff] }
 0x11f   :  { %v455_v48 = vld [vmem:[#allocation5 + $0x950] sm:$0xff]  ;;  %1142 = vmatpush.msrb.mxu3 %v655_v47  ;;  %v272_v46 = vld [vmem:[#allocation5 + $0x398] sm:$0xff] }
 0x120   :  { %v519_v49 = vld [vmem:[#allocation5 + $0xb50] sm:$0xff]  ;;  %1084 = vmatpush.msrb.mxu0 %v455_v48  ;;  %v336_v47 = vld [vmem:[#allocation5 + $0x598] sm:$0xff] }
 0x121   :  { %v583_v50 = vld [vmem:[#allocation5 + $0xd50] sm:$0xff]  ;;  %1104 = vmatpush.msrb.mxu1 %v519_v49  ;;  %v404_v48 = vld [vmem:[#allocation5 + $0x7b8] sm:$0xff] }
 0x122   :  { %v651_v51 = vld [vmem:[#allocation5 + $0xf70] sm:$0xff]  ;;  %1124 = vmatpush.msrb.mxu2 %v583_v50  ;;  %v332_v49 = vld [vmem:[#allocation5 + $0x578] sm:$0xff] }
 0x123   :  { %v451_v52 = vld [vmem:[#allocation5 + $0x930] sm:$0xff]  ;;  %1143 = vmatpush.msrb.mxu3 %v651_v51  ;;  %v400_v50 = vld [vmem:[#allocation5 + $0x798] sm:$0xff] }
 0x124   :  { %v515_v53 = vld [vmem:[#allocation5 + $0xb30] sm:$0xff]  ;;  %1085 = vmatpush.msrb.mxu0 %v451_v52  ;;  %v200_v51 = vld [vmem:[#allocation5 + $0x158] sm:$0xff] }
 0x125   :  { %v579_v54 = vld [vmem:[#allocation5 + $0xd30] sm:$0xff]  ;;  %1105 = vmatpush.msrb.mxu1 %v515_v53  ;;  %v264_v52 = vld [vmem:[#allocation5 + $0x358] sm:$0xff] }
 0x126   :  { %v647_v55 = vld [vmem:[#allocation5 + $0xf50] sm:$0xff]  ;;  %1125 = vmatpush.msrb.mxu2 %v579_v54  ;;  %v396_v53 = vld [vmem:[#allocation5 + $0x778] sm:$0xff] }
 0x127   :  { %v447_v56 = vld [vmem:[#allocation5 + $0x910] sm:$0xff]  ;;  %1144 = vmatpush.msrb.mxu3 %v647_v55  ;;  %v196_v54 = vld [vmem:[#allocation5 + $0x138] sm:$0xff] }
 0x128   :  { %v511_v57 = vld [vmem:[#allocation5 + $0xb10] sm:$0xff]  ;;  %1086 = vmatpush.msrb.mxu0 %v447_v56  ;;  %v260_v55 = vld [vmem:[#allocation5 + $0x338] sm:$0xff] }
 0x129   :  { %v575_v58 = vld [vmem:[#allocation5 + $0xd10] sm:$0xff]  ;;  %1106 = vmatpush.msrb.mxu1 %v511_v57  ;;  %v324_v56 = vld [vmem:[#allocation5 + $0x538] sm:$0xff] }
 0x12a   :  { %v643_v59 = vld [vmem:[#allocation5 + $0xf30] sm:$0xff]  ;;  %1126 = vmatpush.msrb.mxu2 %v575_v58  ;;  %v392_v57 = vld [vmem:[#allocation5 + $0x758] sm:$0xff] }
 0x12b   :  { %v443_v60 = vld [vmem:[#allocation5 + $0x8f0] sm:$0xff]  ;;  %1145 = vmatpush.msrb.mxu3 %v643_v59  ;;  %v192_v58 = vld [vmem:[#allocation5 + $0x118] sm:$0xff] }
 0x12c   :  { %v507_v61 = vld [vmem:[#allocation5 + $0xaf0] sm:$0xff]  ;;  %1087 = vmatpush.msrb.mxu0 %v443_v60  ;;  %v256_v59 = vld [vmem:[#allocation5 + $0x318] sm:$0xff] }
 0x12d   :  { %v571_v62 = vld [vmem:[#allocation5 + $0xcf0] sm:$0xff]  ;;  %1107 = vmatpush.msrb.mxu1 %v507_v61  ;;  %v320_v60 = vld [vmem:[#allocation5 + $0x518] sm:$0xff] }
 0x12e   :  { %v639_v63 = vld [vmem:[#allocation5 + $0xf10] sm:$0xff]  ;;  %1127 = vmatpush.msrb.mxu2 %v571_v62  ;;  %v388_v61 = vld [vmem:[#allocation5 + $0x738] sm:$0xff] }
 0x12f   :  { %v439_v3 = vld [vmem:[#allocation5 + $0x8d0] sm:$0xff]  ;;  %1146 = vmatpush.msrb.mxu3 %v639_v63  ;;  %v188_v62 = vld [vmem:[#allocation5 + $0xf8] sm:$0xff] }
 0x130   :  { %v503_v4 = vld [vmem:[#allocation5 + $0xad0] sm:$0xff]  ;;  %1088 = vmatpush.msrb.mxu0 %v439_v3  ;;  %v252_v63 = vld [vmem:[#allocation5 + $0x2f8] sm:$0xff] }
 0x131   :  { %v567_v5 = vld [vmem:[#allocation5 + $0xcd0] sm:$0xff]  ;;  %1108 = vmatpush.msrb.mxu1 %v503_v4  ;;  %v316_v3 = vld [vmem:[#allocation5 + $0x4f8] sm:$0xff] }
 0x132   :  { %v635_v6 = vld [vmem:[#allocation5 + $0xef0] sm:$0xff]  ;;  %1128 = vmatpush.msrb.mxu2 %v567_v5  ;;  %v384_v4 = vld [vmem:[#allocation5 + $0x718] sm:$0xff] }
 0x133   :  { %v435_v7 = vld [vmem:[#allocation5 + $0x8b0] sm:$0xff]  ;;  %1147 = vmatpush.msrb.mxu3 %v635_v6  ;;  %v184_v5 = vld [vmem:[#allocation5 + $0xd8] sm:$0xff] }
 0x134   :  { %v499_v9 = vld [vmem:[#allocation5 + $0xab0] sm:$0xff]  ;;  %1089 = vmatpush.msrb.mxu0 %v435_v7  ;;  %v248_v6 = vld [vmem:[#allocation5 + $0x2d8] sm:$0xff] }
 0x135   :  { %v563_v10 = vld [vmem:[#allocation5 + $0xcb0] sm:$0xff]  ;;  %1109 = vmatpush.msrb.mxu1 %v499_v9  ;;  %v312_v7 = vld [vmem:[#allocation5 + $0x4d8] sm:$0xff] }
 0x136   :  { %v631_v11 = vld [vmem:[#allocation5 + $0xed0] sm:$0xff]  ;;  %1129 = vmatpush.msrb.mxu2 %v563_v10  ;;  %v380_v9 = vld [vmem:[#allocation5 + $0x6f8] sm:$0xff] }
 0x137   :  { %v431_v12 = vld [vmem:[#allocation5 + $0x890] sm:$0xff]  ;;  %1148 = vmatpush.msrb.mxu3 %v631_v11  ;;  %v180_v10 = vld [vmem:[#allocation5 + $0xb8] sm:$0xff] }
 0x138   :  { %v495_v13 = vld [vmem:[#allocation5 + $0xa90] sm:$0xff]  ;;  %1090 = vmatpush.msrb.mxu0 %v431_v12  ;;  %v244_v11 = vld [vmem:[#allocation5 + $0x2b8] sm:$0xff] }
 0x139   :  { %v559_v14 = vld [vmem:[#allocation5 + $0xc90] sm:$0xff]  ;;  %1110 = vmatpush.msrb.mxu1 %v495_v13  ;;  %v308_v12 = vld [vmem:[#allocation5 + $0x4b8] sm:$0xff] }
 0x13a   :  { %v627_v15 = vld [vmem:[#allocation5 + $0xeb0] sm:$0xff]  ;;  %1130 = vmatpush.msrb.mxu2 %v559_v14  ;;  %v376_v13 = vld [vmem:[#allocation5 + $0x6d8] sm:$0xff] }
 0x13b   :  { %v427_v16 = vld [vmem:[#allocation5 + $0x870] sm:$0xff]  ;;  %1149 = vmatpush.msrb.mxu3 %v627_v15  ;;  %v176_v14 = vld [vmem:[#allocation5 + $0x98] sm:$0xff] }
 0x13c   :  { %v491_v17 = vld [vmem:[#allocation5 + $0xa70] sm:$0xff]  ;;  %1091 = vmatpush.msrb.mxu0 %v427_v16  ;;  %v240_v15 = vld [vmem:[#allocation5 + $0x298] sm:$0xff] }
 0x13d   :  { %v555_v18 = vld [vmem:[#allocation5 + $0xc70] sm:$0xff]  ;;  %1111 = vmatpush.msrb.mxu1 %v491_v17  ;;  %v304_v16 = vld [vmem:[#allocation5 + $0x498] sm:$0xff] }
 0x13e   :  { %v623_v19 = vld [vmem:[#allocation5 + $0xe90] sm:$0xff]  ;;  %1131 = vmatpush.msrb.mxu2 %v555_v18  ;;  %v372_v17 = vld [vmem:[#allocation5 + $0x6b8] sm:$0xff] }
 0x13f   :  { %v423_v21 = vld [vmem:[#allocation5 + $0x850] sm:$0xff]  ;;  %1150 = vmatpush.msrb.mxu3 %v623_v19  ;;  %v172_v18 = vld [vmem:[#allocation5 + $0x78] sm:$0xff] }
 0x140   :  { %v487_v22 = vld [vmem:[#allocation5 + $0xa50] sm:$0xff]  ;;  %1092 = vmatpush.msrb.mxu0 %v423_v21  ;;  %v236_v19 = vld [vmem:[#allocation5 + $0x278] sm:$0xff] }
 0x141   :  { %v551_v23 = vld [vmem:[#allocation5 + $0xc50] sm:$0xff]  ;;  %1112 = vmatpush.msrb.mxu1 %v487_v22  ;;  %v300_v21 = vld [vmem:[#allocation5 + $0x478] sm:$0xff] }
 0x142   :  { %v619_v27 = vld [vmem:[#allocation5 + $0xe70] sm:$0xff]  ;;  %1132 = vmatpush.msrb.mxu2 %v551_v23  ;;  %v368_v22 = vld [vmem:[#allocation5 + $0x698] sm:$0xff] }
 0x143   :  { %v419_v28 = vld [vmem:[#allocation5 + $0x830] sm:$0xff]  ;;  %1151 = vmatpush.msrb.mxu3 %v619_v27  ;;  %v168_v23 = vld [vmem:[#allocation5 + $0x58] sm:$0xff] }
 0x144   :  { %v483_v29 = vld [vmem:[#allocation5 + $0xa30] sm:$0xff]  ;;  %1093 = vmatpush.msrb.mxu0 %v419_v28  ;;  %v232_v27 = vld [vmem:[#allocation5 + $0x258] sm:$0xff] }
 0x145   :  { %v547_v2 = vld [vmem:[#allocation5 + $0xc30] sm:$0xff]  ;;  %1113 = vmatpush.msrb.mxu1 %v483_v29  ;;  %v296_v28 = vld [vmem:[#allocation5 + $0x458] sm:$0xff] }
 0x146   :  { %v615_v30 = vld [vmem:[#allocation5 + $0xe50] sm:$0xff]  ;;  %1133 = vmatpush.msrb.mxu2 %v547_v2  ;;  %v364_v29 = vld [vmem:[#allocation5 + $0x678] sm:$0xff] }
 0x147   :  { %v415_v33 = vld [vmem:[#allocation5 + $0x810] sm:$0xff]  ;;  %1152 = vmatpush.msrb.mxu3 %v615_v30  ;;  %v164_v2 = vld [vmem:[#allocation5 + $0x38] sm:$0xff] }
 0x148   :  { %v479_v0 = vld [vmem:[#allocation5 + $0xa10] sm:$0xff]  ;;  %1094 = vmatpush.msrb.mxu0 %v415_v33  ;;  %v228_v30 = vld [vmem:[#allocation5 + $0x238] sm:$0xff] }
 0x149   :  { %v543_v34 = vld [vmem:[#allocation5 + $0xc10] sm:$0xff]  ;;  %1114 = vmatpush.msrb.mxu1 %v479_v0  ;;  %1095 = vmatmul.f32.vlgmr.msrb.gmra.mxu0 %v2083_v25  ;;  %v204_v25 = vld [vmem:[#allocation5 + $0x178] sm:$0xff] }
 0x14a   :  { %v611_v1 = vld [vmem:[#allocation5 + $0xe30] sm:$0xff]  ;;  %1134 = vmatpush.msrb.mxu2 %v543_v34  ;;  %1159 = vmatpush.msra.mxu0 %v220_v8  ;;  %v292_v33 = vld [vmem:[#allocation5 + $0x438] sm:$0xff] }
 0x14b   :  { %1153 = vmatpush.msrb.mxu3 %v611_v1  ;;  %v607_v37 = vld [vmem:[#allocation5 + $0xe10] sm:$0xff]  ;;  %1135 = vmatmul.f32.vlgmr.msrb.gmra.mxu2 %v2081_v20  ;;  %v208_v20 = vld [vmem:[#allocation5 + $0x198] sm:$0xff] }
 0x14c   :  { %1179 = vmatpush.msra.mxu1 %v284_v35  ;;  %1199 = vmatpush.msra.mxu2 %v348_v36  ;;  %v360_v0 = vld [vmem:[#allocation5 + $0x658] sm:$0xff] }
 0x14d   :  { %1154 = vmatpush.msrb.mxu3 %v607_v37  ;;  %1160 = vmatpush.msra.mxu0 %v216_v38  ;;  %v160_v34 = vld [vmem:[#allocation5 + $0x18] sm:$0xff] }
 0x14e   :  { %1155 = vmatmul.f32.vlgmr.msrb.gmra.mxu3 %v2086_v26  ;;  %1180 = vmatpush.msra.mxu1 %v280_v39  ;;  %v268_v26 = vld [vmem:[#allocation5 + $0x378] sm:$0xff] }
 0x14f   :  { %1200 = vmatpush.msra.mxu2 %v344_v40  ;;  %1219 = vmatpush.msra.mxu3 %v412_v41  ;;  %v224_v1 = vld [vmem:[#allocation5 + $0x218] sm:$0xff] }
 0x150   :  { %1115 = vmatmul.f32.vlgmr.msrb.gmra.mxu1 %v2089_v31  ;;  %1161 = vmatpush.msra.mxu0 %v212_v42  ;;  %v328_v31 = vld [vmem:[#allocation5 + $0x558] sm:$0xff] }
 0x151   :  { %1181 = vmatpush.msra.mxu1 %v276_v43  ;;  %1201 = vmatpush.msra.mxu2 %v340_v44  ;;  %v288_v8 = vld [vmem:[#allocation5 + $0x418] sm:$0xff] }
 0x152   :  { %1220 = vmatpush.msra.mxu3 %v408_v45  ;;  %1162 = vmatpush.msra.mxu0 %v208_v20  ;;  %v356_v35 = vld [vmem:[#allocation5 + $0x638] sm:$0xff] }
 0x153   :  { %1182 = vmatpush.msra.mxu1 %v272_v46  ;;  %1202 = vmatpush.msra.mxu2 %v336_v47  ;;  %v476_v36 = vld [vmem:[#allocation5 + $0x9f8] sm:$0xff] }
 0x154   :  { %1221 = vmatpush.msra.mxu3 %v404_v48  ;;  %1163 = vmatpush.msra.mxu0 %v204_v25  ;;  %v540_v37 = vld [vmem:[#allocation5 + $0xbf8] sm:$0xff] }
 0x155   :  { %1183 = vmatpush.msra.mxu1 %v268_v26  ;;  %1203 = vmatpush.msra.mxu2 %v332_v49  ;;  %v604_v38 = vld [vmem:[#allocation5 + $0xdf8] sm:$0xff] }
 0x156   :  { %1222 = vmatpush.msra.mxu3 %v400_v50  ;;  %1164 = vmatpush.msra.mxu0 %v200_v51  ;;  %v352_v39 = vld [vmem:[#allocation5 + $0x618] sm:$0xff] }
 0x157   :  { %1184 = vmatpush.msra.mxu1 %v264_v52  ;;  %1204 = vmatpush.msra.mxu2 %v328_v31  ;;  %v472_v40 = vld [vmem:[#allocation5 + $0x9d8] sm:$0xff] }
 0x158   :  { %1223 = vmatpush.msra.mxu3 %v396_v53  ;;  %1165 = vmatpush.msra.mxu0 %v196_v54  ;;  %v536_v41 = vld [vmem:[#allocation5 + $0xbd8] sm:$0xff] }
 0x159   :  { %1185 = vmatpush.msra.mxu1 %v260_v55  ;;  %1205 = vmatpush.msra.mxu2 %v324_v56  ;;  %v600_v42 = vld [vmem:[#allocation5 + $0xdd8] sm:$0xff] }
 0x15a   :  { %1224 = vmatpush.msra.mxu3 %v392_v57  ;;  %1166 = vmatpush.msra.mxu0 %v192_v58  ;;  %v668_v43 = vld [vmem:[#allocation5 + $0xff8] sm:$0xff] }
 0x15b   :  { %1186 = vmatpush.msra.mxu1 %v256_v59  ;;  %1206 = vmatpush.msra.mxu2 %v320_v60  ;;  %v468_v44 = vld [vmem:[#allocation5 + $0x9b8] sm:$0xff]  ;;  %v2113_v60 = vpop.f32.mrf.mxu0 }
 0x15c   :  { %1225 = vmatpush.msra.mxu3 %v388_v61  ;;  %1167 = vmatpush.msra.mxu0 %v188_v62  ;;  %v532_v45 = vld [vmem:[#allocation5 + $0xbb8] sm:$0xff] }
 0x15d   :  { %1187 = vmatpush.msra.mxu1 %v252_v63  ;;  %1207 = vmatpush.msra.mxu2 %v316_v3  ;;  %v596_v20 = vld [vmem:[#allocation5 + $0xdb8] sm:$0xff] }
 0x15e   :  { %1226 = vmatpush.msra.mxu3 %v384_v4  ;;  %1168 = vmatpush.msra.mxu0 %v184_v5  ;;  %v664_v46 = vld [vmem:[#allocation5 + $0xfd8] sm:$0xff] }
 0x15f   :  { %1188 = vmatpush.msra.mxu1 %v248_v6  ;;  %1208 = vmatpush.msra.mxu2 %v312_v7  ;;  %v464_v47 = vld [vmem:[#allocation5 + $0x998] sm:$0xff] }
 0x160   :  { %1227 = vmatpush.msra.mxu3 %v380_v9  ;;  %1169 = vmatpush.msra.mxu0 %v180_v10  ;;  %v528_v48 = vld [vmem:[#allocation5 + $0xb98] sm:$0xff]  ;;  %v2115_v9 = vpop.f32.mrf.mxu1 }
 0x161   :  { %1189 = vmatpush.msra.mxu1 %v244_v11  ;;  %1209 = vmatpush.msra.mxu2 %v308_v12  ;;  %v592_v25 = vld [vmem:[#allocation5 + $0xd98] sm:$0xff] }
 0x162   :  { %1228 = vmatpush.msra.mxu3 %v376_v13  ;;  %1170 = vmatpush.msra.mxu0 %v176_v14  ;;  %v660_v26 = vld [vmem:[#allocation5 + $0xfb8] sm:$0xff] }
 0x163   :  { %1190 = vmatpush.msra.mxu1 %v240_v15  ;;  %1210 = vmatpush.msra.mxu2 %v304_v16  ;;  %v460_v49 = vld [vmem:[#allocation5 + $0x978] sm:$0xff] }
 0x164   :  { %1229 = vmatpush.msra.mxu3 %v372_v17  ;;  %1171 = vmatpush.msra.mxu0 %v172_v18  ;;  %v524_v50 = vld [vmem:[#allocation5 + $0xb78] sm:$0xff]  ;;  %v2117_v18 = vpop.f32.mrf.mxu2 }
 0x165   :  { %1191 = vmatpush.msra.mxu1 %v236_v19  ;;  %1211 = vmatpush.msra.mxu2 %v300_v21  ;;  %v588_v51 = vld [vmem:[#allocation5 + $0xd78] sm:$0xff] }
 0x166   :  { %1230 = vmatpush.msra.mxu3 %v368_v22  ;;  %1172 = vmatpush.msra.mxu0 %v168_v23  ;;  %v656_v52 = vld [vmem:[#allocation5 + $0xf98] sm:$0xff] }
 0x167   :  { %1192 = vmatpush.msra.mxu1 %v232_v27  ;;  %1212 = vmatpush.msra.mxu2 %v296_v28  ;;  %v456_v31 = vld [vmem:[#allocation5 + $0x958] sm:$0xff]  ;;  %v2119_v27 = vpop.f32.mrf.mxu0 }
 0x168   :  { %1231 = vmatpush.msra.mxu3 %v364_v29  ;;  %1173 = vmatpush.msra.mxu0 %v164_v2  ;;  %v520_v53 = vld [vmem:[#allocation5 + $0xb58] sm:$0xff] }
 0x169   :  { %1193 = vmatpush.msra.mxu1 %v228_v30  ;;  %1213 = vmatpush.msra.mxu2 %v292_v33  ;;  %v584_v54 = vld [vmem:[#allocation5 + $0xd58] sm:$0xff]  ;;  %v2121_v30 = vpop.f32.mrf.mxu3 }
 0x16a   :  { %1232 = vmatpush.msra.mxu3 %v360_v0  ;;  %1174 = vmatpush.msra.mxu0 %v160_v34  ;;  %v652_v55 = vld [vmem:[#allocation5 + $0xf78] sm:$0xff]  ;;  %v1770_v0 = vld [vmem:[#allocation3 + $0x10] sm:$0xff] }
 0x16b   :  { %1194 = vmatpush.msra.mxu1 %v224_v1  ;;  %1214 = vmatpush.msra.mxu2 %v288_v8  ;;  %v452_v56 = vld [vmem:[#allocation5 + $0x938] sm:$0xff]  ;;  %v2123_v1 = vld [vmem:[#allocation7] sm:$0xf]  ;;  %v2125_v8 = vpop.f32.mrf.mxu1 }
 0x16c   :  { %1233 = vmatpush.msra.mxu3 %v356_v35  ;;  %1239 = vmatpush.msrb.mxu0 %v476_v36  ;;  %v516_v57 = vld [vmem:[#allocation5 + $0xb38] sm:$0xff] }
 0x16d   :  { %1259 = vmatpush.msrb.mxu1 %v540_v37  ;;  %1279 = vmatpush.msrb.mxu2 %v604_v38  ;;  %v580_v58 = vld [vmem:[#allocation5 + $0xd38] sm:$0xff] }
 0x16e   :  { %1234 = vmatpush.msra.mxu3 %v352_v39  ;;  %1240 = vmatpush.msrb.mxu0 %v472_v40  ;;  %v648_v59 = vld [vmem:[#allocation5 + $0xf58] sm:$0xff] }
 0x16f   :  { %1260 = vmatpush.msrb.mxu1 %v536_v41  ;;  %1280 = vmatpush.msrb.mxu2 %v600_v42  ;;  %v448_v61 = vld [vmem:[#allocation5 + $0x918] sm:$0xff]  ;;  %v671_v41 = vperm.slane %v2123_v1, 0 }
 0x170   :  { %1299 = vmatpush.msrb.mxu3 %v668_v43  ;;  %1241 = vmatpush.msrb.mxu0 %v468_v44  ;;  %v512_v62 = vld [vmem:[#allocation5 + $0xb18] sm:$0xff]  ;;  %v672_v44 = vperm.slane %v2123_v1, 1 }
 0x171   :  { %1261 = vmatpush.msrb.mxu1 %v532_v45  ;;  %1281 = vmatpush.msrb.mxu2 %v596_v20  ;;  %v576_v63 = vld [vmem:[#allocation5 + $0xd18] sm:$0xff]  ;;  %v2130_v45 = vpop.f32.mrf.mxu2 }
 0x172   :  { %1300 = vmatpush.msrb.mxu3 %v664_v46  ;;  %1242 = vmatpush.msrb.mxu0 %v464_v47  ;;  %v644_v3 = vld [vmem:[#allocation5 + $0xf38] sm:$0xff]  ;;  %v856_v46 = vpop.f32.mrf.mxu0 }
 0x173   :  { %1262 = vmatpush.msrb.mxu1 %v528_v48  ;;  %1282 = vmatpush.msrb.mxu2 %v592_v25  ;;  %v444_v4 = vld [vmem:[#allocation5 + $0x8f8] sm:$0xff] }
 0x174   :  { %1301 = vmatpush.msrb.mxu3 %v660_v26  ;;  %1243 = vmatpush.msrb.mxu0 %v460_v49  ;;  %v508_v5 = vld [vmem:[#allocation5 + $0xaf8] sm:$0xff]  ;;  %v697_v26 = vadd.f32 %v2113_v60, %v671_v41 }
 0x175   :  { %1263 = vmatpush.msrb.mxu1 %v524_v50  ;;  %1283 = vmatpush.msrb.mxu2 %v588_v51  ;;  %v572_v6 = vld [vmem:[#allocation5 + $0xcf8] sm:$0xff]  ;;  %v857_v51 = vadd.f32 %v856_v46, %v672_v44  ;;  %v1399_v44 = vld [vmem:[#allocation8 + $0x260] sm:$0xff] }
 0x176   :  { %1302 = vmatpush.msrb.mxu3 %v656_v52  ;;  %1244 = vmatpush.msrb.mxu0 %v456_v31  ;;  %v640_v7 = vld [vmem:[#allocation5 + $0xf18] sm:$0xff]  ;;  %v2134_v52 = vpop.f32.mrf.mxu3  ;;  %v1772_v31 = vld [vmem:[#allocation3 + $0x30] sm:$0xff] }
 0x177   :  { %1264 = vmatpush.msrb.mxu1 %v520_v53  ;;  %1284 = vmatpush.msrb.mxu2 %v584_v54  ;;  %v440_v10 = vld [vmem:[#allocation5 + $0x8d8] sm:$0xff]  ;;  %v1351_v53 = vld [vmem:[#allocation8 + $0xe0] sm:$0xff] }
 0x178   :  { %1303 = vmatpush.msrb.mxu3 %v652_v55  ;;  %1245 = vmatpush.msrb.mxu0 %v452_v56  ;;  %v504_v11 = vld [vmem:[#allocation5 + $0xad8] sm:$0xff]  ;;  %v1383_v54 = vld [vmem:[#allocation8 + $0x1e0] sm:$0xff]  ;;  %v717_v56 = vadd.f32 %v2115_v9, %v697_v26 }
 0x179   :  { %1265 = vmatpush.msrb.mxu1 %v516_v57  ;;  %1285 = vmatpush.msrb.mxu2 %v580_v58  ;;  %v568_v12 = vld [vmem:[#allocation5 + $0xcd8] sm:$0xff]  ;;  %v1773_v57 = vld [vmem:[#allocation3 + $0x20] sm:$0xff] }
 0x17a   :  { %1304 = vmatpush.msrb.mxu3 %v648_v59  ;;  %1246 = vmatpush.msrb.mxu0 %v448_v61  ;;  %v636_v13 = vld [vmem:[#allocation5 + $0xef8] sm:$0xff] }
 0x17b   :  { %1266 = vmatpush.msrb.mxu1 %v512_v62  ;;  %1286 = vmatpush.msrb.mxu2 %v576_v63  ;;  %v436_v14 = vld [vmem:[#allocation5 + $0x8b8] sm:$0xff]  ;;  %v896_v62 = vpop.f32.mrf.mxu2  ;;  %v1415_v63 = vld [vmem:[#allocation8 + $0x2e0] sm:$0xff] }
 0x17c   :  { %1305 = vmatpush.msrb.mxu3 %v644_v3  ;;  %1247 = vmatpush.msrb.mxu0 %v444_v4  ;;  %v500_v15 = vld [vmem:[#allocation5 + $0xab8] sm:$0xff]  ;;  %v1775_v3 = vld [vmem:[#allocation3 + $0x28] sm:$0xff] }
 0x17d   :  { %1267 = vmatpush.msrb.mxu1 %v508_v5  ;;  %1287 = vmatpush.msrb.mxu2 %v572_v6  ;;  %v564_v16 = vld [vmem:[#allocation5 + $0xcb8] sm:$0xff]  ;;  %v1347_v4 = vld [vmem:[#allocation8 + $0xc0] sm:$0xff] }
 0x17e   :  { %1306 = vmatpush.msrb.mxu3 %v640_v7  ;;  %1248 = vmatpush.msrb.mxu0 %v440_v10  ;;  %v632_v17 = vld [vmem:[#allocation5 + $0xed8] sm:$0xff]  ;;  %v1379_v5 = vld [vmem:[#allocation8 + $0x1c0] sm:$0xff]  ;;  %v737_v7 = vadd.f32 %v2117_v18, %v717_v56  ;;  %v936_v18 = vpop.f32.mrf.mxu0 }
 0x17f   :  { %1268 = vmatpush.msrb.mxu1 %v504_v11  ;;  %1288 = vmatpush.msrb.mxu2 %v568_v12  ;;  %v432_v19 = vld [vmem:[#allocation5 + $0x898] sm:$0xff]  ;;  %v916_v12 = vpop.f32.mrf.mxu3  ;;  %v1323_v56 = vld [vmem:[#allocation8] sm:$0xff] }
 0x180   :  { %1307 = vmatpush.msrb.mxu3 %v636_v13  ;;  %v496_v21 = vld [vmem:[#allocation5 + $0xa98] sm:$0xff]  ;;  %1249 = vmatpush.msrb.mxu0 %v436_v14  ;;  %v1411_v13 = vld [vmem:[#allocation8 + $0x2c0] sm:$0xff] }
 0x181   :  { %1269 = vmatpush.msrb.mxu1 %v500_v15  ;;  %v560_v22 = vld [vmem:[#allocation5 + $0xc98] sm:$0xff]  ;;  %1289 = vmatpush.msrb.mxu2 %v564_v16  ;;  %v1343_v14 = vld [vmem:[#allocation8 + $0xa0] sm:$0xff] }
 0x182   :  { %v628_v23 = vld [vmem:[#allocation5 + $0xeb8] sm:$0xff]  ;;  %1308 = vmatpush.msrb.mxu3 %v632_v17  ;;  %1250 = vmatpush.msrb.mxu0 %v432_v19  ;;  %v1375_v15 = vld [vmem:[#allocation8 + $0x1a0] sm:$0xff]  ;;  %v757_v17 = vadd.f32 %v2121_v30, %v737_v7  ;;  %v1348_v7 = vld [vmem:[#allocation8 + $0xc8] sm:$0xff] }
 0x183   :  { %v428_v28 = vld [vmem:[#allocation5 + $0x878] sm:$0xff]  ;;  %1270 = vmatpush.msrb.mxu1 %v496_v21  ;;  %1290 = vmatpush.msrb.mxu2 %v560_v22 }
 0x184   :  { %v492_v29 = vld [vmem:[#allocation5 + $0xa78] sm:$0xff]  ;;  %1309 = vmatpush.msrb.mxu3 %v628_v23  ;;  %1215 = vmatmul.f32.vlgmr.msra.gmra.mxu2 %v1770_v0  ;;  %v1407_v23 = vld [vmem:[#allocation8 + $0x2a0] sm:$0xff] }
 0x185   :  { %v556_v2 = vld [vmem:[#allocation5 + $0xc78] sm:$0xff]  ;;  %1251 = vmatpush.msrb.mxu0 %v428_v28  ;;  %1271 = vmatpush.msrb.mxu1 %v492_v29  ;;  %v1339_v28 = vld [vmem:[#allocation8 + $0x80] sm:$0xff] }
 0x186   :  { %v624_v33 = vld [vmem:[#allocation5 + $0xe98] sm:$0xff]  ;;  %1291 = vmatpush.msrb.mxu2 %v556_v2  ;;  %1175 = vmatmul.f32.vlgmr.msra.gmra.mxu0 %v2102_v24  ;;  %v1371_v29 = vld [vmem:[#allocation8 + $0x180] sm:$0xff] }
 0x187   :  { %v424_v34 = vld [vmem:[#allocation5 + $0x858] sm:$0xff]  ;;  %1310 = vmatpush.msrb.mxu3 %v624_v33  ;;  %1195 = vmatmul.f32.vlgmr.msra.gmra.mxu1 %v2106_v32  ;;  %v876_v32 = vpop.f32.mrf.mxu1  ;;  %v777_v33 = vadd.f32 %v2119_v27, %v757_v17  ;;  %v976_v27 = vpop.f32.mrf.mxu2  ;;  %v1412_v17 = vld [vmem:[#allocation8 + $0x2c8] sm:$0xff] }
 0x188   :  { %v488_v35 = vld [vmem:[#allocation5 + $0xa58] sm:$0xff]  ;;  %1252 = vmatpush.msrb.mxu0 %v424_v34  ;;  %v877_v61 = vadd.f32 %v876_v32, %v857_v51  ;;  %v1359_v51 = vld [vmem:[#allocation8 + $0x120] sm:$0xff] }
 0x189   :  { %v552_v36 = vld [vmem:[#allocation5 + $0xc58] sm:$0xff]  ;;  %1272 = vmatpush.msrb.mxu1 %v488_v35 }
 0x18a   :  { %v620_v37 = vld [vmem:[#allocation5 + $0xe78] sm:$0xff]  ;;  %1292 = vmatpush.msrb.mxu2 %v552_v36  ;;  %v897_v9 = vadd.f32 %v896_v62, %v877_v61  ;;  %v1403_v36 = vld [vmem:[#allocation8 + $0x280] sm:$0xff]  ;;  %v1352_v62 = vld [vmem:[#allocation8 + $0xe8] sm:$0xff] }
 0x18b   :  { %v1771_v38 = vld [vmem:[#allocation3 + $0x18] sm:$0xff]  ;;  %1311 = vmatpush.msrb.mxu3 %v620_v37  ;;  %v1335_v37 = vld [vmem:[#allocation8 + $0x60] sm:$0xff] }
 0x18c   :  { %1235 = vmatmul.f32.vlgmr.msra.gmra.mxu3 %v1771_v38  ;;  %v420_v39 = vld [vmem:[#allocation5 + $0x838] sm:$0xff]  ;;  %v917_v19 = vadd.f32 %v916_v12, %v897_v9  ;;  %v1367_v38 = vld [vmem:[#allocation8 + $0x160] sm:$0xff]  ;;  %v1380_v9 = vld [vmem:[#allocation8 + $0x1c8] sm:$0xff] }
 0x18d   :  { %v484_v40 = vld [vmem:[#allocation5 + $0xa38] sm:$0xff]  ;;  %1253 = vmatpush.msrb.mxu0 %v420_v39 }
 0x18e   :  { %v548_v42 = vld [vmem:[#allocation5 + $0xc38] sm:$0xff]  ;;  %1273 = vmatpush.msrb.mxu1 %v484_v40  ;;  %v937_v0 = vadd.f32 %v936_v18, %v917_v19  ;;  %v797_v40 = vadd.f32 %v2125_v8, %v777_v33  ;;  %v996_v8 = vpop.f32.mrf.mxu3  ;;  %v1340_v18 = vld [vmem:[#allocation8 + $0x88] sm:$0xff]  ;;  %v673_v33 = vperm.slane %v2123_v1, 2 }
 0x18f   :  { %v616_v43 = vld [vmem:[#allocation5 + $0xe58] sm:$0xff]  ;;  %1293 = vmatpush.msrb.mxu2 %v548_v42  ;;  %v956_v30 = vpop.f32.mrf.mxu1 }
 0x190   :  { %v416_v24 = vld [vmem:[#allocation5 + $0x818] sm:$0xff]  ;;  %1312 = vmatpush.msrb.mxu3 %v616_v43  ;;  %v957_v41 = vadd.f32 %v956_v30, %v937_v0  ;;  %v1336_v30 = vld [vmem:[#allocation8 + $0x68] sm:$0xff] }
 0x191   :  { %v480_v20 = vld [vmem:[#allocation5 + $0xa18] sm:$0xff]  ;;  %1254 = vmatpush.msrb.mxu0 %v416_v24  ;;  %v1331_v24 = vld [vmem:[#allocation8 + $0x40] sm:$0xff] }
 0x192   :  { %v544_v47 = vld [vmem:[#allocation5 + $0xc18] sm:$0xff]  ;;  %1274 = vmatpush.msrb.mxu1 %v480_v20  ;;  %1255 = vmatmul.f32.vlgmr.msrb.gmra.mxu0 %v1773_v57  ;;  %v1363_v20 = vld [vmem:[#allocation8 + $0x140] sm:$0xff] }
 0x193   :  { %v612_v48 = vld [vmem:[#allocation5 + $0xe38] sm:$0xff]  ;;  %1294 = vmatpush.msrb.mxu2 %v544_v47  ;;  %1275 = vmatmul.f32.vlgmr.msrb.gmra.mxu1 %v1775_v3  ;;  %v817_v47 = vadd.f32 %v2130_v45, %v797_v40  ;;  %v1355_v57 = vld [vmem:[#allocation8 + $0x100] sm:$0xff] }
 0x194   :  { %v1353_v25 = vld [vmem:[#allocation8 + $0xf0] sm:$0xff]  ;;  %1313 = vmatpush.msrb.mxu3 %v612_v48  ;;  %1295 = vmatmul.f32.vlgmr.msrb.gmra.mxu2 %v1772_v31  ;;  %v977_v48 = vadd.f32 %v976_v27, %v957_v41  ;;  %v1387_v3 = vld [vmem:[#allocation8 + $0x200] sm:$0xff]  ;;  %v1378_v12 = vld [vmem:[#allocation8 + $0x1b8] sm:$0xff] }
 0x195   :  { %v1385_v49 = vld [vmem:[#allocation8 + $0x1f0] sm:$0xff]  ;;  %1457 = vmatpush.msra.mxu0 %v1353_v25  ;;  %v2143_v31 = vadd.f32 %v2134_v52, %v817_v47  ;;  %v1386_v52 = vld [vmem:[#allocation8 + $0x1f8] sm:$0xff] }
 0x196   :  { %v608_v50 = vld [vmem:[#allocation5 + $0xe18] sm:$0xff]  ;;  %1477 = vmatpush.msra.mxu1 %v1385_v49  ;;  %v1395_v49 = vld [vmem:[#allocation8 + $0x240] sm:$0xff] }
 0x197   :  { %1314 = vmatpush.msrb.mxu3 %v608_v50  ;;  %v1417_v55 = vld [vmem:[#allocation8 + $0x2f0] sm:$0xff]  ;;  %1458 = vmatpush.msra.mxu0 %v1351_v53  ;;  %v1327_v50 = vld [vmem:[#allocation8 + $0x20] sm:$0xff]  ;;  %v2145_v53 = vadd.f32 %v996_v8, %v977_v48  ;;  %v1342_v19 = vld [vmem:[#allocation8 + $0x98] sm:$0xff] }
 0x198   :  { %v1774_v58 = vld [vmem:[#allocation3 + $0x38] sm:$0xff]  ;;  %1478 = vmatpush.msra.mxu1 %v1383_v54  ;;  %1497 = vmatpush.msra.mxu2 %v1417_v55  ;;  %v1391_v55 = vld [vmem:[#allocation8 + $0x220] sm:$0xff]  ;;  %v1056_v47 = vpop.f32.mrf.mxu2  ;;  %v1400_v48 = vld [vmem:[#allocation8 + $0x268] sm:$0xff] }
 0x199   :  { %1315 = vmatmul.f32.vlgmr.msrb.gmra.mxu3 %v1774_v58  ;;  %v1349_v59 = vld [vmem:[#allocation8 + $0xd0] sm:$0xff]  ;;  %v1319_v58 = vmax.f32 %v2143_v31, 0.0  ;;  %v1406_v0 = vld [vmem:[#allocation8 + $0x298] sm:$0xff]  ;;  %v1423_v31 = vld [vmem:[#allocation8 + $0x320] sm:$0xff] }
 0x19a   :  { %v1381_v60 = vld [vmem:[#allocation8 + $0x1d0] sm:$0xff]  ;;  %1459 = vmatpush.msra.mxu0 %v1349_v59  ;;  %1498 = vmatpush.msra.mxu2 %v1415_v63  ;;  %v1320_v59 = vmax.f32 %v2145_v53, 0.0  ;;  %v1384_v63 = vld [vmem:[#allocation8 + $0x1e8] sm:$0xff]  ;;  %v1334_v40 = vld [vmem:[#allocation8 + $0x58] sm:$0xff] }
 0x19b   :  { %1479 = vmatpush.msra.mxu1 %v1381_v60  ;;  %v1413_v6 = vld [vmem:[#allocation8 + $0x2d0] sm:$0xff]  ;;  %v1354_v60 = vld [vmem:[#allocation8 + $0xf8] sm:$0xff] }
 0x19c   :  { %v1345_v10 = vld [vmem:[#allocation8 + $0xb0] sm:$0xff]  ;;  %1460 = vmatpush.msra.mxu0 %v1347_v4  ;;  %1499 = vmatpush.msra.mxu2 %v1413_v6  ;;  %v1350_v4 = vld [vmem:[#allocation8 + $0xd8] sm:$0xff] }
 0x19d   :  { %v1377_v11 = vld [vmem:[#allocation8 + $0x1b0] sm:$0xff]  ;;  %1480 = vmatpush.msra.mxu1 %v1379_v5  ;;  %v1382_v5 = vld [vmem:[#allocation8 + $0x1d8] sm:$0xff] }
 0x19e   :  { %1461 = vmatpush.msra.mxu0 %v1345_v10  ;;  %v1409_v16 = vld [vmem:[#allocation8 + $0x2b0] sm:$0xff]  ;;  %1500 = vmatpush.msra.mxu2 %v1411_v13  ;;  %v1418_v6 = vld [vmem:[#allocation8 + $0x2f8] sm:$0xff]  ;;  %v1416_v10 = vld [vmem:[#allocation8 + $0x2e8] sm:$0xff] }
 0x19f   :  { %1481 = vmatpush.msra.mxu1 %v1377_v11  ;;  %v1341_v21 = vld [vmem:[#allocation8 + $0x90] sm:$0xff]  ;;  %v1346_v11 = vld [vmem:[#allocation8 + $0xb8] sm:$0xff] }
 0x1a0   :  { %v1373_v22 = vld [vmem:[#allocation8 + $0x190] sm:$0xff]  ;;  %1462 = vmatpush.msra.mxu0 %v1343_v14  ;;  %1501 = vmatpush.msra.mxu2 %v1409_v16  ;;  %v1414_v13 = vld [vmem:[#allocation8 + $0x2d8] sm:$0xff]  ;;  %v1344_v14 = vld [vmem:[#allocation8 + $0xa8] sm:$0xff] }
 0x1a1   :  { %1482 = vmatpush.msra.mxu1 %v1375_v15  ;;  %v1405_v2 = vld [vmem:[#allocation8 + $0x290] sm:$0xff]  ;;  %v1376_v15 = vld [vmem:[#allocation8 + $0x1a8] sm:$0xff]  ;;  %v1366_v41 = vld [vmem:[#allocation8 + $0x158] sm:$0xff] }
 0x1a2   :  { %1463 = vmatpush.msra.mxu0 %v1341_v21  ;;  %v1337_v34 = vld [vmem:[#allocation8 + $0x70] sm:$0xff]  ;;  %1502 = vmatpush.msra.mxu2 %v1407_v23  ;;  %v1374_v21 = vld [vmem:[#allocation8 + $0x198] sm:$0xff]  ;;  %v1372_v23 = vld [vmem:[#allocation8 + $0x188] sm:$0xff] }
 0x1a3   :  { %1483 = vmatpush.msra.mxu1 %v1373_v22  ;;  %v1369_v35 = vld [vmem:[#allocation8 + $0x170] sm:$0xff]  ;;  %v1410_v22 = vld [vmem:[#allocation8 + $0x2b8] sm:$0xff] }
 0x1a4   :  { %1464 = vmatpush.msra.mxu0 %v1339_v28  ;;  %1503 = vmatpush.msra.mxu2 %v1405_v2  ;;  %v1401_v39 = vld [vmem:[#allocation8 + $0x270] sm:$0xff]  ;;  %v1408_v28 = vld [vmem:[#allocation8 + $0x2a8] sm:$0xff]  ;;  %v1370_v2 = vld [vmem:[#allocation8 + $0x178] sm:$0xff] }
 0x1a5   :  { %1484 = vmatpush.msra.mxu1 %v1371_v29  ;;  %v1333_v42 = vld [vmem:[#allocation8 + $0x50] sm:$0xff]  ;;  %v1338_v29 = vld [vmem:[#allocation8 + $0x78] sm:$0xff] }
 0x1a6   :  { %1465 = vmatpush.msra.mxu0 %v1337_v34  ;;  %v1365_v43 = vld [vmem:[#allocation8 + $0x150] sm:$0xff]  ;;  %1504 = vmatpush.msra.mxu2 %v1403_v36  ;;  %v1447_v34 = vld [vmem:[#allocation8 + $0x3e0] sm:$0xff]  ;;  %v1368_v36 = vld [vmem:[#allocation8 + $0x168] sm:$0xff] }
 0x1a7   :  { %1485 = vmatpush.msra.mxu1 %v1369_v35  ;;  %v1397_v46 = vld [vmem:[#allocation8 + $0x250] sm:$0xff]  ;;  %v1362_v8 = vld [vmem:[#allocation8 + $0x138] sm:$0xff] }
 0x1a8   :  { %1466 = vmatpush.msra.mxu0 %v1335_v37  ;;  %1505 = vmatpush.msra.mxu2 %v1401_v39  ;;  %v1329_v25 = vld [vmem:[#allocation8 + $0x30] sm:$0xff]  ;;  %v1016_v37 = vpop.f32.mrf.mxu0  ;;  %v1443_v39 = vld [vmem:[#allocation8 + $0x3c0] sm:$0xff] }
 0x1a9   :  { %1486 = vmatpush.msra.mxu1 %v1367_v38  ;;  %v1361_v26 = vld [vmem:[#allocation8 + $0x130] sm:$0xff]  ;;  %v1404_v38 = vld [vmem:[#allocation8 + $0x288] sm:$0xff] }
 0x1aa   :  { %1467 = vmatpush.msra.mxu0 %v1333_v42  ;;  %1506 = vmatpush.msra.mxu2 %v1399_v44  ;;  %v1393_v32 = vld [vmem:[#allocation8 + $0x230] sm:$0xff]  ;;  %v1017_v42 = vadd.f32 %v1016_v37, %v673_v33  ;;  %v1332_v44 = vld [vmem:[#allocation8 + $0x48] sm:$0xff]  ;;  %v1438_v33 = vld [vmem:[#allocation8 + $0x398] sm:$0xff] }
 0x1ab   :  { %1487 = vmatpush.msra.mxu1 %v1365_v43  ;;  %v1325_v45 = vld [vmem:[#allocation8 + $0x10] sm:$0xff]  ;;  %v1402_v43 = vld [vmem:[#allocation8 + $0x278] sm:$0xff] }
 0x1ac   :  { %1468 = vmatpush.msra.mxu0 %v1331_v24  ;;  %1507 = vmatpush.msra.mxu2 %v1397_v46  ;;  %v1357_v54 = vld [vmem:[#allocation8 + $0x110] sm:$0xff]  ;;  %v1364_v24 = vld [vmem:[#allocation8 + $0x148] sm:$0xff]  ;;  %v1426_v37 = vld [vmem:[#allocation8 + $0x338] sm:$0xff] }
 0x1ad   :  { %1488 = vmatpush.msra.mxu1 %v1363_v20  ;;  %v1389_v61 = vld [vmem:[#allocation8 + $0x210] sm:$0xff]  ;;  %v1036_v20 = vpop.f32.mrf.mxu1 }
 0x1ae   :  { %1469 = vmatpush.msra.mxu0 %v1329_v25  ;;  %1508 = vmatpush.msra.mxu2 %v1395_v49  ;;  %v1449_v16 = vld [vmem:[#allocation8 + $0x3f0] sm:$0xff]  ;;  %v1037_v46 = vadd.f32 %v1036_v20, %v1017_v42  ;;  %v1439_v25 = vld [vmem:[#allocation8 + $0x3a0] sm:$0xff] }
 0x1af   :  { %1489 = vmatpush.msra.mxu1 %v1361_v26  ;;  %1517 = vmatpush.msra.mxu3 %v1449_v16  ;;  %v1445_v35 = vld [vmem:[#allocation8 + $0x3d0] sm:$0xff]  ;;  %v1330_v26 = vld [vmem:[#allocation8 + $0x38] sm:$0xff]  ;;  %v1388_v16 = vld [vmem:[#allocation8 + $0x208] sm:$0xff] }
 0x1b0   :  { %1470 = vmatpush.msra.mxu0 %v1327_v50  ;;  %1509 = vmatpush.msra.mxu2 %v1393_v32  ;;  %v1441_v27 = vld [vmem:[#allocation8 + $0x3b0] sm:$0xff]  ;;  %v1057_v49 = vadd.f32 %v1056_v47, %v1037_v46  ;;  %v1398_v50 = vld [vmem:[#allocation8 + $0x258] sm:$0xff]  ;;  %v1328_v32 = vld [vmem:[#allocation8 + $0x28] sm:$0xff] }
 0x1b1   :  { %1490 = vmatpush.msra.mxu1 %v1359_v51  ;;  %1518 = vmatpush.msra.mxu3 %v1447_v34  ;;  %v1437_v51 = vld [vmem:[#allocation8 + $0x390] sm:$0xff]  ;;  %v1434_v34 = vld [vmem:[#allocation8 + $0x378] sm:$0xff] }
 0x1b2   :  { %1471 = vmatpush.msra.mxu0 %v1325_v45  ;;  %1510 = vmatpush.msra.mxu2 %v1391_v55  ;;  %v1360_v45 = vld [vmem:[#allocation8 + $0x128] sm:$0xff]  ;;  %v1421_v53 = vld [vmem:[#allocation8 + $0x310] sm:$0xff] }
 0x1b3   :  { %1491 = vmatpush.msra.mxu1 %v1357_v54  ;;  %1519 = vmatpush.msra.mxu3 %v1445_v35  ;;  %v1076_v54 = vpop.f32.mrf.mxu3  ;;  %v1432_v35 = vld [vmem:[#allocation8 + $0x368] sm:$0xff] }
 0x1b4   :  { %1472 = vmatpush.msra.mxu0 %v1323_v56  ;;  %1511 = vmatpush.msra.mxu2 %v1389_v61  ;;  %v1077_v55 = vadd.f32 %v1076_v54, %v1057_v49  ;;  %v1396_v56 = vld [vmem:[#allocation8 + $0x248] sm:$0xff]  ;;  %v1451_v54 = vld [vmem:[#allocation10] sm:$0x3] }
 0x1b5   :  { %1492 = vmatpush.msra.mxu1 %v1355_v57  ;;  %1473 = vmatmul.f32.vlgmr.msra.gmra.mxu0 %v1319_v58  ;;  %v1435_v57 = vld [vmem:[#allocation8 + $0x380] sm:$0xff] }
 0x1b6   :  { %1493 = vmatmul.f32.vlgmr.msra.gmra.mxu1 %v1320_v59  ;;  %1537 = vmatpush.msrb.mxu0 %v1354_v60  ;;  %v1326_v60 = vld [vmem:[#allocation8 + $0x18] sm:$0xff] }
 0x1b7   :  { %1557 = vmatpush.msrb.mxu1 %v1386_v52  ;;  %1512 = vmatpush.msra.mxu2 %v1387_v3  ;;  %v1358_v52 = vld [vmem:[#allocation8 + $0x118] sm:$0xff]  ;;  %v1324_v3 = vld [vmem:[#allocation8 + $0x8] sm:$0xff] }
 0x1b8   :  { %1538 = vmatpush.msrb.mxu0 %v1352_v62  ;;  %1520 = vmatpush.msra.mxu3 %v1443_v39  ;;  %v1394_v62 = vld [vmem:[#allocation8 + $0x238] sm:$0xff] }
 0x1b9   :  { %1558 = vmatpush.msrb.mxu1 %v1384_v63  ;;  %1577 = vmatpush.msrb.mxu2 %v1418_v6  ;;  %v1433_v63 = vld [vmem:[#allocation8 + $0x370] sm:$0xff]  ;;  %v1422_v39 = vld [vmem:[#allocation8 + $0x318] sm:$0xff] }
 0x1ba   :  { %1539 = vmatpush.msrb.mxu0 %v1350_v4  ;;  %1521 = vmatpush.msra.mxu3 %v1441_v27  ;;  %v1356_v4 = vld [vmem:[#allocation8 + $0x108] sm:$0xff] }
 0x1bb   :  { %1559 = vmatpush.msrb.mxu1 %v1382_v5  ;;  %1578 = vmatpush.msrb.mxu2 %v1416_v10 }
 0x1bc   :  { %1540 = vmatpush.msrb.mxu0 %v1348_v7  ;;  %1522 = vmatpush.msra.mxu3 %v1439_v25  ;;  %v1392_v7 = vld [vmem:[#allocation8 + $0x228] sm:$0xff] }
 0x1bd   :  { %1560 = vmatpush.msrb.mxu1 %v1380_v9  ;;  %1579 = vmatpush.msrb.mxu2 %v1414_v13  ;;  %v1431_v9 = vld [vmem:[#allocation8 + $0x360] sm:$0xff]  ;;  %v1429_v13 = vld [vmem:[#allocation8 + $0x350] sm:$0xff] }
 0x1be   :  { %1541 = vmatpush.msrb.mxu0 %v1346_v11  ;;  %1523 = vmatpush.msra.mxu3 %v1437_v51 }
 0x1bf   :  { %1561 = vmatpush.msrb.mxu1 %v1378_v12  ;;  %1580 = vmatpush.msrb.mxu2 %v1412_v17  ;;  %v1390_v12 = vld [vmem:[#allocation8 + $0x218] sm:$0xff]  ;;  %v1427_v17 = vld [vmem:[#allocation8 + $0x340] sm:$0xff] }
 0x1c0   :  { %1542 = vmatpush.msrb.mxu0 %v1344_v14  ;;  %1524 = vmatpush.msra.mxu3 %v1435_v57  ;;  %v1453_v57 = vperm.slane %v1451_v54, 0 }
 0x1c1   :  { %1562 = vmatpush.msrb.mxu1 %v1376_v15  ;;  %1581 = vmatpush.msrb.mxu2 %v1410_v22 }
 0x1c2   :  { %1543 = vmatpush.msrb.mxu0 %v1342_v19  ;;  %1525 = vmatpush.msra.mxu3 %v1433_v63 }
 0x1c3   :  { %1563 = vmatpush.msrb.mxu1 %v1374_v21  ;;  %1582 = vmatpush.msrb.mxu2 %v1408_v28  ;;  %v1425_v21 = vld [vmem:[#allocation8 + $0x330] sm:$0xff]  ;;  %v1444_v28 = vld [vmem:[#allocation8 + $0x3c8] sm:$0xff] }
 0x1c4   :  { %1544 = vmatpush.msrb.mxu0 %v1340_v18  ;;  %1526 = vmatpush.msra.mxu3 %v1431_v9  ;;  %v1448_v18 = vld [vmem:[#allocation8 + $0x3e8] sm:$0xff] }
 0x1c5   :  { %1564 = vmatpush.msrb.mxu1 %v1372_v23  ;;  %1583 = vmatpush.msrb.mxu2 %v1406_v0  ;;  %v1446_v23 = vld [vmem:[#allocation8 + $0x3d8] sm:$0xff]  ;;  %v1436_v0 = vld [vmem:[#allocation8 + $0x388] sm:$0xff] }
 0x1c6   :  { %1545 = vmatpush.msrb.mxu0 %v1338_v29  ;;  %v1096_v61 = vpop.f32.mrf.mxu0  ;;  %1527 = vmatpush.msra.mxu3 %v1429_v13  ;;  %v1442_v29 = vld [vmem:[#allocation8 + $0x3b8] sm:$0xff] }
 0x1c7   :  { %1565 = vmatpush.msrb.mxu1 %v1370_v2  ;;  %1584 = vmatpush.msrb.mxu2 %v1404_v38  ;;  %v1097_v5 = vadd.f32 %v1096_v61, %v1077_v55  ;;  %v1440_v2 = vld [vmem:[#allocation8 + $0x3a8] sm:$0xff] }
 0x1c8   :  { %1546 = vmatpush.msrb.mxu0 %v1336_v30  ;;  %1528 = vmatpush.msra.mxu3 %v1427_v17  ;;  %v1430_v30 = vld [vmem:[#allocation8 + $0x358] sm:$0xff]  ;;  %v1424_v38 = vld [vmem:[#allocation8 + $0x328] sm:$0xff] }
 0x1c9   :  { %1566 = vmatpush.msrb.mxu1 %v1368_v36  ;;  %1585 = vmatpush.msrb.mxu2 %v1402_v43  ;;  %v1428_v36 = vld [vmem:[#allocation8 + $0x348] sm:$0xff]  ;;  %v1675_v17 = vld [vmem:[#allocation11 + $0xf0] sm:$0xff] }
 0x1ca   :  { %1547 = vmatpush.msrb.mxu0 %v1334_v40  ;;  %1529 = vmatpush.msra.mxu3 %v1425_v21  ;;  %v1420_v40 = vld [vmem:[#allocation8 + $0x308] sm:$0xff] }
 0x1cb   :  { %1567 = vmatpush.msrb.mxu1 %v1366_v41  ;;  %1586 = vmatpush.msrb.mxu2 %v1400_v48  ;;  %v674_v41 = vperm.slane %v2123_v1, 3  ;;  %v1674_v21 = vld [vmem:[#allocation11 + $0xe8] sm:$0xff] }
 0x1cc   :  { %1548 = vmatpush.msrb.mxu0 %v1332_v44  ;;  %1530 = vmatpush.msra.mxu3 %v1423_v31  ;;  %v1673_v31 = vld [vmem:[#allocation11 + $0xe0] sm:$0xff] }
 0x1cd   :  { %1568 = vmatpush.msrb.mxu1 %v1364_v24  ;;  %1587 = vmatpush.msrb.mxu2 %v1398_v50  ;;  %v1116_v6 = vpop.f32.mrf.mxu1 }
 0x1ce   :  { %1549 = vmatpush.msrb.mxu0 %v1330_v26  ;;  %v1117_v10 = vadd.f32 %v1116_v6, %v1097_v5  ;;  %v1136_v11 = vpop.f32.mrf.mxu2  ;;  %1531 = vmatpush.msra.mxu3 %v1421_v53  ;;  %v1656_v53 = vld [vmem:[#allocation11 + $0x58] sm:$0xff] }
 0x1cf   :  { %1569 = vmatpush.msrb.mxu1 %v1362_v8  ;;  %1588 = vmatpush.msrb.mxu2 %v1396_v56 }
 0x1d0   :  { %1550 = vmatpush.msrb.mxu0 %v1328_v32  ;;  %v1137_v14 = vadd.f32 %v1136_v11, %v1117_v10 }
 0x1d1   :  { %1570 = vmatpush.msrb.mxu1 %v1360_v45  ;;  %1589 = vmatpush.msrb.mxu2 %v1394_v62  ;;  %v1156_v15 = vpop.f32.mrf.mxu3 }
 0x1d2   :  { %1551 = vmatpush.msrb.mxu0 %v1326_v60  ;;  %v1157_v19 = vadd.f32 %v1156_v15, %v1137_v14  ;;  %v1454_v60 = vperm.slane %v1451_v54, 1  ;;  %v1660_v14 = vld [vmem:[#allocation11 + $0x78] sm:$0xff] }
 0x1d3   :  { %1571 = vmatpush.msrb.mxu1 %v1358_v52  ;;  %1590 = vmatpush.msrb.mxu2 %v1392_v7  ;;  %v1676_v15 = vld [vmem:[#allocation11 + $0xf8] sm:$0xff] }
 0x1d4   :  { %1552 = vmatpush.msrb.mxu0 %v1324_v3  ;;  %v1321_v22 = vmax.f32 %v1157_v19, 0.0  ;;  %v1658_v19 = vld [vmem:[#allocation11 + $0x68] sm:$0xff] }
 0x1d5   :  { %1572 = vmatpush.msrb.mxu1 %v1356_v4  ;;  %1553 = vmatmul.f32.vlgmr.msrb.gmra.mxu0 %v1319_v58  ;;  %v1419_v58 = vld [vmem:[#allocation8 + $0x300] sm:$0xff] }
 0x1d6   :  { %1573 = vmatmul.f32.vlgmr.msrb.gmra.mxu1 %v1320_v59  ;;  %1591 = vmatpush.msrb.mxu2 %v1390_v12  ;;  %v1450_v59 = vld [vmem:[#allocation8 + $0x3f8] sm:$0xff] }
 0x1d7   :  { %1513 = vmatmul.f32.vlgmr.msra.gmra.mxu2 %v1321_v22  ;;  %1532 = vmatpush.msra.mxu3 %v1419_v58  ;;  %v1672_v58 = vld [vmem:[#allocation11 + $0xd8] sm:$0xff] }
 0x1d8   :  { %1592 = vmatpush.msrb.mxu2 %v1388_v16  ;;  %v1659_v16 = vld [vmem:[#allocation11 + $0x70] sm:$0xff]  ;;  %1681 = vmatpush.msra.mxu0 %v1660_v14 }
 0x1d9   :  { %1597 = vmatpush.msrb.mxu3 %v1450_v59  ;;  %1701 = vmatpush.msra.mxu1 %v1676_v15  ;;  %v1655_v59 = vld [vmem:[#allocation11 + $0x50] sm:$0xff] }
 0x1da   :  { %1682 = vmatpush.msra.mxu0 %v1659_v16 }
 0x1db   :  { %1598 = vmatpush.msrb.mxu3 %v1448_v18  ;;  %1702 = vmatpush.msra.mxu1 %v1675_v17  ;;  %v1671_v18 = vld [vmem:[#allocation11 + $0xd0] sm:$0xff] }
 0x1dc   :  { %1683 = vmatpush.msra.mxu0 %v1658_v19 }
 0x1dd   :  { %1599 = vmatpush.msrb.mxu3 %v1446_v23  ;;  %1703 = vmatpush.msra.mxu1 %v1674_v21 }
 0x1df   :  { %1593 = vmatmul.f32.vlgmr.msrb.gmra.mxu2 %v1321_v22  ;;  %1600 = vmatpush.msrb.mxu3 %v1444_v28  ;;  %v1657_v22 = vld [vmem:[#allocation11 + $0x60] sm:$0xff] }
 0x1e0   :  { %1684 = vmatpush.msra.mxu0 %v1657_v22  ;;  %1704 = vmatpush.msra.mxu1 %v1673_v31 }
 0x1e1   :  { %1601 = vmatpush.msrb.mxu3 %v1442_v29 }
 0x1e2   :  { %1685 = vmatpush.msra.mxu0 %v1656_v53  ;;  %1705 = vmatpush.msra.mxu1 %v1672_v58 }
 0x1e3   :  { %1602 = vmatpush.msrb.mxu3 %v1440_v2 }
 0x1e4   :  { %1686 = vmatpush.msra.mxu0 %v1655_v59  ;;  %1706 = vmatpush.msra.mxu1 %v1671_v18 }
 0x1e5   :  { %1603 = vmatpush.msrb.mxu3 %v1438_v33 }
 0x1e7   :  { %1604 = vmatpush.msrb.mxu3 %v1436_v0 }
 0x1e9   :  { %1605 = vmatpush.msrb.mxu3 %v1434_v34 }
 0x1eb   :  { %1606 = vmatpush.msrb.mxu3 %v1432_v35 }
 0x1ed   :  { %1607 = vmatpush.msrb.mxu3 %v1430_v30  ;;  %v1654_v30 = vld [vmem:[#allocation11 + $0x48] sm:$0xff] }
 0x1ee   :  { %1687 = vmatpush.msra.mxu0 %v1654_v30 }
 0x1ef   :  { %1608 = vmatpush.msrb.mxu3 %v1428_v36  ;;  %v1670_v36 = vld [vmem:[#allocation11 + $0xc8] sm:$0xff] }
 0x1f0   :  { %1707 = vmatpush.msra.mxu1 %v1670_v36 }
 0x1f1   :  { %1609 = vmatpush.msrb.mxu3 %v1426_v37  ;;  %v1653_v37 = vld [vmem:[#allocation11 + $0x40] sm:$0xff] }
 0x1f2   :  { %1688 = vmatpush.msra.mxu0 %v1653_v37 }
 0x1f3   :  { %1610 = vmatpush.msrb.mxu3 %v1424_v38  ;;  %v1669_v38 = vld [vmem:[#allocation11 + $0xc0] sm:$0xff] }
 0x1f4   :  { %1708 = vmatpush.msra.mxu1 %v1669_v38 }
 0x1f5   :  { %1611 = vmatpush.msrb.mxu3 %v1422_v39  ;;  %v1652_v39 = vld [vmem:[#allocation11 + $0x38] sm:$0xff] }
 0x1f6   :  { %1689 = vmatpush.msra.mxu0 %v1652_v39 }
 0x1f7   :  { %1612 = vmatpush.msrb.mxu3 %v1420_v40  ;;  %v1668_v40 = vld [vmem:[#allocation11 + $0xb8] sm:$0xff] }
 0x1f8   :  { %1709 = vmatpush.msra.mxu1 %v1668_v40 }
 0x203   :  { %v1176_v42 = vpop.f32.mrf.mxu0 }
 0x204   :  { %v1177_v43 = vadd.f32 %v1176_v42, %v674_v41  ;;  %v1196_v27 = vpop.f32.mrf.mxu1  ;;  %v1651_v41 = vld [vmem:[#allocation11 + $0x30] sm:$0xff] }
 0x205   :  { %v1667_v42 = vld [vmem:[#allocation11 + $0xb0] sm:$0xff]  ;;  %1690 = vmatpush.msra.mxu0 %v1651_v41 }
 0x206   :  { %v1197_v44 = vadd.f32 %v1196_v27, %v1177_v43  ;;  %1710 = vmatpush.msra.mxu1 %v1667_v42  ;;  %v1650_v43 = vld [vmem:[#allocation11 + $0x28] sm:$0xff] }
 0x207   :  { %v1216_v24 = vpop.f32.mrf.mxu2  ;;  %v1666_v27 = vld [vmem:[#allocation11 + $0xa8] sm:$0xff]  ;;  %1691 = vmatpush.msra.mxu0 %v1650_v43 }
 0x208   :  { %v1217_v20 = vadd.f32 %v1216_v24, %v1197_v44  ;;  %1711 = vmatpush.msra.mxu1 %v1666_v27  ;;  %v1649_v44 = vld [vmem:[#allocation11 + $0x20] sm:$0xff] }
 0x209   :  { %v1665_v24 = vld [vmem:[#allocation11 + $0xa0] sm:$0xff]  ;;  %1692 = vmatpush.msra.mxu0 %v1649_v44 }
 0x20a   :  { %1712 = vmatpush.msra.mxu1 %v1665_v24 }
 0x20f   :  { %v1236_v46 = vpop.f32.mrf.mxu3  ;;  %v1256_v48 = vpop.f32.mrf.mxu0 }
 0x210   :  { %v1237_v47 = vadd.f32 %v1236_v46, %v1217_v20  ;;  %v1276_v26 = vpop.f32.mrf.mxu1  ;;  %v1648_v20 = vld [vmem:[#allocation11 + $0x18] sm:$0xff] }
 0x211   :  { %v1664_v46 = vld [vmem:[#allocation11 + $0x98] sm:$0xff]  ;;  %1693 = vmatpush.msra.mxu0 %v1648_v20 }
 0x212   :  { %v1257_v25 = vadd.f32 %v1256_v48, %v1237_v47  ;;  %1713 = vmatpush.msra.mxu1 %v1664_v46  ;;  %v1647_v47 = vld [vmem:[#allocation11 + $0x10] sm:$0xff] }
 0x213   :  { %v1663_v48 = vld [vmem:[#allocation11 + $0x90] sm:$0xff]  ;;  %1694 = vmatpush.msra.mxu0 %v1647_v47 }
 0x214   :  { %v1277_v8 = vadd.f32 %v1276_v26, %v1257_v25  ;;  %1714 = vmatpush.msra.mxu1 %v1663_v48  ;;  %v1646_v25 = vld [vmem:[#allocation11 + $0x8] sm:$0xff] }
 0x215   :  { %v1662_v26 = vld [vmem:[#allocation11 + $0x88] sm:$0xff]  ;;  %1695 = vmatpush.msra.mxu0 %v1646_v25 }
 0x216   :  { %1715 = vmatpush.msra.mxu1 %v1662_v26 }
 0x217   :  { %v1296_v49 = vpop.f32.mrf.mxu2 }
 0x218   :  { %v1297_v50 = vadd.f32 %v1296_v49, %v1277_v8  ;;  %v1645_v8 = vld [vmem:[#allocation11] sm:$0xff] }
 0x219   :  { %v1661_v49 = vld [vmem:[#allocation11 + $0x80] sm:$0xff]  ;;  %1696 = vmatpush.msra.mxu0 %v1645_v8 }
 0x21a   :  { %1716 = vmatpush.msra.mxu1 %v1661_v49 }
 0x21c   :  { %v1316_v51 = vpop.f32.mrf.mxu3 }
 0x21d   :  { %v1317_v32 = vadd.f32 %v1316_v51, %v1297_v50 }
 0x21f   :  { %v1322_v45 = vmax.f32 %v1317_v32, 0.0 }
 0x221   :  { %1533 = vmatmul.f32.vlgmr.msra.gmra.mxu3 %v1322_v45 }
 0x229   :  { %1613 = vmatmul.f32.vlgmr.msrb.gmra.mxu3 %v1322_v45 }
 0x232   :  { %v1474_v1 = vpop.f32.mrf.mxu0 }
 0x233   :  { %v1494_v56 = vpop.f32.mrf.mxu1  ;;  %v1475_v62 = vadd.f32 %v1474_v1, %v1453_v57 }
 0x235   :  { %v1495_v5 = vadd.f32 %v1494_v56, %v1475_v62 }
 0x252   :  { %v1554_v52 = vpop.f32.mrf.mxu0 }
 0x253   :  { %v1555_v63 = vadd.f32 %v1554_v52, %v1454_v60  ;;  %v1574_v3 = vpop.f32.mrf.mxu1 }
 0x255   :  { %v1575_v6 = vadd.f32 %v1574_v3, %v1555_v63  ;;  %v1759_v63 = vld [vmem:[#allocation13] ss:$0 sm:$0xff] }
 0x25a   :  { %v1514_v55 = vpop.f32.mrf.mxu2 }
 0x25b   :  { %v1515_v7 = vadd.f32 %v1514_v55, %v1495_v5 }
 0x262   :  { %v1594_v4 = vpop.f32.mrf.mxu2 }
 0x263   :  { %v1595_v9 = vadd.f32 %v1594_v4, %v1575_v6 }
 0x2a4   :  { %v1534_v61 = vpop.f32.mrf.mxu3 }
 0x2a5   :  { %v1535_v11 = vadd.f32 %v1534_v61, %v1515_v7  ;;  %v1760_v7 = vld [vmem:[#allocation14] ss:$0 sm:$0xff] }
 0x2ac   :  { %v1614_v10 = vpop.f32.mrf.mxu3 }
 0x2ad   :  { %v1615_v12 = vadd.f32 %v1614_v10, %v1595_v9 }
 0x2af   :  { %v1617_v13 = vmax.f32 %v1535_v11, %v1615_v12 }
 0x2b1   :  { %1618 = vmax.xlane.f32.xlu0 %v1617_v13 }
 0x324   :  { %v1619_v23 = vpop.xlane.xlu0 %1618 }
 0x325   :  { %v1620_v28 = vsub.f32 %v1535_v11, %v1619_v23  ;;  %v1621_v29 = vsub.f32 %v1615_v12, %v1619_v23  ;;  %v1761_v11 = vld [vmem:[#allocation2] ss:$0 sm:$0xff] }
 0x327   :  { %v1622_v2 = vmul.f32 1.442695, %v1620_v28  ;;  %v1624_v33 = vmul.f32 1.442695, %v1621_v29 }
 0x329   :  { %1762 = vpow2.f32 %v1622_v2 }
 0x32a   :  { %1764 = vpow2.f32 %v1624_v33 }
 0x32f   :  { %v1763_v0 = vpop.eup %1762 }
 0x330   :  { %v1765_v34 = vpop.eup %1764 }
 0x331   :  { %v1626_v35 = vadd.f32 %v1765_v34, %v1763_v0 }
 0x333   :  { %1627 = vadd.xlane.f32.xlu0 %v1626_v35 }
 0x3a6   :  { %v1628_v50 = vpop.xlane.xlu0 %1627 }
 0x3a7   :  { %1766 = vrcp.f32 %v1628_v50  ;;  %v1640_v1 = vand.u32 2147483648, %v1628_v50  ;;  %v1638_v55 = vand.u32 2147483647, %v1628_v50  ;;  %vm1634_vm1 = vweird.f32 %v1628_v50 }
 0x3a9   :  { %v1641_v57 = vor.u32 1.1754944e-38, %v1640_v1  ;;  %vm1639_vm3 = vcmp.eq.f32.partialorder %v1638_v55, 8.507059e+37 }
 0x3ad   :  { %v1767_v51 = vpop.eup %1766 }
 0x3ae   :  { %v1630_v32 = vmul.f32 %v1767_v51, %v1628_v50  ;;  %vm1635_vm0 = vweird.f32 %v1767_v51 }
 0x3af   :  { %vm1636_vm2 = vmor %vm1634_vm1, %vm1635_vm0 }
 0x3b0   :  { %v1631_v45 = vsub.f32 1.0, %v1630_v32 }
 0x3b2   :  { %v1632_v54 = vmul.f32 %v1767_v51, %v1631_v45 }
 0x3b4   :  { %v1633_v56 = vadd.f32 %v1767_v51, %v1632_v54 }
 0x3b6   :  { %v1637_v60 = vsel %vm1636_vm2, %v1767_v51, %v1633_v56 }
 0x3b7   :  { %v1642_v52 = vsel %vm1639_vm3, %v1641_v57, %v1637_v60 }
 0x3b8   :  { %v1643_v61 = vmul.f32 %v1763_v0, %v1642_v52  ;;  %v1644_v62 = vmul.f32 %v1765_v34, %v1642_v52 }
 0x3ba   :  { %1697 = vmatmul.f32.vlgmr.msra.gmra.mxu0 %v1643_v61  ;;  %1717 = vmatmul.f32.vlgmr.msra.gmra.mxu1 %v1644_v62 }
 0x437   :  { %v1698_v3 = vpop.f32.mrf.mxu0  ;;  %v1718_v5 = vpop.f32.mrf.mxu1 }
 0x438   :  { %v1699_v4 = vadd.f32 %v1759_v63, %v1698_v3 }
 0x43a   :  { %v1719_v6 = vadd.f32 %v1718_v5, %v1699_v4 }
 0x43c   :  { %v1721_v9 = vmax.f32 %v1719_v6, 0.0 }
 0x43e   :  { %v1726_v10 = vmul.f32 %v1760_v7, %v1721_v9 }
 0x440   :  { %1727 = vadd.xlane.f32.xlu1 %v1726_v10 }
 0x4b3   :  { %v1728_v12 = vpop.xlane.xlu1 %1727 }
 0x4b4   :  { %v1733_v13 = vadd.f32 %v1761_v11, %v1728_v12 }
 0x4b6   :  { %1735 = vst.msk [vmem:[%s2171_s9] sm:$0xff] %vm1734_vm4, %v1733_v13 }
 0x4b7   :  { %1740 = vsyncpa [#allocation4], 1 }
 0x4b8   :  { %1741 = vsyncpa [#allocation6], 1 }
 0x4b9   :  { %1742 = vsyncpa [#allocation9], 1 }
 0x4ba   :  { %1743 = vsyncpa [#allocation12], 1 }
 0x4bb   :  { %1744 = vsyncpa [#allocation15], 1 }

// kernel: tpu_custom_call.1
= control target key start
LH: loop header
LB: loop body
LE: loop exit
PB: predicated region body
PF: predicated region fallthrough
CT: control target
= control target key end

     0   :  { %s2162_s0 = inlined_call_operand.hbm [shape: f32[8,1024], index: 0, kind: input, shape index: {}]   ;;  %s2163_s1 = inlined_call_operand.hbm [shape: f32[1024,512], index: 1, kind: input, shape index: {}]   ;;  %s2164_s2 = inlined_call_operand.hbm [shape: f32[1,512], index: 2, kind: input, shape index: {}]   ;;  %s2165_s3 = inlined_call_operand.hbm [shape: f32[512,256], index: 3, kind: input, shape index: {}]   ;;  %s2166_s4 = inlined_call_operand.hbm [shape: f32[1,256], index: 4, kind: input, shape index: {}]   ;;  %s2167_s5 = inlined_call_operand.hbm [shape: f32[256,128], index: 5, kind: input, shape index: {}]   ;;  %s2168_s6 = inlined_call_operand.hbm [shape: f32[1,128], index: 6, kind: input, shape index: {}]   ;;  %s2169_s7 = inlined_call_operand.hbm [shape: f32[1,128], index: 7, kind: input, shape index: {}]   ;;  %s2170_s8 = inlined_call_operand.<no memory space> [shape: f32[1,1], index: 8, kind: input, shape index: {}]   ;;  %s2171_s9 = inlined_call_operand.vmem [shape: f32[8,1], index: 9, kind: output, shape index: {}]  }
   0x1   :  { %v14_v0 = vstv %s2170_s8 }
   0x2   :  { %15 = vst [vmem:[#allocation2] sm:$0x1] %v14_v0 }
   0x3   :  { %16 = vsyncpa [#allocation4], 0 }
   0x4   :  { %17 = vsyncpa [#allocation6], 0 }
   0x5   :  { %18 = vsyncpa [#allocation9], 0 }
   0x6   :  { %19 = vsyncpa [#allocation12], 0  ;;  %s36_s13 = sshll.u32 %s2163_s1, 4  ;;  %s37_s13 = int_to_ptr.hbm [resolvable:$true] %s36_s13 }
   0x7   :  { %20 = vsyncpa [#allocation15], 0  ;;  %s1978_s14 = smov [#allocation5]   ;;  %s60_s18 = sshll.u32 %s2165_s3, 4  ;;  %s61_s18 = int_to_ptr.hbm [resolvable:$true] %s60_s18 }
   0x8   :  { %s38_s15 = sshll.u32 %s1978_s14, 4  ;;  %s1979_s19 = smov 512   ;;  %s39_s15 = int_to_ptr.vmem [resolvable:$true] %s38_s15 }
   0x9   :  { %s1980_s8 = smov 32   ;;  %s1981_s20 = smov [#allocation8]  }
   0xa   :  { %44 = dma.hbm_to_vmem [thread:$0]  %s37_s13, 65536, %s39_s15, [#allocation6], %s1979_s19, %s1979_s19, %s1980_s8  }
   0xb   :  { %s62_s21 = sshll.u32 %s1981_s20, 4  ;;  %s1982_s22 = smov 256   ;;  %s63_s21 = int_to_ptr.vmem [resolvable:$true] %s62_s21 }
   0xc   :  { %s1983_s23 = smov 16   ;;  %s84_s25 = sshll.u32 %s2167_s5, 4  ;;  %s85_s25 = int_to_ptr.hbm [resolvable:$true] %s84_s25 }
   0xd   :  { %68 = dma.hbm_to_vmem [thread:$0]  %s61_s18, 16384, %s63_s21, [#allocation9], %s1982_s22, %s1982_s22, %s1983_s23  }
   0xe   :  { %s1984_s26 = smov [#allocation11]   ;;  %s26_s29 = sshll.u32 %s2162_s0, 4  ;;  %s27_s29 = int_to_ptr.hbm [resolvable:$true] %s26_s29 }
   0xf   :  { %s86_s27 = sshll.u32 %s1984_s26, 4  ;;  %s1985_s30 = smov 128   ;;  %s87_s27 = int_to_ptr.vmem [resolvable:$true] %s86_s27 }
  0x10   :  { %s1986_s10 = smov 8   ;;  %s1987_s11 = smov [#allocation3]  }
  0x11   :  { %92 = dma.hbm_to_vmem [thread:$0]  %s85_s25, 4096, %s87_s27, [#allocation12], %s1985_s30, %s1985_s30, %s1986_s10  }
  0x12   :  { %s28_s12 = sshll.u32 %s1987_s11, 4  ;;  %s50_s15 = sshll.u32 %s2164_s2, 4  ;;  %s29_s12 = int_to_ptr.vmem [resolvable:$true] %s28_s12  ;;  %s51_s15 = int_to_ptr.hbm [resolvable:$true] %s50_s15 }
  0x13   :  { %31 = dma.hbm_to_vmem [thread:$0]  %s27_s29, 1024, %s29_s12, [#allocation4]  }
  0x14   :  { %s74_s17 = sshll.u32 %s2166_s4, 4  ;;  %s1988_s18 = smov [#allocation7]   ;;  %s75_s17 = int_to_ptr.hbm [resolvable:$true] %s74_s17 }
  0x15   :  { %s52_s19 = sshll.u32 %s1988_s18, 4  ;;  %s1989_s0 = smov [#allocation10]   ;;  %s53_s19 = int_to_ptr.vmem [resolvable:$true] %s52_s19 }
  0x16   :  { %55 = dma.hbm_to_vmem [thread:$0]  %s51_s15, 64, %s53_s19, [#allocation6]  }
  0x17   :  { %s76_s8 = sshll.u32 %s1989_s0, 4  ;;  %s98_s22 = sshll.u32 %s2168_s6, 4  ;;  %s77_s8 = int_to_ptr.vmem [resolvable:$true] %s76_s8  ;;  %s99_s22 = int_to_ptr.hbm [resolvable:$true] %s98_s22 }
  0x18   :  { %79 = dma.hbm_to_vmem [thread:$0]  %s75_s17, 32, %s77_s8, [#allocation9]  }
  0x19   :  { %s109_s1 = sshll.u32 %s2169_s7, 4  ;;  %s1990_s24 = smov [#allocation13]   ;;  %s110_s1 = int_to_ptr.hbm [resolvable:$true] %s109_s1 }
  0x1a   :  { %s100_s4 = sshll.u32 %s1990_s24, 4  ;;  %s1991_s25 = smov [#allocation14]   ;;  %s101_s4 = int_to_ptr.vmem [resolvable:$true] %s100_s4 }
  0x1b   :  { %103 = dma.hbm_to_vmem [thread:$0]  %s99_s22, 16, %s101_s4, [#allocation12]  }
  0x1c   :  { %s111_s26 = sshll.u32 %s1991_s25, 4  ;;  %s112_s26 = int_to_ptr.vmem [resolvable:$true] %s111_s26 }
  0x1d   :  { %114 = dma.hbm_to_vmem [thread:$0]  %s110_s1, 16, %s112_s26, [#allocation15]  }
  0x1e   :  { %1968 = dma.done.wait [#allocation4], 1024  }
  0x1f   :  { %1969 = vsyncadd [#allocation4], 4294966272 }
  0x20   :  { %1970 = dma.done.wait [#allocation6], 65600  }
  0x21   :  { %1971 = vsyncadd [#allocation6], 4294901696 }
  0x22   :  { %1972 = dma.done.wait [#allocation9], 16416  }
  0x23   :  { %1973 = vsyncadd [#allocation9], 4294950880 }
  0x24   :  { %1974 = dma.done.wait [#allocation12], 4112  }
  0x25   :  { %1975 = vsyncadd [#allocation12], 4294963184 }
  0x26   :  { %1976 = dma.done.wait [#allocation15], 16  }
  0x27   :  { %1977 = vsyncadd [#allocation15], 4294967280  ;;  %v217_v1 = vld [vmem:[#allocation5 + $0x1e0] sm:$0xff]  ;;  %vm1734_vm4 = vcmask 7168  }
  0x28   :  { %v281_v2 = vld [vmem:[#allocation5 + $0x3e0] sm:$0xff]  ;;  %679 = vmatpush.msra.mxu0 %v217_v1 }
  0x29   :  { %v345_v3 = vld [vmem:[#allocation5 + $0x5e0] sm:$0xff]  ;;  %699 = vmatpush.msra.mxu1 %v281_v2 }
  0x2a   :  { %v213_v4 = vld [vmem:[#allocation5 + $0x1c0] sm:$0xff]  ;;  %719 = vmatpush.msra.mxu2 %v345_v3 }
  0x2b   :  { %v277_v5 = vld [vmem:[#allocation5 + $0x3c0] sm:$0xff]  ;;  %680 = vmatpush.msra.mxu0 %v213_v4 }
  0x2c   :  { %v341_v6 = vld [vmem:[#allocation5 + $0x5c0] sm:$0xff]  ;;  %700 = vmatpush.msra.mxu1 %v277_v5 }
  0x2d   :  { %v409_v7 = vld [vmem:[#allocation5 + $0x7e0] sm:$0xff]  ;;  %720 = vmatpush.msra.mxu2 %v341_v6 }
  0x2e   :  { %v209_v8 = vld [vmem:[#allocation5 + $0x1a0] sm:$0xff]  ;;  %739 = vmatpush.msra.mxu3 %v409_v7 }
  0x2f   :  { %v273_v9 = vld [vmem:[#allocation5 + $0x3a0] sm:$0xff]  ;;  %681 = vmatpush.msra.mxu0 %v209_v8 }
  0x30   :  { %v337_v10 = vld [vmem:[#allocation5 + $0x5a0] sm:$0xff]  ;;  %701 = vmatpush.msra.mxu1 %v273_v9 }
  0x31   :  { %v405_v11 = vld [vmem:[#allocation5 + $0x7c0] sm:$0xff]  ;;  %721 = vmatpush.msra.mxu2 %v337_v10 }
  0x32   :  { %v205_v12 = vld [vmem:[#allocation5 + $0x180] sm:$0xff]  ;;  %740 = vmatpush.msra.mxu3 %v405_v11 }
  0x33   :  { %v269_v13 = vld [vmem:[#allocation5 + $0x380] sm:$0xff]  ;;  %682 = vmatpush.msra.mxu0 %v205_v12 }
  0x34   :  { %v333_v14 = vld [vmem:[#allocation5 + $0x580] sm:$0xff]  ;;  %702 = vmatpush.msra.mxu1 %v269_v13 }
  0x35   :  { %v401_v15 = vld [vmem:[#allocation5 + $0x7a0] sm:$0xff]  ;;  %722 = vmatpush.msra.mxu2 %v333_v14 }
  0x36   :  { %v201_v16 = vld [vmem:[#allocation5 + $0x160] sm:$0xff]  ;;  %741 = vmatpush.msra.mxu3 %v401_v15 }
  0x37   :  { %v265_v17 = vld [vmem:[#allocation5 + $0x360] sm:$0xff]  ;;  %683 = vmatpush.msra.mxu0 %v201_v16 }
  0x38   :  { %v329_v18 = vld [vmem:[#allocation5 + $0x560] sm:$0xff]  ;;  %703 = vmatpush.msra.mxu1 %v265_v17 }
  0x39   :  { %v397_v19 = vld [vmem:[#allocation5 + $0x780] sm:$0xff]  ;;  %723 = vmatpush.msra.mxu2 %v329_v18 }
  0x3a   :  { %v197_v20 = vld [vmem:[#allocation5 + $0x140] sm:$0xff]  ;;  %742 = vmatpush.msra.mxu3 %v397_v19 }
  0x3b   :  { %v261_v21 = vld [vmem:[#allocation5 + $0x340] sm:$0xff]  ;;  %684 = vmatpush.msra.mxu0 %v197_v20 }
  0x3c   :  { %v325_v22 = vld [vmem:[#allocation5 + $0x540] sm:$0xff]  ;;  %704 = vmatpush.msra.mxu1 %v261_v21 }
  0x3d   :  { %v393_v23 = vld [vmem:[#allocation5 + $0x760] sm:$0xff]  ;;  %724 = vmatpush.msra.mxu2 %v325_v22 }
  0x3e   :  { %v193_v24 = vld [vmem:[#allocation5 + $0x120] sm:$0xff]  ;;  %743 = vmatpush.msra.mxu3 %v393_v23 }
  0x3f   :  { %v257_v25 = vld [vmem:[#allocation5 + $0x320] sm:$0xff]  ;;  %685 = vmatpush.msra.mxu0 %v193_v24 }
  0x40   :  { %v321_v26 = vld [vmem:[#allocation5 + $0x520] sm:$0xff]  ;;  %705 = vmatpush.msra.mxu1 %v257_v25 }
  0x41   :  { %v389_v27 = vld [vmem:[#allocation5 + $0x740] sm:$0xff]  ;;  %725 = vmatpush.msra.mxu2 %v321_v26 }
  0x42   :  { %v189_v28 = vld [vmem:[#allocation5 + $0x100] sm:$0xff]  ;;  %744 = vmatpush.msra.mxu3 %v389_v27 }
  0x43   :  { %v253_v29 = vld [vmem:[#allocation5 + $0x300] sm:$0xff]  ;;  %686 = vmatpush.msra.mxu0 %v189_v28 }
  0x44   :  { %v317_v30 = vld [vmem:[#allocation5 + $0x500] sm:$0xff]  ;;  %706 = vmatpush.msra.mxu1 %v253_v29 }
  0x45   :  { %v385_v31 = vld [vmem:[#allocation5 + $0x720] sm:$0xff]  ;;  %726 = vmatpush.msra.mxu2 %v317_v30 }
  0x46   :  { %v185_v32 = vld [vmem:[#allocation5 + $0xe0] sm:$0xff]  ;;  %745 = vmatpush.msra.mxu3 %v385_v31 }
  0x47   :  { %v249_v33 = vld [vmem:[#allocation5 + $0x2e0] sm:$0xff]  ;;  %687 = vmatpush.msra.mxu0 %v185_v32 }
  0x48   :  { %v313_v34 = vld [vmem:[#allocation5 + $0x4e0] sm:$0xff]  ;;  %707 = vmatpush.msra.mxu1 %v249_v33 }
  0x49   :  { %v381_v35 = vld [vmem:[#allocation5 + $0x700] sm:$0xff]  ;;  %727 = vmatpush.msra.mxu2 %v313_v34 }
  0x4a   :  { %v181_v36 = vld [vmem:[#allocation5 + $0xc0] sm:$0xff]  ;;  %746 = vmatpush.msra.mxu3 %v381_v35 }
  0x4b   :  { %v245_v37 = vld [vmem:[#allocation5 + $0x2c0] sm:$0xff]  ;;  %688 = vmatpush.msra.mxu0 %v181_v36 }
  0x4c   :  { %v309_v38 = vld [vmem:[#allocation5 + $0x4c0] sm:$0xff]  ;;  %708 = vmatpush.msra.mxu1 %v245_v37 }
  0x4d   :  { %v377_v39 = vld [vmem:[#allocation5 + $0x6e0] sm:$0xff]  ;;  %728 = vmatpush.msra.mxu2 %v309_v38 }
  0x4e   :  { %v177_v40 = vld [vmem:[#allocation5 + $0xa0] sm:$0xff]  ;;  %747 = vmatpush.msra.mxu3 %v377_v39 }
  0x4f   :  { %v241_v41 = vld [vmem:[#allocation5 + $0x2a0] sm:$0xff]  ;;  %689 = vmatpush.msra.mxu0 %v177_v40 }
  0x50   :  { %v305_v42 = vld [vmem:[#allocation5 + $0x4a0] sm:$0xff]  ;;  %709 = vmatpush.msra.mxu1 %v241_v41 }
  0x51   :  { %v373_v43 = vld [vmem:[#allocation5 + $0x6c0] sm:$0xff]  ;;  %729 = vmatpush.msra.mxu2 %v305_v42 }
  0x52   :  { %v173_v44 = vld [vmem:[#allocation5 + $0x80] sm:$0xff]  ;;  %748 = vmatpush.msra.mxu3 %v373_v43 }
  0x53   :  { %v237_v45 = vld [vmem:[#allocation5 + $0x280] sm:$0xff]  ;;  %690 = vmatpush.msra.mxu0 %v173_v44 }
  0x54   :  { %v301_v46 = vld [vmem:[#allocation5 + $0x480] sm:$0xff]  ;;  %710 = vmatpush.msra.mxu1 %v237_v45 }
  0x55   :  { %v369_v47 = vld [vmem:[#allocation5 + $0x6a0] sm:$0xff]  ;;  %730 = vmatpush.msra.mxu2 %v301_v46 }
  0x56   :  { %v169_v48 = vld [vmem:[#allocation5 + $0x60] sm:$0xff]  ;;  %749 = vmatpush.msra.mxu3 %v369_v47 }
  0x57   :  { %v233_v49 = vld [vmem:[#allocation5 + $0x260] sm:$0xff]  ;;  %691 = vmatpush.msra.mxu0 %v169_v48 }
  0x58   :  { %v297_v50 = vld [vmem:[#allocation5 + $0x460] sm:$0xff]  ;;  %711 = vmatpush.msra.mxu1 %v233_v49 }
  0x59   :  { %v365_v51 = vld [vmem:[#allocation5 + $0x680] sm:$0xff]  ;;  %731 = vmatpush.msra.mxu2 %v297_v50 }
  0x5a   :  { %v165_v52 = vld [vmem:[#allocation5 + $0x40] sm:$0xff]  ;;  %750 = vmatpush.msra.mxu3 %v365_v51 }
  0x5b   :  { %v229_v53 = vld [vmem:[#allocation5 + $0x240] sm:$0xff]  ;;  %692 = vmatpush.msra.mxu0 %v165_v52 }
  0x5c   :  { %v293_v54 = vld [vmem:[#allocation5 + $0x440] sm:$0xff]  ;;  %712 = vmatpush.msra.mxu1 %v229_v53 }
  0x5d   :  { %v361_v55 = vld [vmem:[#allocation5 + $0x660] sm:$0xff]  ;;  %732 = vmatpush.msra.mxu2 %v293_v54 }
  0x5e   :  { %v161_v56 = vld [vmem:[#allocation5 + $0x20] sm:$0xff]  ;;  %751 = vmatpush.msra.mxu3 %v361_v55 }
  0x5f   :  { %v225_v57 = vld [vmem:[#allocation5 + $0x220] sm:$0xff]  ;;  %693 = vmatpush.msra.mxu0 %v161_v56 }
  0x60   :  { %v289_v58 = vld [vmem:[#allocation5 + $0x420] sm:$0xff]  ;;  %713 = vmatpush.msra.mxu1 %v225_v57 }
  0x61   :  { %v357_v59 = vld [vmem:[#allocation5 + $0x640] sm:$0xff]  ;;  %733 = vmatpush.msra.mxu2 %v289_v58 }
  0x62   :  { %v157_v60 = vld [vmem:[#allocation5] sm:$0xff]  ;;  %752 = vmatpush.msra.mxu3 %v357_v59 }
  0x63   :  { %v221_v61 = vld [vmem:[#allocation5 + $0x200] sm:$0xff]  ;;  %694 = vmatpush.msra.mxu0 %v157_v60 }
  0x64   :  { %v285_v62 = vld [vmem:[#allocation5 + $0x400] sm:$0xff]  ;;  %714 = vmatpush.msra.mxu1 %v221_v61 }
  0x65   :  { %v353_v63 = vld [vmem:[#allocation5 + $0x620] sm:$0xff]  ;;  %734 = vmatpush.msra.mxu2 %v285_v62 }
  0x66   :  { %v473_v0 = vld [vmem:[#allocation5 + $0x9e0] sm:$0xff]  ;;  %753 = vmatpush.msra.mxu3 %v353_v63 }
  0x67   :  { %v537_v1 = vld [vmem:[#allocation5 + $0xbe0] sm:$0xff]  ;;  %759 = vmatpush.msrb.mxu0 %v473_v0 }
  0x68   :  { %v601_v2 = vld [vmem:[#allocation5 + $0xde0] sm:$0xff]  ;;  %779 = vmatpush.msrb.mxu1 %v537_v1  ;;  %v2071_v1 = vld [vmem:[#allocation3 + $0x8] sm:$0xff] }
  0x69   :  { %v349_v3 = vld [vmem:[#allocation5 + $0x600] sm:$0xff]  ;;  %799 = vmatpush.msrb.mxu2 %v601_v2  ;;  %v2073_v2 = vld [vmem:[#allocation3 + $0x10] sm:$0xff]  ;;  %715 = vmatmul.f32.vlgmr.msra.gmra.mxu1 %v2071_v1 }
  0x6a   :  { %v469_v4 = vld [vmem:[#allocation5 + $0x9c0] sm:$0xff]  ;;  %754 = vmatpush.msra.mxu3 %v349_v3  ;;  %v218_v3 = vld [vmem:[#allocation5 + $0x1e8] sm:$0xff]  ;;  %735 = vmatmul.f32.vlgmr.msra.gmra.mxu2 %v2073_v2 }
  0x6b   :  { %v533_v5 = vld [vmem:[#allocation5 + $0xbc0] sm:$0xff]  ;;  %760 = vmatpush.msrb.mxu0 %v469_v4  ;;  %v282_v4 = vld [vmem:[#allocation5 + $0x3e8] sm:$0xff] }
  0x6c   :  { %v597_v6 = vld [vmem:[#allocation5 + $0xdc0] sm:$0xff]  ;;  %780 = vmatpush.msrb.mxu1 %v533_v5  ;;  %v346_v5 = vld [vmem:[#allocation5 + $0x5e8] sm:$0xff] }
  0x6d   :  { %v665_v7 = vld [vmem:[#allocation5 + $0xfe0] sm:$0xff]  ;;  %800 = vmatpush.msrb.mxu2 %v597_v6 }
  0x6e   :  { %v465_v8 = vld [vmem:[#allocation5 + $0x9a0] sm:$0xff]  ;;  %819 = vmatpush.msrb.mxu3 %v665_v7  ;;  %v214_v7 = vld [vmem:[#allocation5 + $0x1c8] sm:$0xff] }
  0x6f   :  { %v529_v9 = vld [vmem:[#allocation5 + $0xba0] sm:$0xff]  ;;  %761 = vmatpush.msrb.mxu0 %v465_v8  ;;  %v2078_v8 = vld [vmem:[#allocation3 + $0x18] sm:$0xff] }
  0x70   :  { %v593_v10 = vld [vmem:[#allocation5 + $0xda0] sm:$0xff]  ;;  %781 = vmatpush.msrb.mxu1 %v529_v9  ;;  %v278_v9 = vld [vmem:[#allocation5 + $0x3c8] sm:$0xff]  ;;  %755 = vmatmul.f32.vlgmr.msra.gmra.mxu3 %v2078_v8 }
  0x71   :  { %v661_v11 = vld [vmem:[#allocation5 + $0xfc0] sm:$0xff]  ;;  %801 = vmatpush.msrb.mxu2 %v593_v10  ;;  %v342_v10 = vld [vmem:[#allocation5 + $0x5c8] sm:$0xff] }
  0x72   :  { %v461_v12 = vld [vmem:[#allocation5 + $0x980] sm:$0xff]  ;;  %820 = vmatpush.msrb.mxu3 %v661_v11  ;;  %v410_v11 = vld [vmem:[#allocation5 + $0x7e8] sm:$0xff] }
  0x73   :  { %v525_v13 = vld [vmem:[#allocation5 + $0xb80] sm:$0xff]  ;;  %762 = vmatpush.msrb.mxu0 %v461_v12  ;;  %v210_v12 = vld [vmem:[#allocation5 + $0x1a8] sm:$0xff] }
  0x74   :  { %v589_v14 = vld [vmem:[#allocation5 + $0xd80] sm:$0xff]  ;;  %782 = vmatpush.msrb.mxu1 %v525_v13  ;;  %v274_v13 = vld [vmem:[#allocation5 + $0x3a8] sm:$0xff] }
  0x75   :  { %v657_v15 = vld [vmem:[#allocation5 + $0xfa0] sm:$0xff]  ;;  %802 = vmatpush.msrb.mxu2 %v589_v14  ;;  %v338_v14 = vld [vmem:[#allocation5 + $0x5a8] sm:$0xff] }
  0x76   :  { %v457_v16 = vld [vmem:[#allocation5 + $0x960] sm:$0xff]  ;;  %821 = vmatpush.msrb.mxu3 %v657_v15  ;;  %v406_v15 = vld [vmem:[#allocation5 + $0x7c8] sm:$0xff] }
  0x77   :  { %v521_v17 = vld [vmem:[#allocation5 + $0xb60] sm:$0xff]  ;;  %763 = vmatpush.msrb.mxu0 %v457_v16  ;;  %v206_v16 = vld [vmem:[#allocation5 + $0x188] sm:$0xff] }
  0x78   :  { %v585_v18 = vld [vmem:[#allocation5 + $0xd60] sm:$0xff]  ;;  %783 = vmatpush.msrb.mxu1 %v521_v17  ;;  %v270_v17 = vld [vmem:[#allocation5 + $0x388] sm:$0xff] }
  0x79   :  { %v653_v19 = vld [vmem:[#allocation5 + $0xf80] sm:$0xff]  ;;  %803 = vmatpush.msrb.mxu2 %v585_v18  ;;  %v334_v18 = vld [vmem:[#allocation5 + $0x588] sm:$0xff] }
  0x7a   :  { %v453_v20 = vld [vmem:[#allocation5 + $0x940] sm:$0xff]  ;;  %822 = vmatpush.msrb.mxu3 %v653_v19  ;;  %v402_v19 = vld [vmem:[#allocation5 + $0x7a8] sm:$0xff] }
  0x7b   :  { %v517_v21 = vld [vmem:[#allocation5 + $0xb40] sm:$0xff]  ;;  %764 = vmatpush.msrb.mxu0 %v453_v20  ;;  %v2081_v20 = vld [vmem:[#allocation3 + $0x30] sm:$0xff] }
  0x7c   :  { %v581_v22 = vld [vmem:[#allocation5 + $0xd40] sm:$0xff]  ;;  %784 = vmatpush.msrb.mxu1 %v517_v21  ;;  %v202_v21 = vld [vmem:[#allocation5 + $0x168] sm:$0xff] }
  0x7d   :  { %v649_v23 = vld [vmem:[#allocation5 + $0xf60] sm:$0xff]  ;;  %804 = vmatpush.msrb.mxu2 %v581_v22  ;;  %v266_v22 = vld [vmem:[#allocation5 + $0x368] sm:$0xff] }
  0x7e   :  { %v449_v24 = vld [vmem:[#allocation5 + $0x920] sm:$0xff]  ;;  %823 = vmatpush.msrb.mxu3 %v649_v23  ;;  %v330_v23 = vld [vmem:[#allocation5 + $0x568] sm:$0xff] }
  0x7f   :  { %v513_v25 = vld [vmem:[#allocation5 + $0xb20] sm:$0xff]  ;;  %765 = vmatpush.msrb.mxu0 %v449_v24  ;;  %v398_v24 = vld [vmem:[#allocation5 + $0x788] sm:$0xff] }
  0x80   :  { %v577_v26 = vld [vmem:[#allocation5 + $0xd20] sm:$0xff]  ;;  %785 = vmatpush.msrb.mxu1 %v513_v25 }
  0x81   :  { %v645_v27 = vld [vmem:[#allocation5 + $0xf40] sm:$0xff]  ;;  %805 = vmatpush.msrb.mxu2 %v577_v26  ;;  %v2086_v26 = vld [vmem:[#allocation3 + $0x38] sm:$0xff] }
  0x82   :  { %v445_v28 = vld [vmem:[#allocation5 + $0x900] sm:$0xff]  ;;  %824 = vmatpush.msrb.mxu3 %v645_v27  ;;  %v198_v27 = vld [vmem:[#allocation5 + $0x148] sm:$0xff] }
  0x83   :  { %v509_v29 = vld [vmem:[#allocation5 + $0xb00] sm:$0xff]  ;;  %766 = vmatpush.msrb.mxu0 %v445_v28  ;;  %v262_v28 = vld [vmem:[#allocation5 + $0x348] sm:$0xff] }
  0x84   :  { %v573_v30 = vld [vmem:[#allocation5 + $0xd00] sm:$0xff]  ;;  %786 = vmatpush.msrb.mxu1 %v509_v29  ;;  %v326_v29 = vld [vmem:[#allocation5 + $0x548] sm:$0xff] }
  0x85   :  { %v641_v31 = vld [vmem:[#allocation5 + $0xf20] sm:$0xff]  ;;  %806 = vmatpush.msrb.mxu2 %v573_v30  ;;  %v394_v30 = vld [vmem:[#allocation5 + $0x768] sm:$0xff] }
  0x86   :  { %v441_v32 = vld [vmem:[#allocation5 + $0x8e0] sm:$0xff]  ;;  %825 = vmatpush.msrb.mxu3 %v641_v31  ;;  %v2089_v31 = vld [vmem:[#allocation3 + $0x28] sm:$0xff] }
  0x87   :  { %v505_v33 = vld [vmem:[#allocation5 + $0xae0] sm:$0xff]  ;;  %767 = vmatpush.msrb.mxu0 %v441_v32  ;;  %v194_v32 = vld [vmem:[#allocation5 + $0x128] sm:$0xff] }
  0x88   :  { %v569_v34 = vld [vmem:[#allocation5 + $0xce0] sm:$0xff]  ;;  %787 = vmatpush.msrb.mxu1 %v505_v33  ;;  %v258_v33 = vld [vmem:[#allocation5 + $0x328] sm:$0xff] }
  0x89   :  { %v637_v35 = vld [vmem:[#allocation5 + $0xf00] sm:$0xff]  ;;  %807 = vmatpush.msrb.mxu2 %v569_v34  ;;  %v322_v34 = vld [vmem:[#allocation5 + $0x528] sm:$0xff] }
  0x8a   :  { %v437_v36 = vld [vmem:[#allocation5 + $0x8c0] sm:$0xff]  ;;  %826 = vmatpush.msrb.mxu3 %v637_v35  ;;  %v390_v35 = vld [vmem:[#allocation5 + $0x748] sm:$0xff] }
  0x8b   :  { %v501_v37 = vld [vmem:[#allocation5 + $0xac0] sm:$0xff]  ;;  %768 = vmatpush.msrb.mxu0 %v437_v36  ;;  %v190_v36 = vld [vmem:[#allocation5 + $0x108] sm:$0xff] }
  0x8c   :  { %v565_v38 = vld [vmem:[#allocation5 + $0xcc0] sm:$0xff]  ;;  %788 = vmatpush.msrb.mxu1 %v501_v37  ;;  %v254_v37 = vld [vmem:[#allocation5 + $0x308] sm:$0xff] }
  0x8d   :  { %v633_v39 = vld [vmem:[#allocation5 + $0xee0] sm:$0xff]  ;;  %808 = vmatpush.msrb.mxu2 %v565_v38  ;;  %v318_v38 = vld [vmem:[#allocation5 + $0x508] sm:$0xff] }
  0x8e   :  { %v433_v40 = vld [vmem:[#allocation5 + $0x8a0] sm:$0xff]  ;;  %827 = vmatpush.msrb.mxu3 %v633_v39  ;;  %v386_v39 = vld [vmem:[#allocation5 + $0x728] sm:$0xff] }
  0x8f   :  { %v497_v41 = vld [vmem:[#allocation5 + $0xaa0] sm:$0xff]  ;;  %769 = vmatpush.msrb.mxu0 %v433_v40  ;;  %v186_v40 = vld [vmem:[#allocation5 + $0xe8] sm:$0xff] }
  0x90   :  { %v561_v42 = vld [vmem:[#allocation5 + $0xca0] sm:$0xff]  ;;  %789 = vmatpush.msrb.mxu1 %v497_v41  ;;  %v250_v41 = vld [vmem:[#allocation5 + $0x2e8] sm:$0xff] }
  0x91   :  { %v629_v43 = vld [vmem:[#allocation5 + $0xec0] sm:$0xff]  ;;  %809 = vmatpush.msrb.mxu2 %v561_v42  ;;  %v314_v42 = vld [vmem:[#allocation5 + $0x4e8] sm:$0xff] }
  0x92   :  { %v429_v44 = vld [vmem:[#allocation5 + $0x880] sm:$0xff]  ;;  %828 = vmatpush.msrb.mxu3 %v629_v43  ;;  %v382_v43 = vld [vmem:[#allocation5 + $0x708] sm:$0xff] }
  0x93   :  { %v493_v45 = vld [vmem:[#allocation5 + $0xa80] sm:$0xff]  ;;  %770 = vmatpush.msrb.mxu0 %v429_v44  ;;  %v182_v44 = vld [vmem:[#allocation5 + $0xc8] sm:$0xff] }
  0x94   :  { %v557_v46 = vld [vmem:[#allocation5 + $0xc80] sm:$0xff]  ;;  %790 = vmatpush.msrb.mxu1 %v493_v45  ;;  %v246_v45 = vld [vmem:[#allocation5 + $0x2c8] sm:$0xff] }
  0x95   :  { %v625_v47 = vld [vmem:[#allocation5 + $0xea0] sm:$0xff]  ;;  %810 = vmatpush.msrb.mxu2 %v557_v46  ;;  %v310_v46 = vld [vmem:[#allocation5 + $0x4c8] sm:$0xff] }
  0x96   :  { %v425_v48 = vld [vmem:[#allocation5 + $0x860] sm:$0xff]  ;;  %829 = vmatpush.msrb.mxu3 %v625_v47  ;;  %v378_v47 = vld [vmem:[#allocation5 + $0x6e8] sm:$0xff] }
  0x97   :  { %v489_v49 = vld [vmem:[#allocation5 + $0xa60] sm:$0xff]  ;;  %771 = vmatpush.msrb.mxu0 %v425_v48  ;;  %v178_v48 = vld [vmem:[#allocation5 + $0xa8] sm:$0xff] }
  0x98   :  { %v553_v50 = vld [vmem:[#allocation5 + $0xc60] sm:$0xff]  ;;  %791 = vmatpush.msrb.mxu1 %v489_v49  ;;  %v242_v49 = vld [vmem:[#allocation5 + $0x2a8] sm:$0xff] }
  0x99   :  { %v621_v51 = vld [vmem:[#allocation5 + $0xe80] sm:$0xff]  ;;  %811 = vmatpush.msrb.mxu2 %v553_v50  ;;  %v306_v50 = vld [vmem:[#allocation5 + $0x4a8] sm:$0xff] }
  0x9a   :  { %v421_v52 = vld [vmem:[#allocation5 + $0x840] sm:$0xff]  ;;  %830 = vmatpush.msrb.mxu3 %v621_v51  ;;  %v374_v51 = vld [vmem:[#allocation5 + $0x6c8] sm:$0xff] }
  0x9b   :  { %v485_v53 = vld [vmem:[#allocation5 + $0xa40] sm:$0xff]  ;;  %772 = vmatpush.msrb.mxu0 %v421_v52  ;;  %v174_v52 = vld [vmem:[#allocation5 + $0x88] sm:$0xff] }
  0x9c   :  { %v549_v54 = vld [vmem:[#allocation5 + $0xc40] sm:$0xff]  ;;  %792 = vmatpush.msrb.mxu1 %v485_v53  ;;  %v238_v53 = vld [vmem:[#allocation5 + $0x288] sm:$0xff] }
  0x9d   :  { %v617_v55 = vld [vmem:[#allocation5 + $0xe60] sm:$0xff]  ;;  %812 = vmatpush.msrb.mxu2 %v549_v54  ;;  %v302_v54 = vld [vmem:[#allocation5 + $0x488] sm:$0xff] }
  0x9e   :  { %v417_v56 = vld [vmem:[#allocation5 + $0x820] sm:$0xff]  ;;  %831 = vmatpush.msrb.mxu3 %v617_v55  ;;  %v370_v55 = vld [vmem:[#allocation5 + $0x6a8] sm:$0xff] }
  0x9f   :  { %v481_v57 = vld [vmem:[#allocation5 + $0xa20] sm:$0xff]  ;;  %773 = vmatpush.msrb.mxu0 %v417_v56  ;;  %v170_v56 = vld [vmem:[#allocation5 + $0x68] sm:$0xff] }
  0xa0   :  { %v545_v58 = vld [vmem:[#allocation5 + $0xc20] sm:$0xff]  ;;  %793 = vmatpush.msrb.mxu1 %v481_v57  ;;  %v234_v57 = vld [vmem:[#allocation5 + $0x268] sm:$0xff] }
  0xa1   :  { %v613_v59 = vld [vmem:[#allocation5 + $0xe40] sm:$0xff]  ;;  %813 = vmatpush.msrb.mxu2 %v545_v58  ;;  %v298_v58 = vld [vmem:[#allocation5 + $0x468] sm:$0xff] }
  0xa2   :  { %v413_v60 = vld [vmem:[#allocation5 + $0x800] sm:$0xff]  ;;  %832 = vmatpush.msrb.mxu3 %v613_v59  ;;  %v366_v59 = vld [vmem:[#allocation5 + $0x688] sm:$0xff] }
  0xa3   :  { %v477_v61 = vld [vmem:[#allocation5 + $0xa00] sm:$0xff]  ;;  %774 = vmatpush.msrb.mxu0 %v413_v60  ;;  %v166_v60 = vld [vmem:[#allocation5 + $0x48] sm:$0xff] }
  0xa4   :  { %v541_v62 = vld [vmem:[#allocation5 + $0xc00] sm:$0xff]  ;;  %794 = vmatpush.msrb.mxu1 %v477_v61  ;;  %v230_v61 = vld [vmem:[#allocation5 + $0x248] sm:$0xff] }
  0xa5   :  { %v609_v63 = vld [vmem:[#allocation5 + $0xe20] sm:$0xff]  ;;  %814 = vmatpush.msrb.mxu2 %v541_v62  ;;  %795 = vmatmul.f32.vlgmr.msrb.gmra.mxu1 %v2089_v31  ;;  %v294_v62 = vld [vmem:[#allocation5 + $0x448] sm:$0xff] }
  0xa6   :  { %v2069_v0 = vld [vmem:[#allocation3] sm:$0xff]  ;;  %833 = vmatpush.msrb.mxu3 %v609_v63  ;;  %859 = vmatpush.msra.mxu1 %v282_v4  ;;  %v362_v63 = vld [vmem:[#allocation5 + $0x668] sm:$0xff] }
  0xa7   :  { %695 = vmatmul.f32.vlgmr.msra.gmra.mxu0 %v2069_v0  ;;  %v605_v6 = vld [vmem:[#allocation5 + $0xe00] sm:$0xff]  ;;  %879 = vmatpush.msra.mxu2 %v346_v5  ;;  %v226_v4 = vld [vmem:[#allocation5 + $0x228] sm:$0xff] }
  0xa8   :  { %839 = vmatpush.msra.mxu0 %v218_v3  ;;  %834 = vmatpush.msrb.mxu3 %v605_v6  ;;  %v2083_v25 = vld [vmem:[#allocation3 + $0x20] sm:$0xff]  ;;  %v162_v3 = vld [vmem:[#allocation5 + $0x28] sm:$0xff] }
  0xa9   :  { %860 = vmatpush.msra.mxu1 %v278_v9  ;;  %880 = vmatpush.msra.mxu2 %v342_v10  ;;  %v290_v5 = vld [vmem:[#allocation5 + $0x428] sm:$0xff] }
  0xaa   :  { %840 = vmatpush.msra.mxu0 %v214_v7  ;;  %899 = vmatpush.msra.mxu3 %v410_v11  ;;  %v358_v6 = vld [vmem:[#allocation5 + $0x648] sm:$0xff] }
  0xab   :  { %861 = vmatpush.msra.mxu1 %v274_v13  ;;  %881 = vmatpush.msra.mxu2 %v338_v14  ;;  %v158_v7 = vld [vmem:[#allocation5 + $0x8] sm:$0xff] }
  0xac   :  { %841 = vmatpush.msra.mxu0 %v210_v12  ;;  %900 = vmatpush.msra.mxu3 %v406_v15  ;;  %v222_v9 = vld [vmem:[#allocation5 + $0x208] sm:$0xff] }
  0xad   :  { %862 = vmatpush.msra.mxu1 %v270_v17  ;;  %882 = vmatpush.msra.mxu2 %v334_v18  ;;  %v286_v10 = vld [vmem:[#allocation5 + $0x408] sm:$0xff] }
  0xae   :  { %842 = vmatpush.msra.mxu0 %v206_v16  ;;  %901 = vmatpush.msra.mxu3 %v402_v19  ;;  %v354_v11 = vld [vmem:[#allocation5 + $0x628] sm:$0xff] }
  0xaf   :  { %815 = vmatmul.f32.vlgmr.msrb.gmra.mxu2 %v2081_v20  ;;  %863 = vmatpush.msra.mxu1 %v266_v22  ;;  %v474_v12 = vld [vmem:[#allocation5 + $0x9e8] sm:$0xff] }
  0xb0   :  { %843 = vmatpush.msra.mxu0 %v202_v21  ;;  %883 = vmatpush.msra.mxu2 %v330_v23  ;;  %v538_v13 = vld [vmem:[#allocation5 + $0xbe8] sm:$0xff] }
  0xb1   :  { %902 = vmatpush.msra.mxu3 %v398_v24  ;;  %775 = vmatmul.f32.vlgmr.msrb.gmra.mxu0 %v2083_v25  ;;  %v602_v14 = vld [vmem:[#allocation5 + $0xde8] sm:$0xff] }
  0xb2   :  { %835 = vmatmul.f32.vlgmr.msrb.gmra.mxu3 %v2086_v26  ;;  %844 = vmatpush.msra.mxu0 %v198_v27  ;;  %v350_v15 = vld [vmem:[#allocation5 + $0x608] sm:$0xff] }
  0xb3   :  { %864 = vmatpush.msra.mxu1 %v262_v28  ;;  %884 = vmatpush.msra.mxu2 %v326_v29  ;;  %v470_v16 = vld [vmem:[#allocation5 + $0x9c8] sm:$0xff] }
  0xb4   :  { %903 = vmatpush.msra.mxu3 %v394_v30  ;;  %845 = vmatpush.msra.mxu0 %v194_v32  ;;  %v534_v17 = vld [vmem:[#allocation5 + $0xbc8] sm:$0xff] }
  0xb5   :  { %865 = vmatpush.msra.mxu1 %v258_v33  ;;  %885 = vmatpush.msra.mxu2 %v322_v34  ;;  %v598_v18 = vld [vmem:[#allocation5 + $0xdc8] sm:$0xff] }
  0xb6   :  { %904 = vmatpush.msra.mxu3 %v390_v35  ;;  %846 = vmatpush.msra.mxu0 %v190_v36  ;;  %v666_v19 = vld [vmem:[#allocation5 + $0xfe8] sm:$0xff] }
  0xb7   :  { %866 = vmatpush.msra.mxu1 %v254_v37  ;;  %886 = vmatpush.msra.mxu2 %v318_v38  ;;  %v466_v21 = vld [vmem:[#allocation5 + $0x9a8] sm:$0xff] }
  0xb8   :  { %905 = vmatpush.msra.mxu3 %v386_v39  ;;  %847 = vmatpush.msra.mxu0 %v186_v40  ;;  %v530_v22 = vld [vmem:[#allocation5 + $0xba8] sm:$0xff] }
  0xb9   :  { %867 = vmatpush.msra.mxu1 %v250_v41  ;;  %887 = vmatpush.msra.mxu2 %v314_v42  ;;  %v594_v23 = vld [vmem:[#allocation5 + $0xda8] sm:$0xff] }
  0xba   :  { %906 = vmatpush.msra.mxu3 %v382_v43  ;;  %848 = vmatpush.msra.mxu0 %v182_v44  ;;  %v662_v24 = vld [vmem:[#allocation5 + $0xfc8] sm:$0xff] }
  0xbb   :  { %868 = vmatpush.msra.mxu1 %v246_v45  ;;  %888 = vmatpush.msra.mxu2 %v310_v46  ;;  %v462_v27 = vld [vmem:[#allocation5 + $0x988] sm:$0xff] }
  0xbc   :  { %907 = vmatpush.msra.mxu3 %v378_v47  ;;  %849 = vmatpush.msra.mxu0 %v178_v48  ;;  %v526_v28 = vld [vmem:[#allocation5 + $0xb88] sm:$0xff] }
  0xbd   :  { %869 = vmatpush.msra.mxu1 %v242_v49  ;;  %889 = vmatpush.msra.mxu2 %v306_v50  ;;  %v590_v29 = vld [vmem:[#allocation5 + $0xd88] sm:$0xff] }
  0xbe   :  { %908 = vmatpush.msra.mxu3 %v374_v51  ;;  %850 = vmatpush.msra.mxu0 %v174_v52  ;;  %v658_v30 = vld [vmem:[#allocation5 + $0xfa8] sm:$0xff] }
  0xbf   :  { %870 = vmatpush.msra.mxu1 %v238_v53  ;;  %890 = vmatpush.msra.mxu2 %v302_v54  ;;  %v458_v32 = vld [vmem:[#allocation5 + $0x968] sm:$0xff] }
  0xc0   :  { %909 = vmatpush.msra.mxu3 %v370_v55  ;;  %851 = vmatpush.msra.mxu0 %v170_v56  ;;  %v522_v33 = vld [vmem:[#allocation5 + $0xb68] sm:$0xff] }
  0xc1   :  { %871 = vmatpush.msra.mxu1 %v234_v57  ;;  %891 = vmatpush.msra.mxu2 %v298_v58  ;;  %v586_v34 = vld [vmem:[#allocation5 + $0xd68] sm:$0xff] }
  0xc2   :  { %910 = vmatpush.msra.mxu3 %v366_v59  ;;  %852 = vmatpush.msra.mxu0 %v166_v60  ;;  %v654_v35 = vld [vmem:[#allocation5 + $0xf88] sm:$0xff] }
  0xc3   :  { %872 = vmatpush.msra.mxu1 %v230_v61  ;;  %892 = vmatpush.msra.mxu2 %v294_v62  ;;  %v454_v36 = vld [vmem:[#allocation5 + $0x948] sm:$0xff] }
  0xc4   :  { %911 = vmatpush.msra.mxu3 %v362_v63  ;;  %853 = vmatpush.msra.mxu0 %v162_v3  ;;  %v518_v37 = vld [vmem:[#allocation5 + $0xb48] sm:$0xff] }
  0xc5   :  { %873 = vmatpush.msra.mxu1 %v226_v4  ;;  %893 = vmatpush.msra.mxu2 %v290_v5  ;;  %v582_v38 = vld [vmem:[#allocation5 + $0xd48] sm:$0xff] }
  0xc6   :  { %912 = vmatpush.msra.mxu3 %v358_v6  ;;  %854 = vmatpush.msra.mxu0 %v158_v7  ;;  %v650_v39 = vld [vmem:[#allocation5 + $0xf68] sm:$0xff] }
  0xc7   :  { %874 = vmatpush.msra.mxu1 %v222_v9  ;;  %894 = vmatpush.msra.mxu2 %v286_v10  ;;  %v450_v40 = vld [vmem:[#allocation5 + $0x928] sm:$0xff] }
  0xc8   :  { %913 = vmatpush.msra.mxu3 %v354_v11  ;;  %919 = vmatpush.msrb.mxu0 %v474_v12  ;;  %v514_v41 = vld [vmem:[#allocation5 + $0xb28] sm:$0xff] }
  0xc9   :  { %939 = vmatpush.msrb.mxu1 %v538_v13  ;;  %959 = vmatpush.msrb.mxu2 %v602_v14  ;;  %v578_v42 = vld [vmem:[#allocation5 + $0xd28] sm:$0xff] }
  0xca   :  { %914 = vmatpush.msra.mxu3 %v350_v15  ;;  %920 = vmatpush.msrb.mxu0 %v470_v16  ;;  %v646_v43 = vld [vmem:[#allocation5 + $0xf48] sm:$0xff] }
  0xcb   :  { %940 = vmatpush.msrb.mxu1 %v534_v17  ;;  %960 = vmatpush.msrb.mxu2 %v598_v18  ;;  %v446_v44 = vld [vmem:[#allocation5 + $0x908] sm:$0xff] }
  0xcc   :  { %979 = vmatpush.msrb.mxu3 %v666_v19  ;;  %921 = vmatpush.msrb.mxu0 %v466_v21  ;;  %v510_v45 = vld [vmem:[#allocation5 + $0xb08] sm:$0xff]  ;;  %v219_v21 = vld [vmem:[#allocation5 + $0x1f0] sm:$0xff] }
  0xcd   :  { %941 = vmatpush.msrb.mxu1 %v530_v22  ;;  %961 = vmatpush.msrb.mxu2 %v594_v23  ;;  %v574_v46 = vld [vmem:[#allocation5 + $0xd08] sm:$0xff]  ;;  %v283_v22 = vld [vmem:[#allocation5 + $0x3f0] sm:$0xff] }
  0xce   :  { %980 = vmatpush.msrb.mxu3 %v662_v24  ;;  %922 = vmatpush.msrb.mxu0 %v462_v27  ;;  %v642_v47 = vld [vmem:[#allocation5 + $0xf28] sm:$0xff]  ;;  %v347_v23 = vld [vmem:[#allocation5 + $0x5f0] sm:$0xff] }
  0xcf   :  { %942 = vmatpush.msrb.mxu1 %v526_v28  ;;  %962 = vmatpush.msrb.mxu2 %v590_v29  ;;  %v442_v48 = vld [vmem:[#allocation5 + $0x8e8] sm:$0xff]  ;;  %v215_v27 = vld [vmem:[#allocation5 + $0x1d0] sm:$0xff] }
  0xd0   :  { %981 = vmatpush.msrb.mxu3 %v658_v30  ;;  %923 = vmatpush.msrb.mxu0 %v458_v32  ;;  %v506_v49 = vld [vmem:[#allocation5 + $0xae8] sm:$0xff]  ;;  %v279_v28 = vld [vmem:[#allocation5 + $0x3d0] sm:$0xff] }
  0xd1   :  { %943 = vmatpush.msrb.mxu1 %v522_v33  ;;  %963 = vmatpush.msrb.mxu2 %v586_v34  ;;  %v570_v50 = vld [vmem:[#allocation5 + $0xce8] sm:$0xff]  ;;  %v343_v29 = vld [vmem:[#allocation5 + $0x5d0] sm:$0xff] }
  0xd2   :  { %982 = vmatpush.msrb.mxu3 %v654_v35  ;;  %924 = vmatpush.msrb.mxu0 %v454_v36  ;;  %v638_v51 = vld [vmem:[#allocation5 + $0xf08] sm:$0xff]  ;;  %v411_v30 = vld [vmem:[#allocation5 + $0x7f0] sm:$0xff] }
  0xd3   :  { %944 = vmatpush.msrb.mxu1 %v518_v37  ;;  %964 = vmatpush.msrb.mxu2 %v582_v38  ;;  %v438_v52 = vld [vmem:[#allocation5 + $0x8c8] sm:$0xff]  ;;  %v211_v32 = vld [vmem:[#allocation5 + $0x1b0] sm:$0xff] }
  0xd4   :  { %983 = vmatpush.msrb.mxu3 %v650_v39  ;;  %925 = vmatpush.msrb.mxu0 %v450_v40  ;;  %v502_v53 = vld [vmem:[#allocation5 + $0xac8] sm:$0xff]  ;;  %v275_v33 = vld [vmem:[#allocation5 + $0x3b0] sm:$0xff] }
  0xd5   :  { %945 = vmatpush.msrb.mxu1 %v514_v41  ;;  %965 = vmatpush.msrb.mxu2 %v578_v42  ;;  %v566_v54 = vld [vmem:[#allocation5 + $0xcc8] sm:$0xff]  ;;  %v407_v34 = vld [vmem:[#allocation5 + $0x7d0] sm:$0xff] }
  0xd6   :  { %984 = vmatpush.msrb.mxu3 %v646_v43  ;;  %926 = vmatpush.msrb.mxu0 %v446_v44  ;;  %v634_v55 = vld [vmem:[#allocation5 + $0xee8] sm:$0xff]  ;;  %v271_v35 = vld [vmem:[#allocation5 + $0x390] sm:$0xff] }
  0xd7   :  { %946 = vmatpush.msrb.mxu1 %v510_v45  ;;  %966 = vmatpush.msrb.mxu2 %v574_v46  ;;  %v434_v56 = vld [vmem:[#allocation5 + $0x8a8] sm:$0xff]  ;;  %v335_v36 = vld [vmem:[#allocation5 + $0x590] sm:$0xff] }
  0xd8   :  { %985 = vmatpush.msrb.mxu3 %v642_v47  ;;  %927 = vmatpush.msrb.mxu0 %v442_v48  ;;  %v498_v57 = vld [vmem:[#allocation5 + $0xaa8] sm:$0xff]  ;;  %v403_v37 = vld [vmem:[#allocation5 + $0x7b0] sm:$0xff] }
  0xd9   :  { %947 = vmatpush.msrb.mxu1 %v506_v49  ;;  %967 = vmatpush.msrb.mxu2 %v570_v50  ;;  %v562_v58 = vld [vmem:[#allocation5 + $0xca8] sm:$0xff]  ;;  %v203_v38 = vld [vmem:[#allocation5 + $0x170] sm:$0xff] }
  0xda   :  { %986 = vmatpush.msrb.mxu3 %v638_v51  ;;  %928 = vmatpush.msrb.mxu0 %v438_v52  ;;  %v630_v59 = vld [vmem:[#allocation5 + $0xec8] sm:$0xff]  ;;  %v267_v39 = vld [vmem:[#allocation5 + $0x370] sm:$0xff] }
  0xdb   :  { %948 = vmatpush.msrb.mxu1 %v502_v53  ;;  %968 = vmatpush.msrb.mxu2 %v566_v54  ;;  %v430_v60 = vld [vmem:[#allocation5 + $0x888] sm:$0xff]  ;;  %v331_v40 = vld [vmem:[#allocation5 + $0x570] sm:$0xff] }
  0xdc   :  { %987 = vmatpush.msrb.mxu3 %v634_v55  ;;  %v494_v61 = vld [vmem:[#allocation5 + $0xa88] sm:$0xff]  ;;  %929 = vmatpush.msrb.mxu0 %v434_v56  ;;  %v399_v41 = vld [vmem:[#allocation5 + $0x790] sm:$0xff] }
  0xdd   :  { %949 = vmatpush.msrb.mxu1 %v498_v57  ;;  %v558_v62 = vld [vmem:[#allocation5 + $0xc88] sm:$0xff]  ;;  %969 = vmatpush.msrb.mxu2 %v562_v58  ;;  %v199_v42 = vld [vmem:[#allocation5 + $0x150] sm:$0xff] }
  0xde   :  { %v626_v63 = vld [vmem:[#allocation5 + $0xea8] sm:$0xff]  ;;  %988 = vmatpush.msrb.mxu3 %v630_v59  ;;  %930 = vmatpush.msrb.mxu0 %v430_v60  ;;  %v263_v43 = vld [vmem:[#allocation5 + $0x350] sm:$0xff] }
  0xdf   :  { %v426_v3 = vld [vmem:[#allocation5 + $0x868] sm:$0xff]  ;;  %950 = vmatpush.msrb.mxu1 %v494_v61  ;;  %970 = vmatpush.msrb.mxu2 %v558_v62  ;;  %v327_v44 = vld [vmem:[#allocation5 + $0x550] sm:$0xff] }
  0xe0   :  { %v490_v4 = vld [vmem:[#allocation5 + $0xa68] sm:$0xff]  ;;  %989 = vmatpush.msrb.mxu3 %v626_v63  ;;  %931 = vmatpush.msrb.mxu0 %v426_v3  ;;  %v395_v45 = vld [vmem:[#allocation5 + $0x770] sm:$0xff] }
  0xe1   :  { %v554_v5 = vld [vmem:[#allocation5 + $0xc68] sm:$0xff]  ;;  %951 = vmatpush.msrb.mxu1 %v490_v4  ;;  %855 = vmatmul.f32.vlgmr.msra.gmra.mxu0 %v2069_v0  ;;  %v339_v0 = vld [vmem:[#allocation5 + $0x5b0] sm:$0xff] }
  0xe2   :  { %v622_v6 = vld [vmem:[#allocation5 + $0xe88] sm:$0xff]  ;;  %971 = vmatpush.msrb.mxu2 %v554_v5  ;;  %875 = vmatmul.f32.vlgmr.msra.gmra.mxu1 %v2071_v1  ;;  %v207_v1 = vld [vmem:[#allocation5 + $0x190] sm:$0xff] }
  0xe3   :  { %v422_v7 = vld [vmem:[#allocation5 + $0x848] sm:$0xff]  ;;  %990 = vmatpush.msrb.mxu3 %v622_v6  ;;  %895 = vmatmul.f32.vlgmr.msra.gmra.mxu2 %v2073_v2  ;;  %v195_v46 = vld [vmem:[#allocation5 + $0x130] sm:$0xff] }
  0xe4   :  { %v486_v9 = vld [vmem:[#allocation5 + $0xa48] sm:$0xff]  ;;  %932 = vmatpush.msrb.mxu0 %v422_v7  ;;  %915 = vmatmul.f32.vlgmr.msra.gmra.mxu3 %v2078_v8  ;;  %v259_v47 = vld [vmem:[#allocation5 + $0x330] sm:$0xff] }
  0xe5   :  { %v550_v10 = vld [vmem:[#allocation5 + $0xc48] sm:$0xff]  ;;  %952 = vmatpush.msrb.mxu1 %v486_v9  ;;  %v323_v48 = vld [vmem:[#allocation5 + $0x530] sm:$0xff] }
  0xe6   :  { %v618_v11 = vld [vmem:[#allocation5 + $0xe68] sm:$0xff]  ;;  %972 = vmatpush.msrb.mxu2 %v550_v10  ;;  %v391_v49 = vld [vmem:[#allocation5 + $0x750] sm:$0xff] }
  0xe7   :  { %v418_v12 = vld [vmem:[#allocation5 + $0x828] sm:$0xff]  ;;  %991 = vmatpush.msrb.mxu3 %v618_v11  ;;  %v191_v50 = vld [vmem:[#allocation5 + $0x110] sm:$0xff] }
  0xe8   :  { %v482_v13 = vld [vmem:[#allocation5 + $0xa28] sm:$0xff]  ;;  %933 = vmatpush.msrb.mxu0 %v418_v12  ;;  %v255_v51 = vld [vmem:[#allocation5 + $0x310] sm:$0xff] }
  0xe9   :  { %v546_v14 = vld [vmem:[#allocation5 + $0xc28] sm:$0xff]  ;;  %953 = vmatpush.msrb.mxu1 %v482_v13  ;;  %v319_v52 = vld [vmem:[#allocation5 + $0x510] sm:$0xff] }
  0xea   :  { %v614_v15 = vld [vmem:[#allocation5 + $0xe48] sm:$0xff]  ;;  %973 = vmatpush.msrb.mxu2 %v546_v14  ;;  %v387_v53 = vld [vmem:[#allocation5 + $0x730] sm:$0xff] }
  0xeb   :  { %v414_v16 = vld [vmem:[#allocation5 + $0x808] sm:$0xff]  ;;  %992 = vmatpush.msrb.mxu3 %v614_v15  ;;  %v187_v54 = vld [vmem:[#allocation5 + $0xf0] sm:$0xff] }
  0xec   :  { %v478_v17 = vld [vmem:[#allocation5 + $0xa08] sm:$0xff]  ;;  %934 = vmatpush.msrb.mxu0 %v414_v16  ;;  %v251_v55 = vld [vmem:[#allocation5 + $0x2f0] sm:$0xff] }
  0xed   :  { %v542_v18 = vld [vmem:[#allocation5 + $0xc08] sm:$0xff]  ;;  %954 = vmatpush.msrb.mxu1 %v478_v17  ;;  %935 = vmatmul.f32.vlgmr.msrb.gmra.mxu0 %v2083_v25  ;;  %v315_v56 = vld [vmem:[#allocation5 + $0x4f0] sm:$0xff] }
  0xee   :  { %v610_v19 = vld [vmem:[#allocation5 + $0xe28] sm:$0xff]  ;;  %974 = vmatpush.msrb.mxu2 %v542_v18  ;;  %999 = vmatpush.msra.mxu0 %v219_v21  ;;  %v383_v57 = vld [vmem:[#allocation5 + $0x710] sm:$0xff] }
  0xef   :  { %993 = vmatpush.msrb.mxu3 %v610_v19  ;;  %v606_v24 = vld [vmem:[#allocation5 + $0xe08] sm:$0xff]  ;;  %1019 = vmatpush.msra.mxu1 %v283_v22  ;;  %v183_v58 = vld [vmem:[#allocation5 + $0xd0] sm:$0xff] }
  0xf0   :  { %1039 = vmatpush.msra.mxu2 %v347_v23  ;;  %1000 = vmatpush.msra.mxu0 %v215_v27  ;;  %v247_v59 = vld [vmem:[#allocation5 + $0x2d0] sm:$0xff] }
  0xf1   :  { %994 = vmatpush.msrb.mxu3 %v606_v24  ;;  %1020 = vmatpush.msra.mxu1 %v279_v28  ;;  %v311_v60 = vld [vmem:[#allocation5 + $0x4d0] sm:$0xff] }
  0xf2   :  { %1040 = vmatpush.msra.mxu2 %v343_v29  ;;  %1001 = vmatpush.msra.mxu0 %v211_v32  ;;  %v379_v61 = vld [vmem:[#allocation5 + $0x6f0] sm:$0xff] }
  0xf3   :  { %1059 = vmatpush.msra.mxu3 %v411_v30  ;;  %1021 = vmatpush.msra.mxu1 %v275_v33  ;;  %v179_v62 = vld [vmem:[#allocation5 + $0xb0] sm:$0xff] }
  0xf4   :  { %1041 = vmatpush.msra.mxu2 %v339_v0  ;;  %1002 = vmatpush.msra.mxu0 %v207_v1  ;;  %v243_v63 = vld [vmem:[#allocation5 + $0x2b0] sm:$0xff] }
  0xf5   :  { %1060 = vmatpush.msra.mxu3 %v407_v34  ;;  %1022 = vmatpush.msra.mxu1 %v271_v35  ;;  %v307_v3 = vld [vmem:[#allocation5 + $0x4b0] sm:$0xff] }
  0xf6   :  { %1042 = vmatpush.msra.mxu2 %v335_v36  ;;  %1003 = vmatpush.msra.mxu0 %v203_v38  ;;  %v375_v4 = vld [vmem:[#allocation5 + $0x6d0] sm:$0xff] }
  0xf7   :  { %1061 = vmatpush.msra.mxu3 %v403_v37  ;;  %975 = vmatmul.f32.vlgmr.msrb.gmra.mxu2 %v2081_v20  ;;  %v175_v5 = vld [vmem:[#allocation5 + $0x90] sm:$0xff] }
  0xf8   :  { %1023 = vmatpush.msra.mxu1 %v267_v39  ;;  %1043 = vmatpush.msra.mxu2 %v331_v40  ;;  %v239_v6 = vld [vmem:[#allocation5 + $0x290] sm:$0xff] }
  0xf9   :  { %1062 = vmatpush.msra.mxu3 %v399_v41  ;;  %1004 = vmatpush.msra.mxu0 %v199_v42  ;;  %v303_v7 = vld [vmem:[#allocation5 + $0x490] sm:$0xff] }
  0xfa   :  { %995 = vmatmul.f32.vlgmr.msrb.gmra.mxu3 %v2086_v26  ;;  %1024 = vmatpush.msra.mxu1 %v263_v43  ;;  %v371_v9 = vld [vmem:[#allocation5 + $0x6b0] sm:$0xff] }
  0xfb   :  { %1044 = vmatpush.msra.mxu2 %v327_v44  ;;  %1063 = vmatpush.msra.mxu3 %v395_v45  ;;  %v171_v10 = vld [vmem:[#allocation5 + $0x70] sm:$0xff] }
  0xfc   :  { %955 = vmatmul.f32.vlgmr.msrb.gmra.mxu1 %v2089_v31  ;;  %1005 = vmatpush.msra.mxu0 %v195_v46  ;;  %v235_v11 = vld [vmem:[#allocation5 + $0x270] sm:$0xff] }
  0xfd   :  { %1025 = vmatpush.msra.mxu1 %v259_v47  ;;  %1045 = vmatpush.msra.mxu2 %v323_v48  ;;  %v299_v12 = vld [vmem:[#allocation5 + $0x470] sm:$0xff] }
  0xfe   :  { %1064 = vmatpush.msra.mxu3 %v391_v49  ;;  %1006 = vmatpush.msra.mxu0 %v191_v50  ;;  %v367_v13 = vld [vmem:[#allocation5 + $0x690] sm:$0xff] }
  0xff   :  { %1026 = vmatpush.msra.mxu1 %v255_v51  ;;  %1046 = vmatpush.msra.mxu2 %v319_v52  ;;  %v167_v14 = vld [vmem:[#allocation5 + $0x50] sm:$0xff] }
 0x100   :  { %1065 = vmatpush.msra.mxu3 %v387_v53  ;;  %1007 = vmatpush.msra.mxu0 %v187_v54  ;;  %v231_v15 = vld [vmem:[#allocation5 + $0x250] sm:$0xff] }
 0x101   :  { %1027 = vmatpush.msra.mxu1 %v251_v55  ;;  %1047 = vmatpush.msra.mxu2 %v315_v56  ;;  %v295_v16 = vld [vmem:[#allocation5 + $0x450] sm:$0xff] }
 0x102   :  { %1066 = vmatpush.msra.mxu3 %v383_v57  ;;  %1008 = vmatpush.msra.mxu0 %v183_v58  ;;  %v363_v17 = vld [vmem:[#allocation5 + $0x670] sm:$0xff] }
 0x103   :  { %1028 = vmatpush.msra.mxu1 %v247_v59  ;;  %1048 = vmatpush.msra.mxu2 %v311_v60  ;;  %v163_v18 = vld [vmem:[#allocation5 + $0x30] sm:$0xff] }
 0x104   :  { %1067 = vmatpush.msra.mxu3 %v379_v61  ;;  %1009 = vmatpush.msra.mxu0 %v179_v62  ;;  %v227_v19 = vld [vmem:[#allocation5 + $0x230] sm:$0xff] }
 0x105   :  { %1029 = vmatpush.msra.mxu1 %v243_v63  ;;  %1049 = vmatpush.msra.mxu2 %v307_v3  ;;  %v291_v21 = vld [vmem:[#allocation5 + $0x430] sm:$0xff] }
 0x106   :  { %1068 = vmatpush.msra.mxu3 %v375_v4  ;;  %1010 = vmatpush.msra.mxu0 %v175_v5  ;;  %v359_v22 = vld [vmem:[#allocation5 + $0x650] sm:$0xff] }
 0x107   :  { %1030 = vmatpush.msra.mxu1 %v239_v6  ;;  %1050 = vmatpush.msra.mxu2 %v303_v7  ;;  %v159_v23 = vld [vmem:[#allocation5 + $0x10] sm:$0xff] }
 0x108   :  { %1069 = vmatpush.msra.mxu3 %v371_v9  ;;  %1011 = vmatpush.msra.mxu0 %v171_v10  ;;  %v223_v24 = vld [vmem:[#allocation5 + $0x210] sm:$0xff] }
 0x109   :  { %1031 = vmatpush.msra.mxu1 %v235_v11  ;;  %1051 = vmatpush.msra.mxu2 %v299_v12  ;;  %v287_v27 = vld [vmem:[#allocation5 + $0x410] sm:$0xff] }
 0x10a   :  { %1070 = vmatpush.msra.mxu3 %v367_v13  ;;  %1012 = vmatpush.msra.mxu0 %v167_v14  ;;  %v355_v28 = vld [vmem:[#allocation5 + $0x630] sm:$0xff] }
 0x10b   :  { %1032 = vmatpush.msra.mxu1 %v231_v15  ;;  %1052 = vmatpush.msra.mxu2 %v295_v16  ;;  %v475_v29 = vld [vmem:[#allocation5 + $0x9f0] sm:$0xff] }
 0x10c   :  { %1071 = vmatpush.msra.mxu3 %v363_v17  ;;  %1013 = vmatpush.msra.mxu0 %v163_v18  ;;  %v539_v30 = vld [vmem:[#allocation5 + $0xbf0] sm:$0xff] }
 0x10d   :  { %1033 = vmatpush.msra.mxu1 %v227_v19  ;;  %1053 = vmatpush.msra.mxu2 %v291_v21  ;;  %v603_v32 = vld [vmem:[#allocation5 + $0xdf0] sm:$0xff] }
 0x10e   :  { %1072 = vmatpush.msra.mxu3 %v359_v22  ;;  %1014 = vmatpush.msra.mxu0 %v159_v23  ;;  %v351_v33 = vld [vmem:[#allocation5 + $0x610] sm:$0xff] }
 0x10f   :  { %1034 = vmatpush.msra.mxu1 %v223_v24  ;;  %1054 = vmatpush.msra.mxu2 %v287_v27  ;;  %v471_v0 = vld [vmem:[#allocation5 + $0x9d0] sm:$0xff]  ;;  %v2102_v24 = vld [vmem:[#allocation3] sm:$0xff] }
 0x110   :  { %1073 = vmatpush.msra.mxu3 %v355_v28  ;;  %v535_v34 = vld [vmem:[#allocation5 + $0xbd0] sm:$0xff]  ;;  %1079 = vmatpush.msrb.mxu0 %v475_v29 }
 0x111   :  { %1099 = vmatpush.msrb.mxu1 %v539_v30  ;;  %v599_v1 = vld [vmem:[#allocation5 + $0xdd0] sm:$0xff]  ;;  %1119 = vmatpush.msrb.mxu2 %v603_v32  ;;  %v2106_v32 = vld [vmem:[#allocation3 + $0x8] sm:$0xff] }
 0x112   :  { %v667_v35 = vld [vmem:[#allocation5 + $0xff0] sm:$0xff]  ;;  %1074 = vmatpush.msra.mxu3 %v351_v33  ;;  %1080 = vmatpush.msrb.mxu0 %v471_v0 }
 0x113   :  { %v467_v36 = vld [vmem:[#allocation5 + $0x9b0] sm:$0xff]  ;;  %1100 = vmatpush.msrb.mxu1 %v535_v34  ;;  %1120 = vmatpush.msrb.mxu2 %v599_v1 }
 0x114   :  { %v531_v37 = vld [vmem:[#allocation5 + $0xbb0] sm:$0xff]  ;;  %1139 = vmatpush.msrb.mxu3 %v667_v35  ;;  %1081 = vmatpush.msrb.mxu0 %v467_v36  ;;  %v284_v35 = vld [vmem:[#allocation5 + $0x3f8] sm:$0xff] }
 0x115   :  { %v595_v38 = vld [vmem:[#allocation5 + $0xdb0] sm:$0xff]  ;;  %1101 = vmatpush.msrb.mxu1 %v531_v37  ;;  %1055 = vmatmul.f32.vlgmr.msra.gmra.mxu2 %v2073_v2  ;;  %v348_v36 = vld [vmem:[#allocation5 + $0x5f8] sm:$0xff] }
 0x116   :  { %v663_v39 = vld [vmem:[#allocation5 + $0xfd0] sm:$0xff]  ;;  %1121 = vmatpush.msrb.mxu2 %v595_v38  ;;  %1015 = vmatmul.f32.vlgmr.msra.gmra.mxu0 %v2102_v24  ;;  %v216_v38 = vld [vmem:[#allocation5 + $0x1d8] sm:$0xff] }
 0x117   :  { %v463_v40 = vld [vmem:[#allocation5 + $0x990] sm:$0xff]  ;;  %1140 = vmatpush.msrb.mxu3 %v663_v39  ;;  %1035 = vmatmul.f32.vlgmr.msra.gmra.mxu1 %v2106_v32  ;;  %v280_v39 = vld [vmem:[#allocation5 + $0x3d8] sm:$0xff] }
 0x118   :  { %v527_v41 = vld [vmem:[#allocation5 + $0xb90] sm:$0xff]  ;;  %1082 = vmatpush.msrb.mxu0 %v463_v40  ;;  %1075 = vmatmul.f32.vlgmr.msra.gmra.mxu3 %v2078_v8  ;;  %v220_v8 = vld [vmem:[#allocation5 + $0x1f8] sm:$0xff] }
 0x119   :  { %v591_v42 = vld [vmem:[#allocation5 + $0xd90] sm:$0xff]  ;;  %1102 = vmatpush.msrb.mxu1 %v527_v41  ;;  %v344_v40 = vld [vmem:[#allocation5 + $0x5d8] sm:$0xff] }
 0x11a   :  { %v659_v43 = vld [vmem:[#allocation5 + $0xfb0] sm:$0xff]  ;;  %1122 = vmatpush.msrb.mxu2 %v591_v42  ;;  %v412_v41 = vld [vmem:[#allocation5 + $0x7f8] sm:$0xff] }
 0x11b   :  { %v459_v44 = vld [vmem:[#allocation5 + $0x970] sm:$0xff]  ;;  %1141 = vmatpush.msrb.mxu3 %v659_v43  ;;  %v212_v42 = vld [vmem:[#allocation5 + $0x1b8] sm:$0xff] }
 0x11c   :  { %v523_v45 = vld [vmem:[#allocation5 + $0xb70] sm:$0xff]  ;;  %1083 = vmatpush.msrb.mxu0 %v459_v44  ;;  %v276_v43 = vld [vmem:[#allocation5 + $0x3b8] sm:$0xff] }
 0x11d   :  { %v587_v46 = vld [vmem:[#allocation5 + $0xd70] sm:$0xff]  ;;  %1103 = vmatpush.msrb.mxu1 %v523_v45  ;;  %v340_v44 = vld [vmem:[#allocation5 + $0x5b8] sm:$0xff] }
 0x11e   :  { %v655_v47 = vld [vmem:[#allocation5 + $0xf90] sm:$0xff]  ;;  %1123 = vmatpush.msrb.mxu2 %v587_v46  ;;  %v408_v45 = vld [vmem:[#allocation5 + $0x7d8] sm:$0xff] }
 0x11f   :  { %v455_v48 = vld [vmem:[#allocation5 + $0x950] sm:$0xff]  ;;  %1142 = vmatpush.msrb.mxu3 %v655_v47  ;;  %v272_v46 = vld [vmem:[#allocation5 + $0x398] sm:$0xff] }
 0x120   :  { %v519_v49 = vld [vmem:[#allocation5 + $0xb50] sm:$0xff]  ;;  %1084 = vmatpush.msrb.mxu0 %v455_v48  ;;  %v336_v47 = vld [vmem:[#allocation5 + $0x598] sm:$0xff] }
 0x121   :  { %v583_v50 = vld [vmem:[#allocation5 + $0xd50] sm:$0xff]  ;;  %1104 = vmatpush.msrb.mxu1 %v519_v49  ;;  %v404_v48 = vld [vmem:[#allocation5 + $0x7b8] sm:$0xff] }
 0x122   :  { %v651_v51 = vld [vmem:[#allocation5 + $0xf70] sm:$0xff]  ;;  %1124 = vmatpush.msrb.mxu2 %v583_v50  ;;  %v332_v49 = vld [vmem:[#allocation5 + $0x578] sm:$0xff] }
 0x123   :  { %v451_v52 = vld [vmem:[#allocation5 + $0x930] sm:$0xff]  ;;  %1143 = vmatpush.msrb.mxu3 %v651_v51  ;;  %v400_v50 = vld [vmem:[#allocation5 + $0x798] sm:$0xff] }
 0x124   :  { %v515_v53 = vld [vmem:[#allocation5 + $0xb30] sm:$0xff]  ;;  %1085 = vmatpush.msrb.mxu0 %v451_v52  ;;  %v200_v51 = vld [vmem:[#allocation5 + $0x158] sm:$0xff] }
 0x125   :  { %v579_v54 = vld [vmem:[#allocation5 + $0xd30] sm:$0xff]  ;;  %1105 = vmatpush.msrb.mxu1 %v515_v53  ;;  %v264_v52 = vld [vmem:[#allocation5 + $0x358] sm:$0xff] }
 0x126   :  { %v647_v55 = vld [vmem:[#allocation5 + $0xf50] sm:$0xff]  ;;  %1125 = vmatpush.msrb.mxu2 %v579_v54  ;;  %v396_v53 = vld [vmem:[#allocation5 + $0x778] sm:$0xff] }
 0x127   :  { %v447_v56 = vld [vmem:[#allocation5 + $0x910] sm:$0xff]  ;;  %1144 = vmatpush.msrb.mxu3 %v647_v55  ;;  %v196_v54 = vld [vmem:[#allocation5 + $0x138] sm:$0xff] }
 0x128   :  { %v511_v57 = vld [vmem:[#allocation5 + $0xb10] sm:$0xff]  ;;  %1086 = vmatpush.msrb.mxu0 %v447_v56  ;;  %v260_v55 = vld [vmem:[#allocation5 + $0x338] sm:$0xff] }
 0x129   :  { %v575_v58 = vld [vmem:[#allocation5 + $0xd10] sm:$0xff]  ;;  %1106 = vmatpush.msrb.mxu1 %v511_v57  ;;  %v324_v56 = vld [vmem:[#allocation5 + $0x538] sm:$0xff] }
 0x12a   :  { %v643_v59 = vld [vmem:[#allocation5 + $0xf30] sm:$0xff]  ;;  %1126 = vmatpush.msrb.mxu2 %v575_v58  ;;  %v392_v57 = vld [vmem:[#allocation5 + $0x758] sm:$0xff] }
 0x12b   :  { %v443_v60 = vld [vmem:[#allocation5 + $0x8f0] sm:$0xff]  ;;  %1145 = vmatpush.msrb.mxu3 %v643_v59  ;;  %v192_v58 = vld [vmem:[#allocation5 + $0x118] sm:$0xff] }
 0x12c   :  { %v507_v61 = vld [vmem:[#allocation5 + $0xaf0] sm:$0xff]  ;;  %1087 = vmatpush.msrb.mxu0 %v443_v60  ;;  %v256_v59 = vld [vmem:[#allocation5 + $0x318] sm:$0xff] }
 0x12d   :  { %v571_v62 = vld [vmem:[#allocation5 + $0xcf0] sm:$0xff]  ;;  %1107 = vmatpush.msrb.mxu1 %v507_v61  ;;  %v320_v60 = vld [vmem:[#allocation5 + $0x518] sm:$0xff] }
 0x12e   :  { %v639_v63 = vld [vmem:[#allocation5 + $0xf10] sm:$0xff]  ;;  %1127 = vmatpush.msrb.mxu2 %v571_v62  ;;  %v388_v61 = vld [vmem:[#allocation5 + $0x738] sm:$0xff] }
 0x12f   :  { %v439_v3 = vld [vmem:[#allocation5 + $0x8d0] sm:$0xff]  ;;  %1146 = vmatpush.msrb.mxu3 %v639_v63  ;;  %v188_v62 = vld [vmem:[#allocation5 + $0xf8] sm:$0xff] }
 0x130   :  { %v503_v4 = vld [vmem:[#allocation5 + $0xad0] sm:$0xff]  ;;  %1088 = vmatpush.msrb.mxu0 %v439_v3  ;;  %v252_v63 = vld [vmem:[#allocation5 + $0x2f8] sm:$0xff] }
 0x131   :  { %v567_v5 = vld [vmem:[#allocation5 + $0xcd0] sm:$0xff]  ;;  %1108 = vmatpush.msrb.mxu1 %v503_v4  ;;  %v316_v3 = vld [vmem:[#allocation5 + $0x4f8] sm:$0xff] }
 0x132   :  { %v635_v6 = vld [vmem:[#allocation5 + $0xef0] sm:$0xff]  ;;  %1128 = vmatpush.msrb.mxu2 %v567_v5  ;;  %v384_v4 = vld [vmem:[#allocation5 + $0x718] sm:$0xff] }
 0x133   :  { %v435_v7 = vld [vmem:[#allocation5 + $0x8b0] sm:$0xff]  ;;  %1147 = vmatpush.msrb.mxu3 %v635_v6  ;;  %v184_v5 = vld [vmem:[#allocation5 + $0xd8] sm:$0xff] }
 0x134   :  { %v499_v9 = vld [vmem:[#allocation5 + $0xab0] sm:$0xff]  ;;  %1089 = vmatpush.msrb.mxu0 %v435_v7  ;;  %v248_v6 = vld [vmem:[#allocation5 + $0x2d8] sm:$0xff] }
 0x135   :  { %v563_v10 = vld [vmem:[#allocation5 + $0xcb0] sm:$0xff]  ;;  %1109 = vmatpush.msrb.mxu1 %v499_v9  ;;  %v312_v7 = vld [vmem:[#allocation5 + $0x4d8] sm:$0xff] }
 0x136   :  { %v631_v11 = vld [vmem:[#allocation5 + $0xed0] sm:$0xff]  ;;  %1129 = vmatpush.msrb.mxu2 %v563_v10  ;;  %v380_v9 = vld [vmem:[#allocation5 + $0x6f8] sm:$0xff] }
 0x137   :  { %v431_v12 = vld [vmem:[#allocation5 + $0x890] sm:$0xff]  ;;  %1148 = vmatpush.msrb.mxu3 %v631_v11  ;;  %v180_v10 = vld [vmem:[#allocation5 + $0xb8] sm:$0xff] }
 0x138   :  { %v495_v13 = vld [vmem:[#allocation5 + $0xa90] sm:$0xff]  ;;  %1090 = vmatpush.msrb.mxu0 %v431_v12  ;;  %v244_v11 = vld [vmem:[#allocation5 + $0x2b8] sm:$0xff] }
 0x139   :  { %v559_v14 = vld [vmem:[#allocation5 + $0xc90] sm:$0xff]  ;;  %1110 = vmatpush.msrb.mxu1 %v495_v13  ;;  %v308_v12 = vld [vmem:[#allocation5 + $0x4b8] sm:$0xff] }
 0x13a   :  { %v627_v15 = vld [vmem:[#allocation5 + $0xeb0] sm:$0xff]  ;;  %1130 = vmatpush.msrb.mxu2 %v559_v14  ;;  %v376_v13 = vld [vmem:[#allocation5 + $0x6d8] sm:$0xff] }
 0x13b   :  { %v427_v16 = vld [vmem:[#allocation5 + $0x870] sm:$0xff]  ;;  %1149 = vmatpush.msrb.mxu3 %v627_v15  ;;  %v176_v14 = vld [vmem:[#allocation5 + $0x98] sm:$0xff] }
 0x13c   :  { %v491_v17 = vld [vmem:[#allocation5 + $0xa70] sm:$0xff]  ;;  %1091 = vmatpush.msrb.mxu0 %v427_v16  ;;  %v240_v15 = vld [vmem:[#allocation5 + $0x298] sm:$0xff] }
 0x13d   :  { %v555_v18 = vld [vmem:[#allocation5 + $0xc70] sm:$0xff]  ;;  %1111 = vmatpush.msrb.mxu1 %v491_v17  ;;  %v304_v16 = vld [vmem:[#allocation5 + $0x498] sm:$0xff] }
 0x13e   :  { %v623_v19 = vld [vmem:[#allocation5 + $0xe90] sm:$0xff]  ;;  %1131 = vmatpush.msrb.mxu2 %v555_v18  ;;  %v372_v17 = vld [vmem:[#allocation5 + $0x6b8] sm:$0xff] }
 0x13f   :  { %v423_v21 = vld [vmem:[#allocation5 + $0x850] sm:$0xff]  ;;  %1150 = vmatpush.msrb.mxu3 %v623_v19  ;;  %v172_v18 = vld [vmem:[#allocation5 + $0x78] sm:$0xff] }
 0x140   :  { %v487_v22 = vld [vmem:[#allocation5 + $0xa50] sm:$0xff]  ;;  %1092 = vmatpush.msrb.mxu0 %v423_v21  ;;  %v236_v19 = vld [vmem:[#allocation5 + $0x278] sm:$0xff] }
 0x141   :  { %v551_v23 = vld [vmem:[#allocation5 + $0xc50] sm:$0xff]  ;;  %1112 = vmatpush.msrb.mxu1 %v487_v22  ;;  %v300_v21 = vld [vmem:[#allocation5 + $0x478] sm:$0xff] }
 0x142   :  { %v619_v27 = vld [vmem:[#allocation5 + $0xe70] sm:$0xff]  ;;  %1132 = vmatpush.msrb.mxu2 %v551_v23  ;;  %v368_v22 = vld [vmem:[#allocation5 + $0x698] sm:$0xff] }
 0x143   :  { %v419_v28 = vld [vmem:[#allocation5 + $0x830] sm:$0xff]  ;;  %1151 = vmatpush.msrb.mxu3 %v619_v27  ;;  %v168_v23 = vld [vmem:[#allocation5 + $0x58] sm:$0xff] }
 0x144   :  { %v483_v29 = vld [vmem:[#allocation5 + $0xa30] sm:$0xff]  ;;  %1093 = vmatpush.msrb.mxu0 %v419_v28  ;;  %v232_v27 = vld [vmem:[#allocation5 + $0x258] sm:$0xff] }
 0x145   :  { %v547_v2 = vld [vmem:[#allocation5 + $0xc30] sm:$0xff]  ;;  %1113 = vmatpush.msrb.mxu1 %v483_v29  ;;  %v296_v28 = vld [vmem:[#allocation5 + $0x458] sm:$0xff] }
 0x146   :  { %v615_v30 = vld [vmem:[#allocation5 + $0xe50] sm:$0xff]  ;;  %1133 = vmatpush.msrb.mxu2 %v547_v2  ;;  %v364_v29 = vld [vmem:[#allocation5 + $0x678] sm:$0xff] }
 0x147   :  { %v415_v33 = vld [vmem:[#allocation5 + $0x810] sm:$0xff]  ;;  %1152 = vmatpush.msrb.mxu3 %v615_v30  ;;  %v164_v2 = vld [vmem:[#allocation5 + $0x38] sm:$0xff] }
 0x148   :  { %v479_v0 = vld [vmem:[#allocation5 + $0xa10] sm:$0xff]  ;;  %1094 = vmatpush.msrb.mxu0 %v415_v33  ;;  %v228_v30 = vld [vmem:[#allocation5 + $0x238] sm:$0xff] }
 0x149   :  { %v543_v34 = vld [vmem:[#allocation5 + $0xc10] sm:$0xff]  ;;  %1114 = vmatpush.msrb.mxu1 %v479_v0  ;;  %1095 = vmatmul.f32.vlgmr.msrb.gmra.mxu0 %v2083_v25  ;;  %v204_v25 = vld [vmem:[#allocation5 + $0x178] sm:$0xff] }
 0x14a   :  { %v611_v1 = vld [vmem:[#allocation5 + $0xe30] sm:$0xff]  ;;  %1134 = vmatpush.msrb.mxu2 %v543_v34  ;;  %1159 = vmatpush.msra.mxu0 %v220_v8  ;;  %v292_v33 = vld [vmem:[#allocation5 + $0x438] sm:$0xff] }
 0x14b   :  { %1153 = vmatpush.msrb.mxu3 %v611_v1  ;;  %v607_v37 = vld [vmem:[#allocation5 + $0xe10] sm:$0xff]  ;;  %1135 = vmatmul.f32.vlgmr.msrb.gmra.mxu2 %v2081_v20  ;;  %v208_v20 = vld [vmem:[#allocation5 + $0x198] sm:$0xff] }
 0x14c   :  { %1179 = vmatpush.msra.mxu1 %v284_v35  ;;  %1199 = vmatpush.msra.mxu2 %v348_v36  ;;  %v360_v0 = vld [vmem:[#allocation5 + $0x658] sm:$0xff] }
 0x14d   :  { %1154 = vmatpush.msrb.mxu3 %v607_v37  ;;  %1160 = vmatpush.msra.mxu0 %v216_v38  ;;  %v160_v34 = vld [vmem:[#allocation5 + $0x18] sm:$0xff] }
 0x14e   :  { %1155 = vmatmul.f32.vlgmr.msrb.gmra.mxu3 %v2086_v26  ;;  %1180 = vmatpush.msra.mxu1 %v280_v39  ;;  %v268_v26 = vld [vmem:[#allocation5 + $0x378] sm:$0xff] }
 0x14f   :  { %1200 = vmatpush.msra.mxu2 %v344_v40  ;;  %1219 = vmatpush.msra.mxu3 %v412_v41  ;;  %v224_v1 = vld [vmem:[#allocation5 + $0x218] sm:$0xff] }
 0x150   :  { %1115 = vmatmul.f32.vlgmr.msrb.gmra.mxu1 %v2089_v31  ;;  %1161 = vmatpush.msra.mxu0 %v212_v42  ;;  %v328_v31 = vld [vmem:[#allocation5 + $0x558] sm:$0xff] }
 0x151   :  { %1181 = vmatpush.msra.mxu1 %v276_v43  ;;  %1201 = vmatpush.msra.mxu2 %v340_v44  ;;  %v288_v8 = vld [vmem:[#allocation5 + $0x418] sm:$0xff] }
 0x152   :  { %1220 = vmatpush.msra.mxu3 %v408_v45  ;;  %1162 = vmatpush.msra.mxu0 %v208_v20  ;;  %v356_v35 = vld [vmem:[#allocation5 + $0x638] sm:$0xff] }
 0x153   :  { %1182 = vmatpush.msra.mxu1 %v272_v46  ;;  %1202 = vmatpush.msra.mxu2 %v336_v47  ;;  %v476_v36 = vld [vmem:[#allocation5 + $0x9f8] sm:$0xff] }
 0x154   :  { %1221 = vmatpush.msra.mxu3 %v404_v48  ;;  %1163 = vmatpush.msra.mxu0 %v204_v25  ;;  %v540_v37 = vld [vmem:[#allocation5 + $0xbf8] sm:$0xff] }
 0x155   :  { %1183 = vmatpush.msra.mxu1 %v268_v26  ;;  %1203 = vmatpush.msra.mxu2 %v332_v49  ;;  %v604_v38 = vld [vmem:[#allocation5 + $0xdf8] sm:$0xff] }
 0x156   :  { %1222 = vmatpush.msra.mxu3 %v400_v50  ;;  %1164 = vmatpush.msra.mxu0 %v200_v51  ;;  %v352_v39 = vld [vmem:[#allocation5 + $0x618] sm:$0xff] }
 0x157   :  { %1184 = vmatpush.msra.mxu1 %v264_v52  ;;  %1204 = vmatpush.msra.mxu2 %v328_v31  ;;  %v472_v40 = vld [vmem:[#allocation5 + $0x9d8] sm:$0xff] }
 0x158   :  { %1223 = vmatpush.msra.mxu3 %v396_v53  ;;  %1165 = vmatpush.msra.mxu0 %v196_v54  ;;  %v536_v41 = vld [vmem:[#allocation5 + $0xbd8] sm:$0xff] }
 0x159   :  { %1185 = vmatpush.msra.mxu1 %v260_v55  ;;  %1205 = vmatpush.msra.mxu2 %v324_v56  ;;  %v600_v42 = vld [vmem:[#allocation5 + $0xdd8] sm:$0xff] }
 0x15a   :  { %1224 = vmatpush.msra.mxu3 %v392_v57  ;;  %1166 = vmatpush.msra.mxu0 %v192_v58  ;;  %v668_v43 = vld [vmem:[#allocation5 + $0xff8] sm:$0xff] }
 0x15b   :  { %1186 = vmatpush.msra.mxu1 %v256_v59  ;;  %1206 = vmatpush.msra.mxu2 %v320_v60  ;;  %v468_v44 = vld [vmem:[#allocation5 + $0x9b8] sm:$0xff]  ;;  %v2113_v60 = vpop.f32.mrf.mxu0 }
 0x15c   :  { %1225 = vmatpush.msra.mxu3 %v388_v61  ;;  %1167 = vmatpush.msra.mxu0 %v188_v62  ;;  %v532_v45 = vld [vmem:[#allocation5 + $0xbb8] sm:$0xff] }
 0x15d   :  { %1187 = vmatpush.msra.mxu1 %v252_v63  ;;  %1207 = vmatpush.msra.mxu2 %v316_v3  ;;  %v596_v20 = vld [vmem:[#allocation5 + $0xdb8] sm:$0xff] }
 0x15e   :  { %1226 = vmatpush.msra.mxu3 %v384_v4  ;;  %1168 = vmatpush.msra.mxu0 %v184_v5  ;;  %v664_v46 = vld [vmem:[#allocation5 + $0xfd8] sm:$0xff] }
 0x15f   :  { %1188 = vmatpush.msra.mxu1 %v248_v6  ;;  %1208 = vmatpush.msra.mxu2 %v312_v7  ;;  %v464_v47 = vld [vmem:[#allocation5 + $0x998] sm:$0xff] }
 0x160   :  { %1227 = vmatpush.msra.mxu3 %v380_v9  ;;  %1169 = vmatpush.msra.mxu0 %v180_v10  ;;  %v528_v48 = vld [vmem:[#allocation5 + $0xb98] sm:$0xff]  ;;  %v2115_v9 = vpop.f32.mrf.mxu1 }
 0x161   :  { %1189 = vmatpush.msra.mxu1 %v244_v11  ;;  %1209 = vmatpush.msra.mxu2 %v308_v12  ;;  %v592_v25 = vld [vmem:[#allocation5 + $0xd98] sm:$0xff] }
 0x162   :  { %1228 = vmatpush.msra.mxu3 %v376_v13  ;;  %1170 = vmatpush.msra.mxu0 %v176_v14  ;;  %v660_v26 = vld [vmem:[#allocation5 + $0xfb8] sm:$0xff] }
 0x163   :  { %1190 = vmatpush.msra.mxu1 %v240_v15  ;;  %1210 = vmatpush.msra.mxu2 %v304_v16  ;;  %v460_v49 = vld [vmem:[#allocation5 + $0x978] sm:$0xff] }
 0x164   :  { %1229 = vmatpush.msra.mxu3 %v372_v17  ;;  %1171 = vmatpush.msra.mxu0 %v172_v18  ;;  %v524_v50 = vld [vmem:[#allocation5 + $0xb78] sm:$0xff]  ;;  %v2117_v18 = vpop.f32.mrf.mxu2 }
 0x165   :  { %1191 = vmatpush.msra.mxu1 %v236_v19  ;;  %1211 = vmatpush.msra.mxu2 %v300_v21  ;;  %v588_v51 = vld [vmem:[#allocation5 + $0xd78] sm:$0xff] }
 0x166   :  { %1230 = vmatpush.msra.mxu3 %v368_v22  ;;  %1172 = vmatpush.msra.mxu0 %v168_v23  ;;  %v656_v52 = vld [vmem:[#allocation5 + $0xf98] sm:$0xff] }
 0x167   :  { %1192 = vmatpush.msra.mxu1 %v232_v27  ;;  %1212 = vmatpush.msra.mxu2 %v296_v28  ;;  %v456_v31 = vld [vmem:[#allocation5 + $0x958] sm:$0xff]  ;;  %v2119_v27 = vpop.f32.mrf.mxu0 }
 0x168   :  { %1231 = vmatpush.msra.mxu3 %v364_v29  ;;  %1173 = vmatpush.msra.mxu0 %v164_v2  ;;  %v520_v53 = vld [vmem:[#allocation5 + $0xb58] sm:$0xff] }
 0x169   :  { %1193 = vmatpush.msra.mxu1 %v228_v30  ;;  %1213 = vmatpush.msra.mxu2 %v292_v33  ;;  %v584_v54 = vld [vmem:[#allocation5 + $0xd58] sm:$0xff]  ;;  %v2121_v30 = vpop.f32.mrf.mxu3 }
 0x16a   :  { %1232 = vmatpush.msra.mxu3 %v360_v0  ;;  %1174 = vmatpush.msra.mxu0 %v160_v34  ;;  %v652_v55 = vld [vmem:[#allocation5 + $0xf78] sm:$0xff]  ;;  %v1770_v0 = vld [vmem:[#allocation3 + $0x10] sm:$0xff] }
 0x16b   :  { %1194 = vmatpush.msra.mxu1 %v224_v1  ;;  %1214 = vmatpush.msra.mxu2 %v288_v8  ;;  %v452_v56 = vld [vmem:[#allocation5 + $0x938] sm:$0xff]  ;;  %v2123_v1 = vld [vmem:[#allocation7] sm:$0xf]  ;;  %v2125_v8 = vpop.f32.mrf.mxu1 }
 0x16c   :  { %1233 = vmatpush.msra.mxu3 %v356_v35  ;;  %1239 = vmatpush.msrb.mxu0 %v476_v36  ;;  %v516_v57 = vld [vmem:[#allocation5 + $0xb38] sm:$0xff] }
 0x16d   :  { %1259 = vmatpush.msrb.mxu1 %v540_v37  ;;  %1279 = vmatpush.msrb.mxu2 %v604_v38  ;;  %v580_v58 = vld [vmem:[#allocation5 + $0xd38] sm:$0xff] }
 0x16e   :  { %1234 = vmatpush.msra.mxu3 %v352_v39  ;;  %1240 = vmatpush.msrb.mxu0 %v472_v40  ;;  %v648_v59 = vld [vmem:[#allocation5 + $0xf58] sm:$0xff] }
 0x16f   :  { %1260 = vmatpush.msrb.mxu1 %v536_v41  ;;  %1280 = vmatpush.msrb.mxu2 %v600_v42  ;;  %v448_v61 = vld [vmem:[#allocation5 + $0x918] sm:$0xff]  ;;  %v671_v41 = vperm.slane %v2123_v1, 0 }
 0x170   :  { %1299 = vmatpush.msrb.mxu3 %v668_v43  ;;  %1241 = vmatpush.msrb.mxu0 %v468_v44  ;;  %v512_v62 = vld [vmem:[#allocation5 + $0xb18] sm:$0xff]  ;;  %v672_v44 = vperm.slane %v2123_v1, 1 }
 0x171   :  { %1261 = vmatpush.msrb.mxu1 %v532_v45  ;;  %1281 = vmatpush.msrb.mxu2 %v596_v20  ;;  %v576_v63 = vld [vmem:[#allocation5 + $0xd18] sm:$0xff]  ;;  %v2130_v45 = vpop.f32.mrf.mxu2 }
 0x172   :  { %1300 = vmatpush.msrb.mxu3 %v664_v46  ;;  %1242 = vmatpush.msrb.mxu0 %v464_v47  ;;  %v644_v3 = vld [vmem:[#allocation5 + $0xf38] sm:$0xff]  ;;  %v856_v46 = vpop.f32.mrf.mxu0 }
 0x173   :  { %1262 = vmatpush.msrb.mxu1 %v528_v48  ;;  %1282 = vmatpush.msrb.mxu2 %v592_v25  ;;  %v444_v4 = vld [vmem:[#allocation5 + $0x8f8] sm:$0xff] }
 0x174   :  { %1301 = vmatpush.msrb.mxu3 %v660_v26  ;;  %1243 = vmatpush.msrb.mxu0 %v460_v49  ;;  %v508_v5 = vld [vmem:[#allocation5 + $0xaf8] sm:$0xff]  ;;  %v697_v26 = vadd.f32 %v2113_v60, %v671_v41 }
 0x175   :  { %1263 = vmatpush.msrb.mxu1 %v524_v50  ;;  %1283 = vmatpush.msrb.mxu2 %v588_v51  ;;  %v572_v6 = vld [vmem:[#allocation5 + $0xcf8] sm:$0xff]  ;;  %v857_v51 = vadd.f32 %v856_v46, %v672_v44  ;;  %v1399_v44 = vld [vmem:[#allocation8 + $0x260] sm:$0xff] }
 0x176   :  { %1302 = vmatpush.msrb.mxu3 %v656_v52  ;;  %1244 = vmatpush.msrb.mxu0 %v456_v31  ;;  %v640_v7 = vld [vmem:[#allocation5 + $0xf18] sm:$0xff]  ;;  %v2134_v52 = vpop.f32.mrf.mxu3  ;;  %v1772_v31 = vld [vmem:[#allocation3 + $0x30] sm:$0xff] }
 0x177   :  { %1264 = vmatpush.msrb.mxu1 %v520_v53  ;;  %1284 = vmatpush.msrb.mxu2 %v584_v54  ;;  %v440_v10 = vld [vmem:[#allocation5 + $0x8d8] sm:$0xff]  ;;  %v1351_v53 = vld [vmem:[#allocation8 + $0xe0] sm:$0xff] }
 0x178   :  { %1303 = vmatpush.msrb.mxu3 %v652_v55  ;;  %1245 = vmatpush.msrb.mxu0 %v452_v56  ;;  %v504_v11 = vld [vmem:[#allocation5 + $0xad8] sm:$0xff]  ;;  %v1383_v54 = vld [vmem:[#allocation8 + $0x1e0] sm:$0xff]  ;;  %v717_v56 = vadd.f32 %v2115_v9, %v697_v26 }
 0x179   :  { %1265 = vmatpush.msrb.mxu1 %v516_v57  ;;  %1285 = vmatpush.msrb.mxu2 %v580_v58  ;;  %v568_v12 = vld [vmem:[#allocation5 + $0xcd8] sm:$0xff]  ;;  %v1773_v57 = vld [vmem:[#allocation3 + $0x20] sm:$0xff] }
 0x17a   :  { %1304 = vmatpush.msrb.mxu3 %v648_v59  ;;  %1246 = vmatpush.msrb.mxu0 %v448_v61  ;;  %v636_v13 = vld [vmem:[#allocation5 + $0xef8] sm:$0xff] }
 0x17b   :  { %1266 = vmatpush.msrb.mxu1 %v512_v62  ;;  %1286 = vmatpush.msrb.mxu2 %v576_v63  ;;  %v436_v14 = vld [vmem:[#allocation5 + $0x8b8] sm:$0xff]  ;;  %v896_v62 = vpop.f32.mrf.mxu2  ;;  %v1415_v63 = vld [vmem:[#allocation8 + $0x2e0] sm:$0xff] }
 0x17c   :  { %1305 = vmatpush.msrb.mxu3 %v644_v3  ;;  %1247 = vmatpush.msrb.mxu0 %v444_v4  ;;  %v500_v15 = vld [vmem:[#allocation5 + $0xab8] sm:$0xff]  ;;  %v1775_v3 = vld [vmem:[#allocation3 + $0x28] sm:$0xff] }
 0x17d   :  { %1267 = vmatpush.msrb.mxu1 %v508_v5  ;;  %1287 = vmatpush.msrb.mxu2 %v572_v6  ;;  %v564_v16 = vld [vmem:[#allocation5 + $0xcb8] sm:$0xff]  ;;  %v1347_v4 = vld [vmem:[#allocation8 + $0xc0] sm:$0xff] }
 0x17e   :  { %1306 = vmatpush.msrb.mxu3 %v640_v7  ;;  %1248 = vmatpush.msrb.mxu0 %v440_v10  ;;  %v632_v17 = vld [vmem:[#allocation5 + $0xed8] sm:$0xff]  ;;  %v1379_v5 = vld [vmem:[#allocation8 + $0x1c0] sm:$0xff]  ;;  %v737_v7 = vadd.f32 %v2117_v18, %v717_v56  ;;  %v936_v18 = vpop.f32.mrf.mxu0 }
 0x17f   :  { %1268 = vmatpush.msrb.mxu1 %v504_v11  ;;  %1288 = vmatpush.msrb.mxu2 %v568_v12  ;;  %v432_v19 = vld [vmem:[#allocation5 + $0x898] sm:$0xff]  ;;  %v916_v12 = vpop.f32.mrf.mxu3  ;;  %v1323_v56 = vld [vmem:[#allocation8] sm:$0xff] }
 0x180   :  { %1307 = vmatpush.msrb.mxu3 %v636_v13  ;;  %v496_v21 = vld [vmem:[#allocation5 + $0xa98] sm:$0xff]  ;;  %1249 = vmatpush.msrb.mxu0 %v436_v14  ;;  %v1411_v13 = vld [vmem:[#allocation8 + $0x2c0] sm:$0xff] }
 0x181   :  { %1269 = vmatpush.msrb.mxu1 %v500_v15  ;;  %v560_v22 = vld [vmem:[#allocation5 + $0xc98] sm:$0xff]  ;;  %1289 = vmatpush.msrb.mxu2 %v564_v16  ;;  %v1343_v14 = vld [vmem:[#allocation8 + $0xa0] sm:$0xff] }
 0x182   :  { %v628_v23 = vld [vmem:[#allocation5 + $0xeb8] sm:$0xff]  ;;  %1308 = vmatpush.msrb.mxu3 %v632_v17  ;;  %1250 = vmatpush.msrb.mxu0 %v432_v19  ;;  %v1375_v15 = vld [vmem:[#allocation8 + $0x1a0] sm:$0xff]  ;;  %v757_v17 = vadd.f32 %v2121_v30, %v737_v7  ;;  %v1348_v7 = vld [vmem:[#allocation8 + $0xc8] sm:$0xff] }
 0x183   :  { %v428_v28 = vld [vmem:[#allocation5 + $0x878] sm:$0xff]  ;;  %1270 = vmatpush.msrb.mxu1 %v496_v21  ;;  %1290 = vmatpush.msrb.mxu2 %v560_v22 }
 0x184   :  { %v492_v29 = vld [vmem:[#allocation5 + $0xa78] sm:$0xff]  ;;  %1309 = vmatpush.msrb.mxu3 %v628_v23  ;;  %1215 = vmatmul.f32.vlgmr.msra.gmra.mxu2 %v1770_v0  ;;  %v1407_v23 = vld [vmem:[#allocation8 + $0x2a0] sm:$0xff] }
 0x185   :  { %v556_v2 = vld [vmem:[#allocation5 + $0xc78] sm:$0xff]  ;;  %1251 = vmatpush.msrb.mxu0 %v428_v28  ;;  %1271 = vmatpush.msrb.mxu1 %v492_v29  ;;  %v1339_v28 = vld [vmem:[#allocation8 + $0x80] sm:$0xff] }
 0x186   :  { %v624_v33 = vld [vmem:[#allocation5 + $0xe98] sm:$0xff]  ;;  %1291 = vmatpush.msrb.mxu2 %v556_v2  ;;  %1175 = vmatmul.f32.vlgmr.msra.gmra.mxu0 %v2102_v24  ;;  %v1371_v29 = vld [vmem:[#allocation8 + $0x180] sm:$0xff] }
 0x187   :  { %v424_v34 = vld [vmem:[#allocation5 + $0x858] sm:$0xff]  ;;  %1310 = vmatpush.msrb.mxu3 %v624_v33  ;;  %1195 = vmatmul.f32.vlgmr.msra.gmra.mxu1 %v2106_v32  ;;  %v876_v32 = vpop.f32.mrf.mxu1  ;;  %v777_v33 = vadd.f32 %v2119_v27, %v757_v17  ;;  %v976_v27 = vpop.f32.mrf.mxu2  ;;  %v1412_v17 = vld [vmem:[#allocation8 + $0x2c8] sm:$0xff] }
 0x188   :  { %v488_v35 = vld [vmem:[#allocation5 + $0xa58] sm:$0xff]  ;;  %1252 = vmatpush.msrb.mxu0 %v424_v34  ;;  %v877_v61 = vadd.f32 %v876_v32, %v857_v51  ;;  %v1359_v51 = vld [vmem:[#allocation8 + $0x120] sm:$0xff] }
 0x189   :  { %v552_v36 = vld [vmem:[#allocation5 + $0xc58] sm:$0xff]  ;;  %1272 = vmatpush.msrb.mxu1 %v488_v35 }
 0x18a   :  { %v620_v37 = vld [vmem:[#allocation5 + $0xe78] sm:$0xff]  ;;  %1292 = vmatpush.msrb.mxu2 %v552_v36  ;;  %v897_v9 = vadd.f32 %v896_v62, %v877_v61  ;;  %v1403_v36 = vld [vmem:[#allocation8 + $0x280] sm:$0xff]  ;;  %v1352_v62 = vld [vmem:[#allocation8 + $0xe8] sm:$0xff] }
 0x18b   :  { %v1771_v38 = vld [vmem:[#allocation3 + $0x18] sm:$0xff]  ;;  %1311 = vmatpush.msrb.mxu3 %v620_v37  ;;  %v1335_v37 = vld [vmem:[#allocation8 + $0x60] sm:$0xff] }
 0x18c   :  { %1235 = vmatmul.f32.vlgmr.msra.gmra.mxu3 %v1771_v38  ;;  %v420_v39 = vld [vmem:[#allocation5 + $0x838] sm:$0xff]  ;;  %v917_v19 = vadd.f32 %v916_v12, %v897_v9  ;;  %v1367_v38 = vld [vmem:[#allocation8 + $0x160] sm:$0xff]  ;;  %v1380_v9 = vld [vmem:[#allocation8 + $0x1c8] sm:$0xff] }
 0x18d   :  { %v484_v40 = vld [vmem:[#allocation5 + $0xa38] sm:$0xff]  ;;  %1253 = vmatpush.msrb.mxu0 %v420_v39 }
 0x18e   :  { %v548_v42 = vld [vmem:[#allocation5 + $0xc38] sm:$0xff]  ;;  %1273 = vmatpush.msrb.mxu1 %v484_v40  ;;  %v937_v0 = vadd.f32 %v936_v18, %v917_v19  ;;  %v797_v40 = vadd.f32 %v2125_v8, %v777_v33  ;;  %v996_v8 = vpop.f32.mrf.mxu3  ;;  %v1340_v18 = vld [vmem:[#allocation8 + $0x88] sm:$0xff]  ;;  %v673_v33 = vperm.slane %v2123_v1, 2 }
 0x18f   :  { %v616_v43 = vld [vmem:[#allocation5 + $0xe58] sm:$0xff]  ;;  %1293 = vmatpush.msrb.mxu2 %v548_v42  ;;  %v956_v30 = vpop.f32.mrf.mxu1 }
 0x190   :  { %v416_v24 = vld [vmem:[#allocation5 + $0x818] sm:$0xff]  ;;  %1312 = vmatpush.msrb.mxu3 %v616_v43  ;;  %v957_v41 = vadd.f32 %v956_v30, %v937_v0  ;;  %v1336_v30 = vld [vmem:[#allocation8 + $0x68] sm:$0xff] }
 0x191   :  { %v480_v20 = vld [vmem:[#allocation5 + $0xa18] sm:$0xff]  ;;  %1254 = vmatpush.msrb.mxu0 %v416_v24  ;;  %v1331_v24 = vld [vmem:[#allocation8 + $0x40] sm:$0xff] }
 0x192   :  { %v544_v47 = vld [vmem:[#allocation5 + $0xc18] sm:$0xff]  ;;  %1274 = vmatpush.msrb.mxu1 %v480_v20  ;;  %1255 = vmatmul.f32.vlgmr.msrb.gmra.mxu0 %v1773_v57  ;;  %v1363_v20 = vld [vmem:[#allocation8 + $0x140] sm:$0xff] }
 0x193   :  { %v612_v48 = vld [vmem:[#allocation5 + $0xe38] sm:$0xff]  ;;  %1294 = vmatpush.msrb.mxu2 %v544_v47  ;;  %1275 = vmatmul.f32.vlgmr.msrb.gmra.mxu1 %v1775_v3  ;;  %v817_v47 = vadd.f32 %v2130_v45, %v797_v40  ;;  %v1355_v57 = vld [vmem:[#allocation8 + $0x100] sm:$0xff] }
 0x194   :  { %v1353_v25 = vld [vmem:[#allocation8 + $0xf0] sm:$0xff]  ;;  %1313 = vmatpush.msrb.mxu3 %v612_v48  ;;  %1295 = vmatmul.f32.vlgmr.msrb.gmra.mxu2 %v1772_v31  ;;  %v977_v48 = vadd.f32 %v976_v27, %v957_v41  ;;  %v1387_v3 = vld [vmem:[#allocation8 + $0x200] sm:$0xff]  ;;  %v1378_v12 = vld [vmem:[#allocation8 + $0x1b8] sm:$0xff] }
 0x195   :  { %v1385_v49 = vld [vmem:[#allocation8 + $0x1f0] sm:$0xff]  ;;  %1457 = vmatpush.msra.mxu0 %v1353_v25  ;;  %v2143_v31 = vadd.f32 %v2134_v52, %v817_v47  ;;  %v1386_v52 = vld [vmem:[#allocation8 + $0x1f8] sm:$0xff] }
 0x196   :  { %v608_v50 = vld [vmem:[#allocation5 + $0xe18] sm:$0xff]  ;;  %1477 = vmatpush.msra.mxu1 %v1385_v49  ;;  %v1395_v49 = vld [vmem:[#allocation8 + $0x240] sm:$0xff] }
 0x197   :  { %1314 = vmatpush.msrb.mxu3 %v608_v50  ;;  %v1417_v55 = vld [vmem:[#allocation8 + $0x2f0] sm:$0xff]  ;;  %1458 = vmatpush.msra.mxu0 %v1351_v53  ;;  %v1327_v50 = vld [vmem:[#allocation8 + $0x20] sm:$0xff]  ;;  %v2145_v53 = vadd.f32 %v996_v8, %v977_v48  ;;  %v1342_v19 = vld [vmem:[#allocation8 + $0x98] sm:$0xff] }
 0x198   :  { %v1774_v58 = vld [vmem:[#allocation3 + $0x38] sm:$0xff]  ;;  %1478 = vmatpush.msra.mxu1 %v1383_v54  ;;  %1497 = vmatpush.msra.mxu2 %v1417_v55  ;;  %v1391_v55 = vld [vmem:[#allocation8 + $0x220] sm:$0xff]  ;;  %v1056_v47 = vpop.f32.mrf.mxu2  ;;  %v1400_v48 = vld [vmem:[#allocation8 + $0x268] sm:$0xff] }
 0x199   :  { %1315 = vmatmul.f32.vlgmr.msrb.gmra.mxu3 %v1774_v58  ;;  %v1349_v59 = vld [vmem:[#allocation8 + $0xd0] sm:$0xff]  ;;  %v1319_v58 = vmax.f32 %v2143_v31, 0.0  ;;  %v1406_v0 = vld [vmem:[#allocation8 + $0x298] sm:$0xff]  ;;  %v1423_v31 = vld [vmem:[#allocation8 + $0x320] sm:$0xff] }
 0x19a   :  { %v1381_v60 = vld [vmem:[#allocation8 + $0x1d0] sm:$0xff]  ;;  %1459 = vmatpush.msra.mxu0 %v1349_v59  ;;  %1498 = vmatpush.msra.mxu2 %v1415_v63  ;;  %v1320_v59 = vmax.f32 %v2145_v53, 0.0  ;;  %v1384_v63 = vld [vmem:[#allocation8 + $0x1e8] sm:$0xff]  ;;  %v1334_v40 = vld [vmem:[#allocation8 + $0x58] sm:$0xff] }
 0x19b   :  { %1479 = vmatpush.msra.mxu1 %v1381_v60  ;;  %v1413_v6 = vld [vmem:[#allocation8 + $0x2d0] sm:$0xff]  ;;  %v1354_v60 = vld [vmem:[#allocation8 + $0xf8] sm:$0xff] }
 0x19c   :  { %v1345_v10 = vld [vmem:[#allocation8 + $0xb0] sm:$0xff]  ;;  %1460 = vmatpush.msra.mxu0 %v1347_v4  ;;  %1499 = vmatpush.msra.mxu2 %v1413_v6  ;;  %v1350_v4 = vld [vmem:[#allocation8 + $0xd8] sm:$0xff] }
 0x19d   :  { %v1377_v11 = vld [vmem:[#allocation8 + $0x1b0] sm:$0xff]  ;;  %1480 = vmatpush.msra.mxu1 %v1379_v5  ;;  %v1382_v5 = vld [vmem:[#allocation8 + $0x1d8] sm:$0xff] }
 0x19e   :  { %1461 = vmatpush.msra.mxu0 %v1345_v10  ;;  %v1409_v16 = vld [vmem:[#allocation8 + $0x2b0] sm:$0xff]  ;;  %1500 = vmatpush.msra.mxu2 %v1411_v13  ;;  %v1418_v6 = vld [vmem:[#allocation8 + $0x2f8] sm:$0xff]  ;;  %v1416_v10 = vld [vmem:[#allocation8 + $0x2e8] sm:$0xff] }
 0x19f   :  { %1481 = vmatpush.msra.mxu1 %v1377_v11  ;;  %v1341_v21 = vld [vmem:[#allocation8 + $0x90] sm:$0xff]  ;;  %v1346_v11 = vld [vmem:[#allocation8 + $0xb8] sm:$0xff] }
 0x1a0   :  { %v1373_v22 = vld [vmem:[#allocation8 + $0x190] sm:$0xff]  ;;  %1462 = vmatpush.msra.mxu0 %v1343_v14  ;;  %1501 = vmatpush.msra.mxu2 %v1409_v16  ;;  %v1414_v13 = vld [vmem:[#allocation8 + $0x2d8] sm:$0xff]  ;;  %v1344_v14 = vld [vmem:[#allocation8 + $0xa8] sm:$0xff] }
 0x1a1   :  { %1482 = vmatpush.msra.mxu1 %v1375_v15  ;;  %v1405_v2 = vld [vmem:[#allocation8 + $0x290] sm:$0xff]  ;;  %v1376_v15 = vld [vmem:[#allocation8 + $0x1a8] sm:$0xff]  ;;  %v1366_v41 = vld [vmem:[#allocation8 + $0x158] sm:$0xff] }
 0x1a2   :  { %1463 = vmatpush.msra.mxu0 %v1341_v21  ;;  %v1337_v34 = vld [vmem:[#allocation8 + $0x70] sm:$0xff]  ;;  %1502 = vmatpush.msra.mxu2 %v1407_v23  ;;  %v1374_v21 = vld [vmem:[#allocation8 + $0x198] sm:$0xff]  ;;  %v1372_v23 = vld [vmem:[#allocation8 + $0x188] sm:$0xff] }
 0x1a3   :  { %1483 = vmatpush.msra.mxu1 %v1373_v22  ;;  %v1369_v35 = vld [vmem:[#allocation8 + $0x170] sm:$0xff]  ;;  %v1410_v22 = vld [vmem:[#allocation8 + $0x2b8] sm:$0xff] }
 0x1a4   :  { %1464 = vmatpush.msra.mxu0 %v1339_v28  ;;  %1503 = vmatpush.msra.mxu2 %v1405_v2  ;;  %v1401_v39 = vld [vmem:[#allocation8 + $0x270] sm:$0xff]  ;;  %v1408_v28 = vld [vmem:[#allocation8 + $0x2a8] sm:$0xff]  ;;  %v1370_v2 = vld [vmem:[#allocation8 + $0x178] sm:$0xff] }
 0x1a5   :  { %1484 = vmatpush.msra.mxu1 %v1371_v29  ;;  %v1333_v42 = vld [vmem:[#allocation8 + $0x50] sm:$0xff]  ;;  %v1338_v29 = vld [vmem:[#allocation8 + $0x78] sm:$0xff] }
 0x1a6   :  { %1465 = vmatpush.msra.mxu0 %v1337_v34  ;;  %v1365_v43 = vld [vmem:[#allocation8 + $0x150] sm:$0xff]  ;;  %1504 = vmatpush.msra.mxu2 %v1403_v36  ;;  %v1447_v34 = vld [vmem:[#allocation8 + $0x3e0] sm:$0xff]  ;;  %v1368_v36 = vld [vmem:[#allocation8 + $0x168] sm:$0xff] }
 0x1a7   :  { %1485 = vmatpush.msra.mxu1 %v1369_v35  ;;  %v1397_v46 = vld [vmem:[#allocation8 + $0x250] sm:$0xff]  ;;  %v1362_v8 = vld [vmem:[#allocation8 + $0x138] sm:$0xff] }
 0x1a8   :  { %1466 = vmatpush.msra.mxu0 %v1335_v37  ;;  %1505 = vmatpush.msra.mxu2 %v1401_v39  ;;  %v1329_v25 = vld [vmem:[#allocation8 + $0x30] sm:$0xff]  ;;  %v1016_v37 = vpop.f32.mrf.mxu0  ;;  %v1443_v39 = vld [vmem:[#allocation8 + $0x3c0] sm:$0xff] }
 0x1a9   :  { %1486 = vmatpush.msra.mxu1 %v1367_v38  ;;  %v1361_v26 = vld [vmem:[#allocation8 + $0x130] sm:$0xff]  ;;  %v1404_v38 = vld [vmem:[#allocation8 + $0x288] sm:$0xff] }
 0x1aa   :  { %1467 = vmatpush.msra.mxu0 %v1333_v42  ;;  %1506 = vmatpush.msra.mxu2 %v1399_v44  ;;  %v1393_v32 = vld [vmem:[#allocation8 + $0x230] sm:$0xff]  ;;  %v1017_v42 = vadd.f32 %v1016_v37, %v673_v33  ;;  %v1332_v44 = vld [vmem:[#allocation8 + $0x48] sm:$0xff]  ;;  %v1438_v33 = vld [vmem:[#allocation8 + $0x398] sm:$0xff] }
 0x1ab   :  { %1487 = vmatpush.msra.mxu1 %v1365_v43  ;;  %v1325_v45 = vld [vmem:[#allocation8 + $0x10] sm:$0xff]  ;;  %v1402_v43 = vld [vmem:[#allocation8 + $0x278] sm:$0xff] }
 0x1ac   :  { %1468 = vmatpush.msra.mxu0 %v1331_v24  ;;  %1507 = vmatpush.msra.mxu2 %v1397_v46  ;;  %v1357_v54 = vld [vmem:[#allocation8 + $0x110] sm:$0xff]  ;;  %v1364_v24 = vld [vmem:[#allocation8 + $0x148] sm:$0xff]  ;;  %v1426_v37 = vld [vmem:[#allocation8 + $0x338] sm:$0xff] }
 0x1ad   :  { %1488 = vmatpush.msra.mxu1 %v1363_v20  ;;  %v1389_v61 = vld [vmem:[#allocation8 + $0x210] sm:$0xff]  ;;  %v1036_v20 = vpop.f32.mrf.mxu1 }
 0x1ae   :  { %1469 = vmatpush.msra.mxu0 %v1329_v25  ;;  %1508 = vmatpush.msra.mxu2 %v1395_v49  ;;  %v1449_v16 = vld [vmem:[#allocation8 + $0x3f0] sm:$0xff]  ;;  %v1037_v46 = vadd.f32 %v1036_v20, %v1017_v42  ;;  %v1439_v25 = vld [vmem:[#allocation8 + $0x3a0] sm:$0xff] }
 0x1af   :  { %1489 = vmatpush.msra.mxu1 %v1361_v26  ;;  %1517 = vmatpush.msra.mxu3 %v1449_v16  ;;  %v1445_v35 = vld [vmem:[#allocation8 + $0x3d0] sm:$0xff]  ;;  %v1330_v26 = vld [vmem:[#allocation8 + $0x38] sm:$0xff]  ;;  %v1388_v16 = vld [vmem:[#allocation8 + $0x208] sm:$0xff] }
 0x1b0   :  { %1470 = vmatpush.msra.mxu0 %v1327_v50  ;;  %1509 = vmatpush.msra.mxu2 %v1393_v32  ;;  %v1441_v27 = vld [vmem:[#allocation8 + $0x3b0] sm:$0xff]  ;;  %v1057_v49 = vadd.f32 %v1056_v47, %v1037_v46  ;;  %v1398_v50 = vld [vmem:[#allocation8 + $0x258] sm:$0xff]  ;;  %v1328_v32 = vld [vmem:[#allocation8 + $0x28] sm:$0xff] }
 0x1b1   :  { %1490 = vmatpush.msra.mxu1 %v1359_v51  ;;  %1518 = vmatpush.msra.mxu3 %v1447_v34  ;;  %v1437_v51 = vld [vmem:[#allocation8 + $0x390] sm:$0xff]  ;;  %v1434_v34 = vld [vmem:[#allocation8 + $0x378] sm:$0xff] }
 0x1b2   :  { %1471 = vmatpush.msra.mxu0 %v1325_v45  ;;  %1510 = vmatpush.msra.mxu2 %v1391_v55  ;;  %v1360_v45 = vld [vmem:[#allocation8 + $0x128] sm:$0xff]  ;;  %v1421_v53 = vld [vmem:[#allocation8 + $0x310] sm:$0xff] }
 0x1b3   :  { %1491 = vmatpush.msra.mxu1 %v1357_v54  ;;  %1519 = vmatpush.msra.mxu3 %v1445_v35  ;;  %v1076_v54 = vpop.f32.mrf.mxu3  ;;  %v1432_v35 = vld [vmem:[#allocation8 + $0x368] sm:$0xff] }
 0x1b4   :  { %1472 = vmatpush.msra.mxu0 %v1323_v56  ;;  %1511 = vmatpush.msra.mxu2 %v1389_v61  ;;  %v1077_v55 = vadd.f32 %v1076_v54, %v1057_v49  ;;  %v1396_v56 = vld [vmem:[#allocation8 + $0x248] sm:$0xff]  ;;  %v1451_v54 = vld [vmem:[#allocation10] sm:$0x3] }
 0x1b5   :  { %1492 = vmatpush.msra.mxu1 %v1355_v57  ;;  %1473 = vmatmul.f32.vlgmr.msra.gmra.mxu0 %v1319_v58  ;;  %v1435_v57 = vld [vmem:[#allocation8 + $0x380] sm:$0xff] }
 0x1b6   :  { %1493 = vmatmul.f32.vlgmr.msra.gmra.mxu1 %v1320_v59  ;;  %1537 = vmatpush.msrb.mxu0 %v1354_v60  ;;  %v1326_v60 = vld [vmem:[#allocation8 + $0x18] sm:$0xff] }
 0x1b7   :  { %1557 = vmatpush.msrb.mxu1 %v1386_v52  ;;  %1512 = vmatpush.msra.mxu2 %v1387_v3  ;;  %v1358_v52 = vld [vmem:[#allocation8 + $0x118] sm:$0xff]  ;;  %v1324_v3 = vld [vmem:[#allocation8 + $0x8] sm:$0xff] }
 0x1b8   :  { %1538 = vmatpush.msrb.mxu0 %v1352_v62  ;;  %1520 = vmatpush.msra.mxu3 %v1443_v39  ;;  %v1394_v62 = vld [vmem:[#allocation8 + $0x238] sm:$0xff] }
 0x1b9   :  { %1558 = vmatpush.msrb.mxu1 %v1384_v63  ;;  %1577 = vmatpush.msrb.mxu2 %v1418_v6  ;;  %v1433_v63 = vld [vmem:[#allocation8 + $0x370] sm:$0xff]  ;;  %v1422_v39 = vld [vmem:[#allocation8 + $0x318] sm:$0xff] }
 0x1ba   :  { %1539 = vmatpush.msrb.mxu0 %v1350_v4  ;;  %1521 = vmatpush.msra.mxu3 %v1441_v27  ;;  %v1356_v4 = vld [vmem:[#allocation8 + $0x108] sm:$0xff] }
 0x1bb   :  { %1559 = vmatpush.msrb.mxu1 %v1382_v5  ;;  %1578 = vmatpush.msrb.mxu2 %v1416_v10 }
 0x1bc   :  { %1540 = vmatpush.msrb.mxu0 %v1348_v7  ;;  %1522 = vmatpush.msra.mxu3 %v1439_v25  ;;  %v1392_v7 = vld [vmem:[#allocation8 + $0x228] sm:$0xff] }
 0x1bd   :  { %1560 = vmatpush.msrb.mxu1 %v1380_v9  ;;  %1579 = vmatpush.msrb.mxu2 %v1414_v13  ;;  %v1431_v9 = vld [vmem:[#allocation8 + $0x360] sm:$0xff]  ;;  %v1429_v13 = vld [vmem:[#allocation8 + $0x350] sm:$0xff] }
 0x1be   :  { %1541 = vmatpush.msrb.mxu0 %v1346_v11  ;;  %1523 = vmatpush.msra.mxu3 %v1437_v51 }
 0x1bf   :  { %1561 = vmatpush.msrb.mxu1 %v1378_v12  ;;  %1580 = vmatpush.msrb.mxu2 %v1412_v17  ;;  %v1390_v12 = vld [vmem:[#allocation8 + $0x218] sm:$0xff]  ;;  %v1427_v17 = vld [vmem:[#allocation8 + $0x340] sm:$0xff] }
 0x1c0   :  { %1542 = vmatpush.msrb.mxu0 %v1344_v14  ;;  %1524 = vmatpush.msra.mxu3 %v1435_v57  ;;  %v1453_v57 = vperm.slane %v1451_v54, 0 }
 0x1c1   :  { %1562 = vmatpush.msrb.mxu1 %v1376_v15  ;;  %1581 = vmatpush.msrb.mxu2 %v1410_v22 }
 0x1c2   :  { %1543 = vmatpush.msrb.mxu0 %v1342_v19  ;;  %1525 = vmatpush.msra.mxu3 %v1433_v63 }
 0x1c3   :  { %1563 = vmatpush.msrb.mxu1 %v1374_v21  ;;  %1582 = vmatpush.msrb.mxu2 %v1408_v28  ;;  %v1425_v21 = vld [vmem:[#allocation8 + $0x330] sm:$0xff]  ;;  %v1444_v28 = vld [vmem:[#allocation8 + $0x3c8] sm:$0xff] }
 0x1c4   :  { %1544 = vmatpush.msrb.mxu0 %v1340_v18  ;;  %1526 = vmatpush.msra.mxu3 %v1431_v9  ;;  %v1448_v18 = vld [vmem:[#allocation8 + $0x3e8] sm:$0xff] }
 0x1c5   :  { %1564 = vmatpush.msrb.mxu1 %v1372_v23  ;;  %1583 = vmatpush.msrb.mxu2 %v1406_v0  ;;  %v1446_v23 = vld [vmem:[#allocation8 + $0x3d8] sm:$0xff]  ;;  %v1436_v0 = vld [vmem:[#allocation8 + $0x388] sm:$0xff] }
 0x1c6   :  { %1545 = vmatpush.msrb.mxu0 %v1338_v29  ;;  %v1096_v61 = vpop.f32.mrf.mxu0  ;;  %1527 = vmatpush.msra.mxu3 %v1429_v13  ;;  %v1442_v29 = vld [vmem:[#allocation8 + $0x3b8] sm:$0xff] }
 0x1c7   :  { %1565 = vmatpush.msrb.mxu1 %v1370_v2  ;;  %1584 = vmatpush.msrb.mxu2 %v1404_v38  ;;  %v1097_v5 = vadd.f32 %v1096_v61, %v1077_v55  ;;  %v1440_v2 = vld [vmem:[#allocation8 + $0x3a8] sm:$0xff] }
 0x1c8   :  { %1546 = vmatpush.msrb.mxu0 %v1336_v30  ;;  %1528 = vmatpush.msra.mxu3 %v1427_v17  ;;  %v1430_v30 = vld [vmem:[#allocation8 + $0x358] sm:$0xff]  ;;  %v1424_v38 = vld [vmem:[#allocation8 + $0x328] sm:$0xff] }
 0x1c9   :  { %1566 = vmatpush.msrb.mxu1 %v1368_v36  ;;  %1585 = vmatpush.msrb.mxu2 %v1402_v43  ;;  %v1428_v36 = vld [vmem:[#allocation8 + $0x348] sm:$0xff]  ;;  %v1675_v17 = vld [vmem:[#allocation11 + $0xf0] sm:$0xff] }
 0x1ca   :  { %1547 = vmatpush.msrb.mxu0 %v1334_v40  ;;  %1529 = vmatpush.msra.mxu3 %v1425_v21  ;;  %v1420_v40 = vld [vmem:[#allocation8 + $0x308] sm:$0xff] }
 0x1cb   :  { %1567 = vmatpush.msrb.mxu1 %v1366_v41  ;;  %1586 = vmatpush.msrb.mxu2 %v1400_v48  ;;  %v674_v41 = vperm.slane %v2123_v1, 3  ;;  %v1674_v21 = vld [vmem:[#allocation11 + $0xe8] sm:$0xff] }
 0x1cc   :  { %1548 = vmatpush.msrb.mxu0 %v1332_v44  ;;  %1530 = vmatpush.msra.mxu3 %v1423_v31  ;;  %v1673_v31 = vld [vmem:[#allocation11 + $0xe0] sm:$0xff] }
 0x1cd   :  { %1568 = vmatpush.msrb.mxu1 %v1364_v24  ;;  %1587 = vmatpush.msrb.mxu2 %v1398_v50  ;;  %v1116_v6 = vpop.f32.mrf.mxu1 }
 0x1ce   :  { %1549 = vmatpush.msrb.mxu0 %v1330_v26  ;;  %v1117_v10 = vadd.f32 %v1116_v6, %v1097_v5  ;;  %v1136_v11 = vpop.f32.mrf.mxu2  ;;  %1531 = vmatpush.msra.mxu3 %v1421_v53  ;;  %v1656_v53 = vld [vmem:[#allocation11 + $0x58] sm:$0xff] }
 0x1cf   :  { %1569 = vmatpush.msrb.mxu1 %v1362_v8  ;;  %1588 = vmatpush.msrb.mxu2 %v1396_v56 }
 0x1d0   :  { %1550 = vmatpush.msrb.mxu0 %v1328_v32  ;;  %v1137_v14 = vadd.f32 %v1136_v11, %v1117_v10 }
 0x1d1   :  { %1570 = vmatpush.msrb.mxu1 %v1360_v45  ;;  %1589 = vmatpush.msrb.mxu2 %v1394_v62  ;;  %v1156_v15 = vpop.f32.mrf.mxu3 }
 0x1d2   :  { %1551 = vmatpush.msrb.mxu0 %v1326_v60  ;;  %v1157_v19 = vadd.f32 %v1156_v15, %v1137_v14  ;;  %v1454_v60 = vperm.slane %v1451_v54, 1  ;;  %v1660_v14 = vld [vmem:[#allocation11 + $0x78] sm:$0xff] }
 0x1d3   :  { %1571 = vmatpush.msrb.mxu1 %v1358_v52  ;;  %1590 = vmatpush.msrb.mxu2 %v1392_v7  ;;  %v1676_v15 = vld [vmem:[#allocation11 + $0xf8] sm:$0xff] }
 0x1d4   :  { %1552 = vmatpush.msrb.mxu0 %v1324_v3  ;;  %v1321_v22 = vmax.f32 %v1157_v19, 0.0  ;;  %v1658_v19 = vld [vmem:[#allocation11 + $0x68] sm:$0xff] }
 0x1d5   :  { %1572 = vmatpush.msrb.mxu1 %v1356_v4  ;;  %1553 = vmatmul.f32.vlgmr.msrb.gmra.mxu0 %v1319_v58  ;;  %v1419_v58 = vld [vmem:[#allocation8 + $0x300] sm:$0xff] }
 0x1d6   :  { %1573 = vmatmul.f32.vlgmr.msrb.gmra.mxu1 %v1320_v59  ;;  %1591 = vmatpush.msrb.mxu2 %v1390_v12  ;;  %v1450_v59 = vld [vmem:[#allocation8 + $0x3f8] sm:$0xff] }
 0x1d7   :  { %1513 = vmatmul.f32.vlgmr.msra.gmra.mxu2 %v1321_v22  ;;  %1532 = vmatpush.msra.mxu3 %v1419_v58  ;;  %v1672_v58 = vld [vmem:[#allocation11 + $0xd8] sm:$0xff] }
 0x1d8   :  { %1592 = vmatpush.msrb.mxu2 %v1388_v16  ;;  %v1659_v16 = vld [vmem:[#allocation11 + $0x70] sm:$0xff]  ;;  %1681 = vmatpush.msra.mxu0 %v1660_v14 }
 0x1d9   :  { %1597 = vmatpush.msrb.mxu3 %v1450_v59  ;;  %1701 = vmatpush.msra.mxu1 %v1676_v15  ;;  %v1655_v59 = vld [vmem:[#allocation11 + $0x50] sm:$0xff] }
 0x1da   :  { %1682 = vmatpush.msra.mxu0 %v1659_v16 }
 0x1db   :  { %1598 = vmatpush.msrb.mxu3 %v1448_v18  ;;  %1702 = vmatpush.msra.mxu1 %v1675_v17  ;;  %v1671_v18 = vld [vmem:[#allocation11 + $0xd0] sm:$0xff] }
 0x1dc   :  { %1683 = vmatpush.msra.mxu0 %v1658_v19 }
 0x1dd   :  { %1599 = vmatpush.msrb.mxu3 %v1446_v23  ;;  %1703 = vmatpush.msra.mxu1 %v1674_v21 }
 0x1df   :  { %1593 = vmatmul.f32.vlgmr.msrb.gmra.mxu2 %v1321_v22  ;;  %1600 = vmatpush.msrb.mxu3 %v1444_v28  ;;  %v1657_v22 = vld [vmem:[#allocation11 + $0x60] sm:$0xff] }
 0x1e0   :  { %1684 = vmatpush.msra.mxu0 %v1657_v22  ;;  %1704 = vmatpush.msra.mxu1 %v1673_v31 }
 0x1e1   :  { %1601 = vmatpush.msrb.mxu3 %v1442_v29 }
 0x1e2   :  { %1685 = vmatpush.msra.mxu0 %v1656_v53  ;;  %1705 = vmatpush.msra.mxu1 %v1672_v58 }
 0x1e3   :  { %1602 = vmatpush.msrb.mxu3 %v1440_v2 }
 0x1e4   :  { %1686 = vmatpush.msra.mxu0 %v1655_v59  ;;  %1706 = vmatpush.msra.mxu1 %v1671_v18 }
 0x1e5   :  { %1603 = vmatpush.msrb.mxu3 %v1438_v33 }
 0x1e7   :  { %1604 = vmatpush.msrb.mxu3 %v1436_v0 }
 0x1e9   :  { %1605 = vmatpush.msrb.mxu3 %v1434_v34 }
 0x1eb   :  { %1606 = vmatpush.msrb.mxu3 %v1432_v35 }
 0x1ed   :  { %1607 = vmatpush.msrb.mxu3 %v1430_v30  ;;  %v1654_v30 = vld [vmem:[#allocation11 + $0x48] sm:$0xff] }
 0x1ee   :  { %1687 = vmatpush.msra.mxu0 %v1654_v30 }
 0x1ef   :  { %1608 = vmatpush.msrb.mxu3 %v1428_v36  ;;  %v1670_v36 = vld [vmem:[#allocation11 + $0xc8] sm:$0xff] }
 0x1f0   :  { %1707 = vmatpush.msra.mxu1 %v1670_v36 }
 0x1f1   :  { %1609 = vmatpush.msrb.mxu3 %v1426_v37  ;;  %v1653_v37 = vld [vmem:[#allocation11 + $0x40] sm:$0xff] }
 0x1f2   :  { %1688 = vmatpush.msra.mxu0 %v1653_v37 }
 0x1f3   :  { %1610 = vmatpush.msrb.mxu3 %v1424_v38  ;;  %v1669_v38 = vld [vmem:[#allocation11 + $0xc0] sm:$0xff] }
 0x1f4   :  { %1708 = vmatpush.msra.mxu1 %v1669_v38 }
 0x1f5   :  { %1611 = vmatpush.msrb.mxu3 %v1422_v39  ;;  %v1652_v39 = vld [vmem:[#allocation11 + $0x38] sm:$0xff] }
 0x1f6   :  { %1689 = vmatpush.msra.mxu0 %v1652_v39 }
 0x1f7   :  { %1612 = vmatpush.msrb.mxu3 %v1420_v40  ;;  %v1668_v40 = vld [vmem:[#allocation11 + $0xb8] sm:$0xff] }
 0x1f8   :  { %1709 = vmatpush.msra.mxu1 %v1668_v40 }
 0x203   :  { %v1176_v42 = vpop.f32.mrf.mxu0 }
 0x204   :  { %v1177_v43 = vadd.f32 %v1176_v42, %v674_v41  ;;  %v1196_v27 = vpop.f32.mrf.mxu1  ;;  %v1651_v41 = vld [vmem:[#allocation11 + $0x30] sm:$0xff] }
 0x205   :  { %v1667_v42 = vld [vmem:[#allocation11 + $0xb0] sm:$0xff]  ;;  %1690 = vmatpush.msra.mxu0 %v1651_v41 }
 0x206   :  { %v1197_v44 = vadd.f32 %v1196_v27, %v1177_v43  ;;  %1710 = vmatpush.msra.mxu1 %v1667_v42  ;;  %v1650_v43 = vld [vmem:[#allocation11 + $0x28] sm:$0xff] }
 0x207   :  { %v1216_v24 = vpop.f32.mrf.mxu2  ;;  %v1666_v27 = vld [vmem:[#allocation11 + $0xa8] sm:$0xff]  ;;  %1691 = vmatpush.msra.mxu0 %v1650_v43 }
 0x208   :  { %v1217_v20 = vadd.f32 %v1216_v24, %v1197_v44  ;;  %1711 = vmatpush.msra.mxu1 %v1666_v27  ;;  %v1649_v44 = vld [vmem:[#allocation11 + $0x20] sm:$0xff] }
 0x209   :  { %v1665_v24 = vld [vmem:[#allocation11 + $0xa0] sm:$0xff]  ;;  %1692 = vmatpush.msra.mxu0 %v1649_v44 }
 0x20a   :  { %1712 = vmatpush.msra.mxu1 %v1665_v24 }
 0x20f   :  { %v1236_v46 = vpop.f32.mrf.mxu3  ;;  %v1256_v48 = vpop.f32.mrf.mxu0 }
 0x210   :  { %v1237_v47 = vadd.f32 %v1236_v46, %v1217_v20  ;;  %v1276_v26 = vpop.f32.mrf.mxu1  ;;  %v1648_v20 = vld [vmem:[#allocation11 + $0x18] sm:$0xff] }
 0x211   :  { %v1664_v46 = vld [vmem:[#allocation11 + $0x98] sm:$0xff]  ;;  %1693 = vmatpush.msra.mxu0 %v1648_v20 }
 0x212   :  { %v1257_v25 = vadd.f32 %v1256_v48, %v1237_v47  ;;  %1713 = vmatpush.msra.mxu1 %v1664_v46  ;;  %v1647_v47 = vld [vmem:[#allocation11 + $0x10] sm:$0xff] }
 0x213   :  { %v1663_v48 = vld [vmem:[#allocation11 + $0x90] sm:$0xff]  ;;  %1694 = vmatpush.msra.mxu0 %v1647_v47 }
 0x214   :  { %v1277_v8 = vadd.f32 %v1276_v26, %v1257_v25  ;;  %1714 = vmatpush.msra.mxu1 %v1663_v48  ;;  %v1646_v25 = vld [vmem:[#allocation11 + $0x8] sm:$0xff] }
 0x215   :  { %v1662_v26 = vld [vmem:[#allocation11 + $0x88] sm:$0xff]  ;;  %1695 = vmatpush.msra.mxu0 %v1646_v25 }
 0x216   :  { %1715 = vmatpush.msra.mxu1 %v1662_v26 }
 0x217   :  { %v1296_v49 = vpop.f32.mrf.mxu2 }
 0x218   :  { %v1297_v50 = vadd.f32 %v1296_v49, %v1277_v8  ;;  %v1645_v8 = vld [vmem:[#allocation11] sm:$0xff] }
 0x219   :  { %v1661_v49 = vld [vmem:[#allocation11 + $0x80] sm:$0xff]  ;;  %1696 = vmatpush.msra.mxu0 %v1645_v8 }
 0x21a   :  { %1716 = vmatpush.msra.mxu1 %v1661_v49 }
 0x21c   :  { %v1316_v51 = vpop.f32.mrf.mxu3 }
 0x21d   :  { %v1317_v32 = vadd.f32 %v1316_v51, %v1297_v50 }
 0x21f   :  { %v1322_v45 = vmax.f32 %v1317_v32, 0.0 }
 0x221   :  { %1533 = vmatmul.f32.vlgmr.msra.gmra.mxu3 %v1322_v45 }
 0x229   :  { %1613 = vmatmul.f32.vlgmr.msrb.gmra.mxu3 %v1322_v45 }
 0x232   :  { %v1474_v1 = vpop.f32.mrf.mxu0 }
 0x233   :  { %v1494_v56 = vpop.f32.mrf.mxu1  ;;  %v1475_v62 = vadd.f32 %v1474_v1, %v1453_v57 }
 0x235   :  { %v1495_v5 = vadd.f32 %v1494_v56, %v1475_v62 }
 0x252   :  { %v1554_v52 = vpop.f32.mrf.mxu0 }
 0x253   :  { %v1555_v63 = vadd.f32 %v1554_v52, %v1454_v60  ;;  %v1574_v3 = vpop.f32.mrf.mxu1 }
 0x255   :  { %v1575_v6 = vadd.f32 %v1574_v3, %v1555_v63  ;;  %v1759_v63 = vld [vmem:[#allocation13] ss:$0 sm:$0xff] }
 0x25a   :  { %v1514_v55 = vpop.f32.mrf.mxu2 }
 0x25b   :  { %v1515_v7 = vadd.f32 %v1514_v55, %v1495_v5 }
 0x262   :  { %v1594_v4 = vpop.f32.mrf.mxu2 }
 0x263   :  { %v1595_v9 = vadd.f32 %v1594_v4, %v1575_v6 }
 0x2a4   :  { %v1534_v61 = vpop.f32.mrf.mxu3 }
 0x2a5   :  { %v1535_v11 = vadd.f32 %v1534_v61, %v1515_v7  ;;  %v1760_v7 = vld [vmem:[#allocation14] ss:$0 sm:$0xff] }
 0x2ac   :  { %v1614_v10 = vpop.f32.mrf.mxu3 }
 0x2ad   :  { %v1615_v12 = vadd.f32 %v1614_v10, %v1595_v9 }
 0x2af   :  { %v1617_v13 = vmax.f32 %v1535_v11, %v1615_v12 }
 0x2b1   :  { %1618 = vmax.xlane.f32.xlu0 %v1617_v13 }
 0x324   :  { %v1619_v23 = vpop.xlane.xlu0 %1618 }
 0x325   :  { %v1620_v28 = vsub.f32 %v1535_v11, %v1619_v23  ;;  %v1621_v29 = vsub.f32 %v1615_v12, %v1619_v23  ;;  %v1761_v11 = vld [vmem:[#allocation2] ss:$0 sm:$0xff] }
 0x327   :  { %v1622_v2 = vmul.f32 1.442695, %v1620_v28  ;;  %v1624_v33 = vmul.f32 1.442695, %v1621_v29 }
 0x329   :  { %1762 = vpow2.f32 %v1622_v2 }
 0x32a   :  { %1764 = vpow2.f32 %v1624_v33 }
 0x32f   :  { %v1763_v0 = vpop.eup %1762 }
 0x330   :  { %v1765_v34 = vpop.eup %1764 }
 0x331   :  { %v1626_v35 = vadd.f32 %v1765_v34, %v1763_v0 }
 0x333   :  { %1627 = vadd.xlane.f32.xlu0 %v1626_v35 }
 0x3a6   :  { %v1628_v50 = vpop.xlane.xlu0 %1627 }
 0x3a7   :  { %1766 = vrcp.f32 %v1628_v50  ;;  %v1640_v1 = vand.u32 2147483648, %v1628_v50  ;;  %v1638_v55 = vand.u32 2147483647, %v1628_v50  ;;  %vm1634_vm1 = vweird.f32 %v1628_v50 }
 0x3a9   :  { %v1641_v57 = vor.u32 1.1754944e-38, %v1640_v1  ;;  %vm1639_vm3 = vcmp.eq.f32.partialorder %v1638_v55, 8.507059e+37 }
 0x3ad   :  { %v1767_v51 = vpop.eup %1766 }
 0x3ae   :  { %v1630_v32 = vmul.f32 %v1767_v51, %v1628_v50  ;;  %vm1635_vm0 = vweird.f32 %v1767_v51 }
 0x3af   :  { %vm1636_vm2 = vmor %vm1634_vm1, %vm1635_vm0 }
 0x3b0   :  { %v1631_v45 = vsub.f32 1.0, %v1630_v32 }
 0x3b2   :  { %v1632_v54 = vmul.f32 %v1767_v51, %v1631_v45 }
 0x3b4   :  { %v1633_v56 = vadd.f32 %v1767_v51, %v1632_v54 }
 0x3b6   :  { %v1637_v60 = vsel %vm1636_vm2, %v1767_v51, %v1633_v56 }
 0x3b7   :  { %v1642_v52 = vsel %vm1639_vm3, %v1641_v57, %v1637_v60 }
 0x3b8   :  { %v1643_v61 = vmul.f32 %v1763_v0, %v1642_v52  ;;  %v1644_v62 = vmul.f32 %v1765_v34, %v1642_v52 }
 0x3ba   :  { %1697 = vmatmul.f32.vlgmr.msra.gmra.mxu0 %v1643_v61  ;;  %1717 = vmatmul.f32.vlgmr.msra.gmra.mxu1 %v1644_v62 }
 0x437   :  { %v1698_v3 = vpop.f32.mrf.mxu0  ;;  %v1718_v5 = vpop.f32.mrf.mxu1 }
 0x438   :  { %v1699_v4 = vadd.f32 %v1759_v63, %v1698_v3 }
 0x43a   :  { %v1719_v6 = vadd.f32 %v1718_v5, %v1699_v4 }
 0x43c   :  { %v1721_v9 = vmax.f32 %v1719_v6, 0.0 }
 0x43e   :  { %v1726_v10 = vmul.f32 %v1760_v7, %v1721_v9 }
 0x440   :  { %1727 = vadd.xlane.f32.xlu1 %v1726_v10 }
 0x4b3   :  { %v1728_v12 = vpop.xlane.xlu1 %1727 }
 0x4b4   :  { %v1733_v13 = vadd.f32 %v1761_v11, %v1728_v12 }
 0x4b6   :  { %1735 = vst.msk [vmem:[%s2171_s9] sm:$0xff] %vm1734_vm4, %v1733_v13 }
 0x4b7   :  { %1740 = vsyncpa [#allocation4], 1 }
 0x4b8   :  { %1741 = vsyncpa [#allocation6], 1 }
 0x4b9   :  { %1742 = vsyncpa [#allocation9], 1 }
 0x4ba   :  { %1743 = vsyncpa [#allocation12], 1 }
 0x4bb   :  { %1744 = vsyncpa [#allocation15], 1 }

</bundles_post_ra>
